<compile_context>
chip_gen: v6e
topology: v6e:2x2x1
jax: 0.10.0
libtpu: 0.0.40
codegen_flags: <defaults>
</compile_context>

<pallas_src>
import math
from functools import partial

import jax
import jax.numpy as jnp
from jax.experimental import pallas as pl
from jax.experimental.pallas import tpu as pltpu


# --------------------------------------------------------------------------- kernel
def _expand_ln_kernel(x_ref, w_ref, seg_ref, segT_ref, g_ref, b_ref,
                      o_ref, acc_ref, *, eps, inv_c):
    """One (tm, 16*dim) output tile: matmul-accumulate over K, then segmented LN."""
    kk = pl.program_id(1)

    @pl.when(kk == 0)
    def _init():
        acc_ref[...] = jnp.zeros_like(acc_ref)

    # bf16 x bf16 -> f32 accumulation on the MXU.
    acc_ref[...] += jnp.dot(x_ref[...], w_ref[...],
                            preferred_element_type=jnp.float32)

    @pl.when(kk == pl.num_programs(1) - 1)
    def _finalize():
        y = acc_ref[...]                                    # (tm, N16) f32
        seg = seg_ref[...]                                  # (N16, P2) one-hot
        segT = segT_ref[...]                                # (P2, N16)

        # Per-segment LayerNorm (each of the P2=16 contiguous dim-sized chunks
        # of a row is one output pixel's channel vector).
        mean = jnp.dot(y, seg, preferred_element_type=jnp.float32) * inv_c     # (tm, P2)
        mean_b = jnp.dot(mean, segT, preferred_element_type=jnp.float32)       # (tm, N16)
        d = y - mean_b
        var = jnp.dot(d * d, seg, preferred_element_type=jnp.float32) * inv_c  # (tm, P2)
        rstd_b = jnp.dot(jax.lax.rsqrt(var + eps), segT,
                         preferred_element_type=jnp.float32)                   # (tm, N16)

        o_ref[...] = (d * rstd_b * g_ref[...] + b_ref[...]).astype(o_ref.dtype)


# -------------------------------------------------------------------------- wrapper
def final_patch_expand_x4(x, w_expand, gamma, beta, *, dim_scale=4, eps=1e-5):
    """x: (B, H, W, dim) f32. w_expand: (16*dim, dim) (nn.Linear layout).
    gamma/beta: (dim,). Returns (B, 4H, 4W, dim) f32."""
    B, H, W, C = x.shape
    P = dim_scale
    P2 = P * P
    N16 = P2 * C
    M = B * H * W

    # bf16 operands for the MXU (f32 accumulation inside the kernel).
    xf = x.reshape(M, C).astype(jnp.bfloat16)
    wt = jnp.transpose(w_expand).astype(jnp.bfloat16)       # (C, N16)

    # Tiling.
    tm = 128 if N16 >= 4096 else 256
    tk = 256 if (C % 256 == 0) else C                        # full-K block for small dim
    Mp = pl.cdiv(M, tm) * tm
    if Mp != M:
        xf = jnp.pad(xf, ((0, Mp - M), (0, 0)))

    # One-hot segment matrices for the per-(p1,p2) LayerNorm, and tiled affine params.
    seg = (jnp.arange(N16)[:, None] // C ==
           jnp.arange(P2)[None, :]).astype(jnp.float32)      # (N16, P2)
    segT = jnp.transpose(seg)                                # (P2, N16)
    g_t = jnp.tile(gamma.astype(jnp.float32), P2).reshape(1, N16)
    b_t = jnp.tile(beta.astype(jnp.float32), P2).reshape(1, N16)

    out = pl.pallas_call(
        partial(_expand_ln_kernel, eps=eps, inv_c=1.0 / C),
        out_shape=jax.ShapeDtypeStruct((Mp, N16), jnp.float32),
        grid_spec=pltpu.PrefetchScalarGridSpec(
            num_scalar_prefetch=0,
            grid=(Mp // tm, C // tk),
            in_specs=[
                pl.BlockSpec((tm, tk), lambda i, k: (i, k)),
                pl.BlockSpec((tk, N16), lambda i, k: (k, 0)),
                pl.BlockSpec((N16, P2), lambda i, k: (0, 0)),
                pl.BlockSpec((P2, N16), lambda i, k: (0, 0)),
                pl.BlockSpec((1, N16), lambda i, k: (0, 0)),
                pl.BlockSpec((1, N16), lambda i, k: (0, 0)),
            ],
            out_specs=pl.BlockSpec((tm, N16), lambda i, k: (i, 0)),
            scratch_shapes=[pltpu.VMEM((tm, N16), jnp.float32)],
        ),
        compiler_params=pltpu.CompilerParams(
            dimension_semantics=("parallel", "arbitrary")),
    )(xf, wt, seg, segT, g_t, b_t)

    y = out[:M]                                               # (M, 16*dim)
    # rearrange 'b h w (p1 p2 c) -> b (h p1) (w p2) c'  (layout plumbing, wrapper-side)
    y = y.reshape(B, H, W, P, P, C).transpose(0, 1, 3, 2, 4, 5)
    return y.reshape(B, H * P, W * P, C)


# ----------------------------------------------------------------- pure-JAX reference
def _reference(x, w_expand, gamma, beta, *, dim_scale=4, eps=1e-5):
    B, H, W, C = x.shape
    P = dim_scale
    y = jnp.dot(x.reshape(-1, C).astype(jnp.bfloat16),
                jnp.transpose(w_expand).astype(jnp.bfloat16),
                preferred_element_type=jnp.float32)
    y = y.reshape(B, H, W, P, P, C).transpose(0, 1, 3, 2, 4, 5)
    y = y.reshape(B, H * P, W * P, C)
    mu = jnp.mean(y, axis=-1, keepdims=True)
    var = jnp.mean((y - mu) ** 2, axis=-1, keepdims=True)
    return (y - mu) * jax.lax.rsqrt(var + eps) * gamma + beta


# ----------------------------------------------------------------------------- main
if __name__ == "__main__":
    dim = 32
    B, H, W = 2, 16, 16

    key = jax.random.PRNGKey(0)
    kx, kw, kg, kb = jax.random.split(key, 4)
    x = jax.random.normal(kx, (B, H, W, dim), jnp.float32)
    w_expand = jax.random.normal(kw, (16 * dim, dim), jnp.float32) / math.sqrt(dim)
    gamma = 1.0 + 0.1 * jax.random.normal(kg, (dim,), jnp.float32)
    beta = 0.1 * jax.random.normal(kb, (dim,), jnp.float32)

    fwd = jax.jit(final_patch_expand_x4)
    out = jax.block_until_ready(fwd(x, w_expand, gamma, beta))

    assert out.shape == (B, 4 * H, 4 * W, dim)
    assert bool(jnp.all(jnp.isfinite(out)))

    ref = jax.block_until_ready(_reference(x, w_expand, gamma, beta))
    max_err = float(jnp.max(jnp.abs(out - ref)))
    assert max_err < 5e-2, f"max abs err {max_err}"

    print("KERNEL_OK")
</pallas_src>

<mosaic_0001>
module attributes {stable_mosaic.version = 11 : i64} {
  func.func @_expand_ln_kernel(%arg0: i32, %arg1: i32, %arg2: memref<256x32xbf16, #tpu.memory_space<vmem>>, %arg3: memref<32x512xbf16, #tpu.memory_space<vmem>>, %arg4: memref<512x16xf32, #tpu.memory_space<vmem>>, %arg5: memref<16x512xf32, #tpu.memory_space<vmem>>, %arg6: memref<1x512xf32, #tpu.memory_space<vmem>>, %arg7: memref<1x512xf32, #tpu.memory_space<vmem>>, %arg8: memref<256x512xf32, #tpu.memory_space<vmem>>, %arg9: memref<256x512xf32, #tpu.memory_space<vmem>>) attributes {dimension_semantics = [#tpu.dimension_semantics<parallel>, #tpu.dimension_semantics<arbitrary>], iteration_bounds = array<i64: 2, 1>, scalar_prefetch = 0 : i64, scratch_operands = 1 : i64, tpu.core_type = #tpu.core_type<tc>, window_params = [{transform_indices = @transform_0, window_bounds = array<i64: 256, 32>}, {transform_indices = @transform_1, window_bounds = array<i64: 32, 512>}, {pipeline_mode = #tpu.pipeline_mode<synchronous>, transform_indices = @transform_2, window_bounds = array<i64: 512, 16>}, {pipeline_mode = #tpu.pipeline_mode<synchronous>, transform_indices = @transform_3, window_bounds = array<i64: 16, 512>}, {pipeline_mode = #tpu.pipeline_mode<synchronous>, transform_indices = @transform_4, window_bounds = array<i64: 1, 512>}, {pipeline_mode = #tpu.pipeline_mode<synchronous>, transform_indices = @transform_5, window_bounds = array<i64: 1, 512>}, {transform_indices = @transform_6, window_bounds = array<i64: 256, 512>}]} {
    %c0_i32 = arith.constant 0 : i32
    %0 = arith.cmpi eq, %arg1, %c0_i32 : i32
    %1 = arith.extui %0 : i1 to i32
    %c0_i32_0 = arith.constant 0 : i32
    %2 = arith.cmpi ne, %1, %c0_i32_0 : i32
    scf.if %2 {
      %cst_10 = arith.constant 0.000000e+00 : f32
      %12 = vector.broadcast %cst_10 : f32 to vector<256x512xf32>
      %c0_11 = arith.constant 0 : index
      %c0_12 = arith.constant 0 : index
      %13 = vector.load %arg9[%c0_11, %c0_12] : memref<256x512xf32, #tpu.memory_space<vmem>>, vector<256x512xf32>
      tpu.vector_store %arg9[%c0_11, %c0_12], %12 {strides = array<i32>} : memref<256x512xf32, #tpu.memory_space<vmem>>, vector<256x512xf32>,
    } else {
    }
    %c0 = arith.constant 0 : index
    %c0_1 = arith.constant 0 : index
    %3 = vector.load %arg9[%c0, %c0_1] : memref<256x512xf32, #tpu.memory_space<vmem>>, vector<256x512xf32>
    %c0_2 = arith.constant 0 : index
    %c0_3 = arith.constant 0 : index
    %4 = vector.load %arg2[%c0_2, %c0_3] : memref<256x32xbf16, #tpu.memory_space<vmem>>, vector<256x32xbf16>
    %c0_4 = arith.constant 0 : index
    %c0_5 = arith.constant 0 : index
    %5 = vector.load %arg3[%c0_4, %c0_5] : memref<32x512xbf16, #tpu.memory_space<vmem>>, vector<32x512xbf16>
    %cst = arith.constant dense<0.000000e+00> : vector<256x512xf32>
    %6 = tpu.matmul %4, %5, %cst {dimension_numbers = #tpu.dot_dimension_numbers<[1], [0], [0], [1], [0, 0, 1, 1], [], []>} : vector<256x32xbf16>, vector<32x512xbf16>, vector<256x512xf32> -> vector<256x512xf32>
    %7 = arith.addf %3, %6 : vector<256x512xf32>
    %c0_6 = arith.constant 0 : index
    %c0_7 = arith.constant 0 : index
    %8 = vector.load %arg9[%c0_6, %c0_7] : memref<256x512xf32, #tpu.memory_space<vmem>>, vector<256x512xf32>
    tpu.vector_store %arg9[%c0_6, %c0_7], %7 {strides = array<i32>} : memref<256x512xf32, #tpu.memory_space<vmem>>, vector<256x512xf32>,
    %c0_i32_8 = arith.constant 0 : i32
    %9 = arith.cmpi eq, %arg1, %c0_i32_8 : i32
    %10 = arith.extui %9 : i1 to i32
    %c0_i32_9 = arith.constant 0 : i32
    %11 = arith.cmpi ne, %10, %c0_i32_9 : i32
    scf.if %11 {
      %c0_10 = arith.constant 0 : index
      %c0_11 = arith.constant 0 : index
      %12 = vector.load %arg9[%c0_10, %c0_11] : memref<256x512xf32, #tpu.memory_space<vmem>>, vector<256x512xf32>
      %c0_12 = arith.constant 0 : index
      %c0_13 = arith.constant 0 : index
      %13 = vector.load %arg4[%c0_12, %c0_13] : memref<512x16xf32, #tpu.memory_space<vmem>>, vector<512x16xf32>
      %c0_14 = arith.constant 0 : index
      %c0_15 = arith.constant 0 : index
      %14 = vector.load %arg5[%c0_14, %c0_15] : memref<16x512xf32, #tpu.memory_space<vmem>>, vector<16x512xf32>
      %cst_16 = arith.constant dense<0.000000e+00> : vector<256x16xf32>
      %15 = tpu.matmul %12, %13, %cst_16 {dimension_numbers = #tpu.dot_dimension_numbers<[1], [0], [0], [1], [0, 0, 1, 1], [], []>} : vector<256x512xf32>, vector<512x16xf32>, vector<256x16xf32> -> vector<256x16xf32>
      %cst_17 = arith.constant 3.125000e-02 : f32
      %16 = vector.broadcast %cst_17 : f32 to vector<256x16xf32>
      %17 = arith.mulf %15, %16 : vector<256x16xf32>
      %cst_18 = arith.constant dense<0.000000e+00> : vector<256x512xf32>
      %18 = tpu.matmul %17, %14, %cst_18 {dimension_numbers = #tpu.dot_dimension_numbers<[1], [0], [0], [1], [0, 0, 1, 1], [], []>} : vector<256x16xf32>, vector<16x512xf32>, vector<256x512xf32> -> vector<256x512xf32>
      %19 = arith.subf %12, %18 : vector<256x512xf32>
      %20 = arith.mulf %19, %19 : vector<256x512xf32>
      %cst_19 = arith.constant dense<0.000000e+00> : vector<256x16xf32>
      %21 = tpu.matmul %20, %13, %cst_19 {dimension_numbers = #tpu.dot_dimension_numbers<[1], [0], [0], [1], [0, 0, 1, 1], [], []>} : vector<256x512xf32>, vector<512x16xf32>, vector<256x16xf32> -> vector<256x16xf32>
      %cst_20 = arith.constant 3.125000e-02 : f32
      %22 = vector.broadcast %cst_20 : f32 to vector<256x16xf32>
      %23 = arith.mulf %21, %22 : vector<256x16xf32>
      %cst_21 = arith.constant 9.99999974E-6 : f32
      %24 = vector.broadcast %cst_21 : f32 to vector<256x16xf32>
      %25 = arith.addf %23, %24 : vector<256x16xf32>
      %26 = math.rsqrt %25 : vector<256x16xf32>
      %cst_22 = arith.constant dense<0.000000e+00> : vector<256x512xf32>
      %27 = tpu.matmul %26, %14, %cst_22 {dimension_numbers = #tpu.dot_dimension_numbers<[1], [0], [0], [1], [0, 0, 1, 1], [], []>} : vector<256x16xf32>, vector<16x512xf32>, vector<256x512xf32> -> vector<256x512xf32>
      %28 = arith.mulf %19, %27 : vector<256x512xf32>
      %c0_23 = arith.constant 0 : index
      %c0_24 = arith.constant 0 : index
      %29 = vector.load %arg6[%c0_23, %c0_24] : memref<1x512xf32, #tpu.memory_space<vmem>>, vector<1x512xf32>
      %30 = vector.broadcast %29 : vector<1x512xf32> to vector<256x512xf32>
      %31 = arith.mulf %28, %30 : vector<256x512xf32>
      %c0_25 = arith.constant 0 : index
      %c0_26 = arith.constant 0 : index
      %32 = vector.load %arg7[%c0_25, %c0_26] : memref<1x512xf32, #tpu.memory_space<vmem>>, vector<1x512xf32>
      %33 = vector.broadcast %32 : vector<1x512xf32> to vector<256x512xf32>
      %34 = arith.addf %31, %33 : vector<256x512xf32>
      %c0_27 = arith.constant 0 : index
      %c0_28 = arith.constant 0 : index
      %35 = vector.load %arg8[%c0_27, %c0_28] : memref<256x512xf32, #tpu.memory_space<vmem>>, vector<256x512xf32>
      tpu.vector_store %arg8[%c0_27, %c0_28], %34 {strides = array<i32>} : memref<256x512xf32, #tpu.memory_space<vmem>>, vector<256x512xf32>,
    } else {
    }
    return
  }
  func.func @transform_0(%arg0: i32, %arg1: i32) -> (i32, i32) {
    %c0_i32 = arith.constant 0 : i32
    return %arg0, %arg1 : i32, i32
  }
  func.func @transform_1(%arg0: i32, %arg1: i32) -> (i32, i32) {
    %c0_i32 = arith.constant 0 : i32
    %c0_i32_0 = arith.constant 0 : i32
    return %arg1, %c0_i32 : i32, i32
  }
  func.func @transform_2(%arg0: i32, %arg1: i32) -> (i32, i32) {
    %c0_i32 = arith.constant 0 : i32
    %c0_i32_0 = arith.constant 0 : i32
    %c0_i32_1 = arith.constant 0 : i32
    return %c0_i32, %c0_i32_0 : i32, i32
  }
  func.func @transform_3(%arg0: i32, %arg1: i32) -> (i32, i32) {
    %c0_i32 = arith.constant 0 : i32
    %c0_i32_0 = arith.constant 0 : i32
    %c0_i32_1 = arith.constant 0 : i32
    return %c0_i32, %c0_i32_0 : i32, i32
  }
  func.func @transform_4(%arg0: i32, %arg1: i32) -> (i32, i32) {
    %c0_i32 = arith.constant 0 : i32
    %c0_i32_0 = arith.constant 0 : i32
    %c0_i32_1 = arith.constant 0 : i32
    return %c0_i32, %c0_i32_0 : i32, i32
  }
  func.func @transform_5(%arg0: i32, %arg1: i32) -> (i32, i32) {
    %c0_i32 = arith.constant 0 : i32
    %c0_i32_0 = arith.constant 0 : i32
    %c0_i32_1 = arith.constant 0 : i32
    return %c0_i32, %c0_i32_0 : i32, i32
  }
  func.func @transform_6(%arg0: i32, %arg1: i32) -> (i32, i32) {
    %c0_i32 = arith.constant 0 : i32
    %c0_i32_0 = arith.constant 0 : i32
    return %arg0, %c0_i32 : i32, i32
  }
}

</mosaic_0001>

<bundles_post_ra>
// kernel: tile.13
= control target key start
LH: loop header
LB: loop body
LE: loop exit
PB: predicated region body
PF: predicated region fallthrough
CT: control target
= control target key end

     0   :  { %2 = vsyncpa [#allocation1], 0  ;;  %s45_s6 = smov [#allocation0]   ;;  %s65_s0 = inlined_call_operand.hbm [shape: f32[32], index: 0, kind: input, shape index: {}]   ;;  %s66_s1 = inlined_call_operand.vmem [shape: f32[16,32], index: 1, kind: output, shape index: {}]  }
   0x1   :  { %s9_s7 = sshll.u32 %s45_s6, 4  ;;  %s10_s7 = int_to_ptr.vmem [resolvable:$true] %s9_s7 }
   0x2   :  { %s31_s8 = scalar_lea.vmem %s10_s7, 16  ;;  %s35_s9 = scalar_lea.vmem %s10_s7, 32 }
   0x3   :  { %p32_p0 = scmp.ne.s32.totalorder %s10_s7, %s31_s8  ;;  %p36_p1 = scmp.lt.s32.totalorder %s10_s7, %s10_s7 }
   0x4   :  { %p37_p2 = scmp.lt.s32.totalorder %s35_s9, %s31_s8 }
   0x6   :  { %p38_p3 = por %p37_p2, %p36_p1 }
   0x8   :  { %p39_p4 = pnand %p38_p3, %p32_p0 }
   0xa   :  { %42 = shalt.err (!%p39_p4)
}
   0xb   :  { %12 = dma.hbm_to_vmem [thread:$0]  %s65_s0, 16, %s10_s7, [#allocation1]  }
   0xc   :  { %43 = dma.done.wait [#allocation1], 16  }
   0xd   :  { %44 = vsyncadd [#allocation1], 4294967280  ;;  %v16_v0 = vld [vmem:[#allocation0] ss:$0 sm:$0xff] }
   0xe   :  { %17 = vst [vmem:[%s66_s1] sm:$0xff] %v16_v0  ;;  %21 = vst [vmem:[%s66_s1 + $0x8] sm:$0xff] %v16_v0 }
   0xf   :  { %20 = vsyncpa [#allocation1], 1 }

// kernel: tile.14
= control target key start
LH: loop header
LB: loop body
LE: loop exit
PB: predicated region body
PF: predicated region fallthrough
CT: control target
= control target key end

     0   :  { %s62_s8 = smov 96   ;;  %vm3_vm0 = vcmask 261120   ;;  %s64_s15 = smov 64   ;;  %vm9_vm1 = vcmask 1048320   ;;  %vm15_vm2 = vcmask 785920   ;;  %vm21_vm3 = vcmask 523520   ;;  %s99_s0 = inlined_call_operand.vmem [shape: f32[16,32], index: 0, kind: input, shape index: {}]   ;;  %s100_s1 = inlined_call_operand.vmem [shape: f32[1,512], index: 1, kind: output, shape index: {}]  }
   0x1   :  { %v53_v0 = vld [vmem:[%s99_s0 + $0x3] ss:$4 sm:$0xf]   ;;  %v54_v1 = vld [vmem:[%s99_s0 + $0x2] ss:$4 sm:$0xf]  }
   0x2   :  { %7 = vrot.lane.b32.xlu0 %v53_v0, %s62_s8  ;;  %v55_v2 = vld [vmem:[%s99_s0 + $0x1] ss:$4 sm:$0xf]   ;;  %v2_v3 = vld [vmem:[%s99_s0] ss:$4 sm:$0xf]  }
   0x3   :  { %s63_s0 = smov 32   ;;  %4 = vst.msk [vmem:[#allocation0] ss:$8 sm:$0xf] %vm3_vm0, %v2_v3  }
   0x4   :  { %19 = vrot.lane.b32.xlu1 %v55_v2, %s63_s0 }
   0x6   :  { %13 = vrot.lane.b32.xlu0 %v54_v1, %s64_s15 }
  0x74   :  { %v8_v4 = vpop.permute.xlu0 %7  }
  0x75   :  { %10 = vst.msk [vmem:[#allocation0] ss:$8 sm:$0xf] %vm9_vm1, %v8_v4  }
  0x76   :  { %v20_v5 = vpop.permute.xlu1 %19  }
  0x78   :  { %v14_v6 = vpop.permute.xlu0 %13  }
  0x79   :  { %16 = vst.msk [vmem:[#allocation0] ss:$8 sm:$0xf] %vm15_vm2, %v14_v6  }
  0x7a   :  { %22 = vst.msk [vmem:[#allocation0] ss:$8 sm:$0xf] %vm21_vm3, %v20_v5  }
  0x81   :  { %v27_v7 = vld [vmem:[#allocation0] sm:$0x1]  ;;  %v32_v8 = vld [vmem:[#allocation0 + $0x8] sm:$0x1]  ;;  %v38_v9 = vld [vmem:[#allocation0 + $0x10] sm:$0x1] }
  0x82   :  { %30 = vst [vmem:[%s100_s1] sm:$0x1] %v27_v7  ;;  %56 = vst [vmem:[%s100_s1 + $0x1] sm:$0x1] %v32_v8  ;;  %v45_v10 = vld [vmem:[#allocation0 + $0x18] sm:$0x1] }
  0x83   :  { %57 = vst [vmem:[%s100_s1 + $0x2] sm:$0x1] %v38_v9  ;;  %58 = vst [vmem:[%s100_s1 + $0x3] sm:$0x1] %v45_v10 }

// kernel: final_patch_expand_x4.1
= control target key start
LH: loop header
LB: loop body
LE: loop exit
PB: predicated region body
PF: predicated region fallthrough
CT: control target
= control target key end

     0   :  { %s5215_s21 = smov 0   ;;  %s5217_s22 = smov 0   ;;  %s7734_s0 = inlined_call_operand.vmem [shape: bf16[512,32], index: 0, kind: input, shape index: {}]   ;;  %s7735_s1 = inlined_call_operand.vmem [shape: bf16[32,512], index: 1, kind: input, shape index: {}]   ;;  %s7736_s2 = inlined_call_operand.vmem [shape: f32[512,16], index: 2, kind: input, shape index: {}]   ;;  %s7737_s3 = inlined_call_operand.vmem [shape: f32[16,512], index: 3, kind: input, shape index: {}]   ;;  %s7738_s4 = inlined_call_operand.vmem [shape: f32[1,512], index: 4, kind: input, shape index: {}]   ;;  %s7739_s5 = inlined_call_operand.vmem [shape: f32[1,512], index: 5, kind: input, shape index: {}]   ;;  %s7740_s6 = inlined_call_operand.vmem [shape: f32[512,512], index: 6, kind: output, shape index: {}]  }
   0x1   :  { %s5219_s23 = smov 0  }
   0x2 LB: > { %s28_s24 = sadd.s32 1, %s5172_s22  ;;  %p4771_p0 = scmp.ge.s32.totalorder %s5176_s23, 1  ;;  %s5176_s23 = sphi %s5219_s23, %s16_s23   ;;  %s5172_s22 = sphi %s5217_s22, %s8237_s22   ;;  %s5168_s21 = sphi %s5215_s21, %s8236_s21  }
   0x3   : > { %p30_p1 = scmp.ge.s32.totalorder %s28_s24, 2  ;;  %p242_p2 = scmp.lt.s32.totalorder %s5176_s23, 3 }
   0x5   : > { %s8239_s24 = smov (%p30_p1, %s28_s24), 0  ;;  %p243_p3 = pnand %p4771_p0, %p242_p2 }
   0x7   : > { %246 = sbr.rel (%p243_p3) target bundleno = 1156 (0x484), region = 44 }
   0xc   : > { %v4990_v0 = vld [vmem:[%s7735_s1 + $0x24] ss:$16 sps:$4 sm:$0xff]   ;;  %s4772_s27 = sshll.u32 %s5168_s21, 5  ;;  %v4992_v1 = vld [vmem:[%s7735_s1 + $0x2c] ss:$16 sps:$4 sm:$0xff]   ;;  %v5178_v2 = vmov 0  }
   0xd   : > { %807 = vmatprep.mubr.bf16.mxu0 %v5178_v2  ;;  %1000 = vmatprep.mubr.bf16.mxu1 %v5178_v2  ;;  %p283_p4 = scmp.lt.s32.totalorder %s4772_s27, 63  ;;  %v4994_v3 = vld [vmem:[%s7735_s1 + $0x20] ss:$16 sps:$4 sm:$0xff]   ;;  %v4995_v4 = vld [vmem:[%s7735_s1 + $0x28] ss:$16 sps:$4 sm:$0xff]   ;;  %vm726_vm0 = vcmask 261120  }
   0xe   : > { %787 = vmatprep.subr.bf16.mxu0 %v4990_v0  ;;  %980 = vmatprep.subr.bf16.mxu1 %v4992_v1  ;;  %v4996_v5 = vld [vmem:[%s7735_s1 + $0x4] ss:$16 sps:$4 sm:$0xff]   ;;  %v4998_v6 = vld [vmem:[%s7735_s1 + $0xc] ss:$16 sps:$4 sm:$0xff]   ;;  %v5000_v7 = vld [vmem:[%s7735_s1] ss:$16 sps:$4 sm:$0xff]  }
   0xf   : > { %s8241_s27 = smov (!%p283_p4, %s4772_s27), 63  ;;  %788 = vmatpush1.bf16.msra.mxu0 %v4994_v3  ;;  %981 = vmatpush1.bf16.msra.mxu1 %v4995_v4  ;;  %v5001_v8 = vld [vmem:[%s7735_s1 + $0x8] ss:$16 sps:$4 sm:$0xff]   ;;  %v7741_v10 = vmov 0.0   ;;  %v1562_v13 = vld [vmem:[%s7736_s2 + $0x70] sm:$0xff]  ;;  %v1560_v18 = vld [vmem:[%s7736_s2 + $0x60] sm:$0xff] }
  0x10   : > { %789 = vmatprep.subr.bf16.mxu0 %v4996_v5  ;;  %s4773_s18 = sshll.u32 %s8241_s27, 2  ;;  %982 = vmatprep.subr.bf16.mxu1 %v4998_v6  ;;  %v1563_v11 = vld [vmem:[%s7736_s2 + $0x78] sm:$0xff]  ;;  %v1594_v14 = vld [vmem:[%s7736_s2 + $0x170] sm:$0xff]  ;;  %v1561_v15 = vld [vmem:[%s7736_s2 + $0x68] sm:$0xff]  ;;  %vm2102_vm1 = vcmask 130048  }
  0x11   : > { %s5265_s21 = scalar_lea.vmem %s7734_s0, %s4773_s18  ;;  %v1595_v12 = vld [vmem:[%s7736_s2 + $0x178] sm:$0xff]  ;;  %v1593_v17 = vld [vmem:[%s7736_s2 + $0x168] sm:$0xff]  ;;  %v1592_v19 = vld [vmem:[%s7736_s2 + $0x160] sm:$0xff] }
  0x12   : > { %v5002_v9 = vld [vmem:[%s5265_s21] sm:$0xff]   ;;  %v5003_v16 = vld [vmem:[%s5265_s21 + $0x8] sm:$0xff]   ;;  %v1559_v20 = vld [vmem:[%s7736_s2 + $0x58] sm:$0xff] }
  0x13   : > { %790 = vmatpush1.bf16.msra.mxu0 %v5000_v7  ;;  %983 = vmatpush1.bf16.msra.mxu1 %v5001_v8  ;;  %v1591_v21 = vld [vmem:[%s7736_s2 + $0x158] sm:$0xff]  ;;  %v1558_v22 = vld [vmem:[%s7736_s2 + $0x50] sm:$0xff]  ;;  %v1557_v25 = vld [vmem:[%s7736_s2 + $0x48] sm:$0xff] }
  0x14   : > { %1620 = vmatprep.subr.mxu0 %v7741_v10  ;;  %1845 = vmatprep.subr.mxu1 %v7741_v10  ;;  %v5004_v23 = vld [vmem:[%s5265_s21 + $0x10] sm:$0xff]   ;;  %v1589_v26 = vld [vmem:[%s7736_s2 + $0x148] sm:$0xff]  ;;  %v1556_v27 = vld [vmem:[%s7736_s2 + $0x40] sm:$0xff] }
  0x15   : > { %v1590_v24 = vld [vmem:[%s7736_s2 + $0x150] sm:$0xff]  ;;  %v1588_v28 = vld [vmem:[%s7736_s2 + $0x140] sm:$0xff]  ;;  %v1555_v29 = vld [vmem:[%s7736_s2 + $0x38] sm:$0xff] }
  0x16   : > { %4801 = vmatmul.mubr.msk.bf16.vlgmr.msra.gmra.mxu0 %vm726_vm0, %v5002_v9  ;;  %4817 = vmatmul.mubr.msk.bf16.vlgmr.msra.gmra.mxu1 %vm726_vm0, %v5002_v9  ;;  %v5005_v30 = vld [vmem:[%s5265_s21 + $0x18] sm:$0xff]   ;;  %v1554_v32 = vld [vmem:[%s7736_s2 + $0x30] sm:$0xff]  ;;  %v1553_v34 = vld [vmem:[%s7736_s2 + $0x28] sm:$0xff] }
  0x17   : > { %817 = vmatprep.mubr.bf16.mxu0 %v5178_v2  ;;  %1010 = vmatprep.mubr.bf16.mxu1 %v5178_v2  ;;  %v1587_v31 = vld [vmem:[%s7736_s2 + $0x138] sm:$0xff]  ;;  %v1586_v33 = vld [vmem:[%s7736_s2 + $0x130] sm:$0xff]  ;;  %v1585_v35 = vld [vmem:[%s7736_s2 + $0x128] sm:$0xff] }
  0x18   : > { %1621 = vmatpush1.msra.mxu0 %v1563_v11  ;;  %1846 = vmatpush1.msra.mxu1 %v1595_v12  ;;  %v1552_v36 = vld [vmem:[%s7736_s2 + $0x20] sm:$0xff]  ;;  %v1551_v39 = vld [vmem:[%s7736_s2 + $0x18] sm:$0xff]  ;;  %v1550_v41 = vld [vmem:[%s7736_s2 + $0x10] sm:$0xff] }
  0x19   : > { %1622 = vmatprep.subr.mxu0 %v7741_v10  ;;  %1847 = vmatprep.subr.mxu1 %v7741_v10  ;;  %v5006_v37 = vld [vmem:[%s5265_s21 + $0x20] sm:$0xff]   ;;  %v1583_v40 = vld [vmem:[%s7736_s2 + $0x118] sm:$0xff]  ;;  %v1582_v42 = vld [vmem:[%s7736_s2 + $0x110] sm:$0xff] }
  0x1a   : > { %1623 = vmatpush1.msra.mxu0 %v1562_v13  ;;  %1848 = vmatpush1.msra.mxu1 %v1594_v14  ;;  %v1584_v38 = vld [vmem:[%s7736_s2 + $0x120] sm:$0xff]  ;;  %v1549_v43 = vld [vmem:[%s7736_s2 + $0x8] sm:$0xff]  ;;  %v1579_v48 = vld [vmem:[%s7736_s2 + $0xf8] sm:$0xff] }
  0x1b   : > { %1624 = vmatprep.subr.mxu0 %v7741_v10  ;;  %1849 = vmatprep.subr.mxu1 %v7741_v10  ;;  %v5007_v44 = vld [vmem:[%s5265_s21 + $0x28] sm:$0xff]   ;;  %v1548_v46 = vld [vmem:[%s7736_s2] sm:$0xff]  ;;  %v1611_v49 = vld [vmem:[%s7736_s2 + $0x1f8] sm:$0xff] }
  0x1c   : > { %1625 = vmatpush1.msra.mxu0 %v1561_v15  ;;  %1850 = vmatpush1.msra.mxu1 %v1593_v17  ;;  %v1581_v45 = vld [vmem:[%s7736_s2 + $0x108] sm:$0xff]  ;;  %v1580_v47 = vld [vmem:[%s7736_s2 + $0x100] sm:$0xff]  ;;  %v1578_v50 = vld [vmem:[%s7736_s2 + $0xf0] sm:$0xff] }
  0x1d   : > { %1626 = vmatprep.subr.mxu0 %v7741_v10  ;;  %1851 = vmatprep.subr.mxu1 %v7741_v10  ;;  %v5008_v51 = vld [vmem:[%s5265_s21 + $0x30] sm:$0xff]   ;;  %v1577_v53 = vld [vmem:[%s7736_s2 + $0xe8] sm:$0xff]  ;;  %v1576_v55 = vld [vmem:[%s7736_s2 + $0xe0] sm:$0xff] }
  0x1e   : > { %4802 = vmatmul.mubr.msk.bf16.gmra.mxu0 %vm726_vm0, %v5003_v16  ;;  %4818 = vmatmul.mubr.msk.bf16.gmra.mxu1 %vm726_vm0, %v5003_v16  ;;  %v1610_v52 = vld [vmem:[%s7736_s2 + $0x1f0] sm:$0xff]  ;;  %v1609_v54 = vld [vmem:[%s7736_s2 + $0x1e8] sm:$0xff]  ;;  %v1608_v56 = vld [vmem:[%s7736_s2 + $0x1e0] sm:$0xff] }
  0x1f   : > { %827 = vmatprep.mubr.bf16.mxu0 %v5178_v2  ;;  %1020 = vmatprep.mubr.bf16.mxu1 %v5178_v2  ;;  %v1575_v57 = vld [vmem:[%s7736_s2 + $0xd8] sm:$0xff]  ;;  %v1574_v60 = vld [vmem:[%s7736_s2 + $0xd0] sm:$0xff]  ;;  %v1573_v62 = vld [vmem:[%s7736_s2 + $0xc8] sm:$0xff] }
  0x20   : > { %1627 = vmatpush1.msra.mxu0 %v1560_v18  ;;  %1852 = vmatpush1.msra.mxu1 %v1592_v19  ;;  %v5009_v58 = vld [vmem:[%s5265_s21 + $0x38] sm:$0xff]   ;;  %v1606_v61 = vld [vmem:[%s7736_s2 + $0x1d0] sm:$0xff]  ;;  %v1605_v63 = vld [vmem:[%s7736_s2 + $0x1c8] sm:$0xff] }
  0x21   : > { %1628 = vmatprep.subr.mxu0 %v7741_v10  ;;  %1853 = vmatprep.subr.mxu1 %v7741_v10  ;;  %v1607_v59 = vld [vmem:[%s7736_s2 + $0x1d8] sm:$0xff]  ;;  %v1572_v0 = vld [vmem:[%s7736_s2 + $0xc0] sm:$0xff]  ;;  %v1570_v6 = vld [vmem:[%s7736_s2 + $0xb0] sm:$0xff] }
  0x22   : > { %1629 = vmatpush1.msra.mxu0 %v1559_v20  ;;  %1854 = vmatpush1.msra.mxu1 %v1591_v21  ;;  %v5010_v1 = vld [vmem:[%s5265_s21 + $0x40] sm:$0xff]   ;;  %v1571_v4 = vld [vmem:[%s7736_s2 + $0xb8] sm:$0xff]  ;;  %v1602_v7 = vld [vmem:[%s7736_s2 + $0x1b0] sm:$0xff] }
  0x23   : > { %1630 = vmatprep.subr.mxu0 %v7741_v10  ;;  %1855 = vmatprep.subr.mxu1 %v7741_v10  ;;  %v1604_v3 = vld [vmem:[%s7736_s2 + $0x1c0] sm:$0xff]  ;;  %v1603_v5 = vld [vmem:[%s7736_s2 + $0x1b8] sm:$0xff]  ;;  %v1569_v8 = vld [vmem:[%s7736_s2 + $0xa8] sm:$0xff] }
  0x24   : > { %1631 = vmatpush1.msra.mxu0 %v1558_v22  ;;  %1856 = vmatpush1.msra.mxu1 %v1590_v24  ;;  %v5011_v9 = vld [vmem:[%s5265_s21 + $0x48] sm:$0xff]   ;;  %v1568_v12 = vld [vmem:[%s7736_s2 + $0xa0] sm:$0xff]  ;;  %v1567_v14 = vld [vmem:[%s7736_s2 + $0x98] sm:$0xff] }
  0x25   : > { %1632 = vmatprep.subr.mxu0 %v7741_v10  ;;  %1857 = vmatprep.subr.mxu1 %v7741_v10  ;;  %v1601_v11 = vld [vmem:[%s7736_s2 + $0x1a8] sm:$0xff]  ;;  %v1600_v13 = vld [vmem:[%s7736_s2 + $0x1a0] sm:$0xff]  ;;  %v1599_v15 = vld [vmem:[%s7736_s2 + $0x198] sm:$0xff] }
  0x26   : > { %4803 = vmatmul.mubr.msk.bf16.gmra.mxu0 %vm726_vm0, %v5004_v23  ;;  %4819 = vmatmul.mubr.msk.bf16.gmra.mxu1 %vm726_vm0, %v5004_v23  ;;  %v1566_v16 = vld [vmem:[%s7736_s2 + $0x90] sm:$0xff]  ;;  %v1565_v19 = vld [vmem:[%s7736_s2 + $0x88] sm:$0xff]  ;;  %v1564_v21 = vld [vmem:[%s7736_s2 + $0x80] sm:$0xff] }
  0x27   : > { %837 = vmatprep.mubr.bf16.mxu0 %v5178_v2  ;;  %1030 = vmatprep.mubr.bf16.mxu1 %v5178_v2  ;;  %v5012_v17 = vld [vmem:[%s5265_s21 + $0x50] sm:$0xff]   ;;  %v1597_v20 = vld [vmem:[%s7736_s2 + $0x188] sm:$0xff]  ;;  %v1596_v22 = vld [vmem:[%s7736_s2 + $0x180] sm:$0xff] }
  0x28   : > { %1633 = vmatpush1.msra.mxu0 %v1557_v25  ;;  %1858 = vmatpush1.msra.mxu1 %v1589_v26  ;;  %v1598_v18 = vld [vmem:[%s7736_s2 + $0x190] sm:$0xff]  ;;  %v5013_v23 = vld [vmem:[%s5265_s21 + $0x58] sm:$0xff]   ;;  %v5014_v24 = vld [vmem:[%s5265_s21 + $0x60] sm:$0xff]  }
  0x29   : > { %1634 = vmatprep.subr.mxu0 %v7741_v10  ;;  %1859 = vmatprep.subr.mxu1 %v7741_v10  ;;  %v5015_v25 = vld [vmem:[%s5265_s21 + $0x68] sm:$0xff]   ;;  %v5016_v26 = vld [vmem:[%s5265_s21 + $0x70] sm:$0xff]  }
  0x2a   : > { %1635 = vmatpush1.msra.mxu0 %v1556_v27  ;;  %1860 = vmatpush1.msra.mxu1 %v1588_v28  ;;  %v5017_v27 = vld [vmem:[%s5265_s21 + $0x78] sm:$0xff]   ;;  %v1617_v28 = vld [vmem:[%s7737_s3 + $0x28] sm:$0xff]  ;;  %s4963_s21 = sshll.u32 %s8241_s27, 5 }
  0x2b   : > { %1636 = vmatprep.subr.mxu0 %v7741_v10  ;;  %1861 = vmatprep.subr.mxu1 %v7741_v10  ;;  %s7217_s25 = scalar_lea.vmem %s7740_s6, %s4963_s21 }
  0x2c   : > { %1637 = vmatpush1.msra.mxu0 %v1555_v29  ;;  %1862 = vmatpush1.msra.mxu1 %v1587_v31  ;;  %v1619_v29 = vld [vmem:[%s7737_s3 + $0x38] sm:$0xff] }
  0x2d   : > { %1638 = vmatprep.subr.mxu0 %v7741_v10  ;;  %1863 = vmatprep.subr.mxu1 %v7741_v10 }
  0x2e   : > { %4804 = vmatmul.mubr.msk.bf16.gmra.mxu0 %vm726_vm0, %v5005_v30  ;;  %4820 = vmatmul.mubr.msk.bf16.gmra.mxu1 %vm726_vm0, %v5005_v30 }
  0x2f   : > { %847 = vmatprep.mubr.bf16.mxu0 %v5178_v2  ;;  %1040 = vmatprep.mubr.bf16.mxu1 %v5178_v2 }
  0x30   : > { %1639 = vmatpush1.msra.mxu0 %v1554_v32  ;;  %1864 = vmatpush1.msra.mxu1 %v1586_v33  ;;  %v1616_v33 = vld [vmem:[%s7737_s3 + $0x20] sm:$0xff] }
  0x31   : > { %1640 = vmatprep.subr.mxu0 %v7741_v10  ;;  %1865 = vmatprep.subr.mxu1 %v7741_v10 }
  0x32   : > { %1641 = vmatpush1.msra.mxu0 %v1553_v34  ;;  %1866 = vmatpush1.msra.mxu1 %v1585_v35  ;;  %v1618_v34 = vld [vmem:[%s7737_s3 + $0x30] sm:$0xff]  ;;  %v1613_v35 = vld [vmem:[%s7737_s3 + $0x8] sm:$0xff] }
  0x33   : > { %1642 = vmatprep.subr.mxu0 %v7741_v10  ;;  %1867 = vmatprep.subr.mxu1 %v7741_v10 }
  0x34   : > { %1643 = vmatpush1.msra.mxu0 %v1552_v36  ;;  %1868 = vmatpush1.msra.mxu1 %v1584_v38  ;;  %v1615_v36 = vld [vmem:[%s7737_s3 + $0x18] sm:$0xff] }
  0x35   : > { %1644 = vmatprep.subr.mxu0 %v7741_v10  ;;  %1869 = vmatprep.subr.mxu1 %v7741_v10 }
  0x36   : > { %4805 = vmatmul.mubr.msk.bf16.gmra.mxu0 %vm726_vm0, %v5006_v37  ;;  %4821 = vmatmul.mubr.msk.bf16.gmra.mxu1 %vm726_vm0, %v5006_v37 }
  0x37   : > { %857 = vmatprep.mubr.bf16.mxu0 %v5178_v2  ;;  %1050 = vmatprep.mubr.bf16.mxu1 %v5178_v2 }
  0x38   : > { %1645 = vmatpush1.msra.mxu0 %v1551_v39  ;;  %1870 = vmatpush1.msra.mxu1 %v1583_v40 }
  0x39   : > { %1646 = vmatprep.subr.mxu0 %v7741_v10  ;;  %1871 = vmatprep.subr.mxu1 %v7741_v10 }
  0x3a   : > { %1647 = vmatpush1.msra.mxu0 %v1550_v41  ;;  %1872 = vmatpush1.msra.mxu1 %v1582_v42  ;;  %v1612_v41 = vld [vmem:[%s7737_s3] sm:$0xff]  ;;  %v1614_v42 = vld [vmem:[%s7737_s3 + $0x10] sm:$0xff] }
  0x3b   : > { %1648 = vmatprep.subr.mxu0 %v7741_v10  ;;  %1873 = vmatprep.subr.mxu1 %v7741_v10 }
  0x3c   : > { %1649 = vmatpush1.msra.mxu0 %v1549_v43  ;;  %1874 = vmatpush1.msra.mxu1 %v1581_v45 }
  0x3d   : > { %1650 = vmatprep.subr.mxu0 %v7741_v10  ;;  %1875 = vmatprep.subr.mxu1 %v7741_v10 }
  0x3e   : > { %4806 = vmatmul.mubr.msk.bf16.gmra.mxu0 %vm726_vm0, %v5007_v44  ;;  %4822 = vmatmul.mubr.msk.bf16.gmra.mxu1 %vm726_vm0, %v5007_v44 }
  0x3f   : > { %867 = vmatprep.mubr.bf16.mxu0 %v5178_v2  ;;  %1060 = vmatprep.mubr.bf16.mxu1 %v5178_v2 }
  0x40   : > { %1651 = vmatpush1.msra.mxu0 %v1548_v46  ;;  %1876 = vmatpush1.msra.mxu1 %v1580_v47 }
  0x41   : > { %1652 = vmatprep.subr.mxu0 %v7741_v10  ;;  %1877 = vmatprep.subr.mxu1 %v7741_v10 }
  0x42   : > { %1653 = vmatpush2.msra.mxu0 %v1579_v48  ;;  %1878 = vmatpush2.msra.mxu1 %v1611_v49 }
  0x43   : > { %1654 = vmatprep.subr.mxu0 %v7741_v10  ;;  %1879 = vmatprep.subr.mxu1 %v7741_v10 }
  0x44   : > { %1655 = vmatpush2.msra.mxu0 %v1578_v50  ;;  %1880 = vmatpush2.msra.mxu1 %v1610_v52 }
  0x45   : > { %1656 = vmatprep.subr.mxu0 %v7741_v10  ;;  %1881 = vmatprep.subr.mxu1 %v7741_v10 }
  0x46   : > { %4807 = vmatmul.mubr.msk.bf16.gmra.mxu0 %vm726_vm0, %v5008_v51  ;;  %4823 = vmatmul.mubr.msk.bf16.gmra.mxu1 %vm726_vm0, %v5008_v51 }
  0x47   : > { %877 = vmatprep.mubr.bf16.mxu0 %v5178_v2  ;;  %1070 = vmatprep.mubr.bf16.mxu1 %v5178_v2 }
  0x48   : > { %1657 = vmatpush2.msra.mxu0 %v1577_v53  ;;  %1882 = vmatpush2.msra.mxu1 %v1609_v54 }
  0x49   : > { %1658 = vmatprep.subr.mxu0 %v7741_v10  ;;  %1883 = vmatprep.subr.mxu1 %v7741_v10 }
  0x4a   : > { %1659 = vmatpush2.msra.mxu0 %v1576_v55  ;;  %1884 = vmatpush2.msra.mxu1 %v1608_v56 }
  0x4b   : > { %1660 = vmatprep.subr.mxu0 %v7741_v10  ;;  %1885 = vmatprep.subr.mxu1 %v7741_v10 }
  0x4c   : > { %1661 = vmatpush2.msra.mxu0 %v1575_v57  ;;  %1886 = vmatpush2.msra.mxu1 %v1607_v59 }
  0x4d   : > { %1662 = vmatprep.subr.mxu0 %v7741_v10  ;;  %1887 = vmatprep.subr.mxu1 %v7741_v10 }
  0x4e   : > { %4808 = vmatmul.mubr.msk.bf16.gmra.mxu0 %vm726_vm0, %v5009_v58  ;;  %4824 = vmatmul.mubr.msk.bf16.gmra.mxu1 %vm726_vm0, %v5009_v58 }
  0x4f   : > { %887 = vmatprep.mubr.bf16.mxu0 %v5178_v2  ;;  %1080 = vmatprep.mubr.bf16.mxu1 %v5178_v2 }
  0x50   : > { %1663 = vmatpush2.msra.mxu0 %v1574_v60  ;;  %1888 = vmatpush2.msra.mxu1 %v1606_v61 }
  0x51   : > { %1664 = vmatprep.subr.mxu0 %v7741_v10  ;;  %1889 = vmatprep.subr.mxu1 %v7741_v10 }
  0x52   : > { %1665 = vmatpush2.msra.mxu0 %v1573_v62  ;;  %1890 = vmatpush2.msra.mxu1 %v1605_v63 }
  0x53   : > { %1666 = vmatprep.subr.mxu0 %v7741_v10  ;;  %1891 = vmatprep.subr.mxu1 %v7741_v10 }
  0x54   : > { %1667 = vmatpush2.msra.mxu0 %v1572_v0  ;;  %1892 = vmatpush2.msra.mxu1 %v1604_v3 }
  0x55   : > { %1668 = vmatprep.subr.mxu0 %v7741_v10  ;;  %1893 = vmatprep.subr.mxu1 %v7741_v10 }
  0x56   : > { %4809 = vmatmul.mubr.msk.bf16.gmra.mxu0 %vm726_vm0, %v5010_v1  ;;  %4825 = vmatmul.mubr.msk.bf16.gmra.mxu1 %vm726_vm0, %v5010_v1 }
  0x57   : > { %897 = vmatprep.mubr.bf16.mxu0 %v5178_v2  ;;  %1090 = vmatprep.mubr.bf16.mxu1 %v5178_v2 }
  0x58   : > { %1669 = vmatpush2.msra.mxu0 %v1571_v4  ;;  %1894 = vmatpush2.msra.mxu1 %v1603_v5 }
  0x59   : > { %1670 = vmatprep.subr.mxu0 %v7741_v10  ;;  %1895 = vmatprep.subr.mxu1 %v7741_v10 }
  0x5a   : > { %1671 = vmatpush2.msra.mxu0 %v1570_v6  ;;  %1896 = vmatpush2.msra.mxu1 %v1602_v7 }
  0x5b   : > { %1672 = vmatprep.subr.mxu0 %v7741_v10  ;;  %1897 = vmatprep.subr.mxu1 %v7741_v10 }
  0x5c   : > { %1673 = vmatpush2.msra.mxu0 %v1569_v8  ;;  %1898 = vmatpush2.msra.mxu1 %v1601_v11 }
  0x5d   : > { %1674 = vmatprep.subr.mxu0 %v7741_v10  ;;  %1899 = vmatprep.subr.mxu1 %v7741_v10 }
  0x5e   : > { %4810 = vmatmul.mubr.msk.bf16.gmra.mxu0 %vm726_vm0, %v5011_v9  ;;  %4826 = vmatmul.mubr.msk.bf16.gmra.mxu1 %vm726_vm0, %v5011_v9 }
  0x5f   : > { %907 = vmatprep.mubr.bf16.mxu0 %v5178_v2  ;;  %1100 = vmatprep.mubr.bf16.mxu1 %v5178_v2 }
  0x60   : > { %1675 = vmatpush2.msra.mxu0 %v1568_v12  ;;  %1900 = vmatpush2.msra.mxu1 %v1600_v13 }
  0x61   : > { %1676 = vmatprep.subr.mxu0 %v7741_v10  ;;  %1901 = vmatprep.subr.mxu1 %v7741_v10 }
  0x62   : > { %1677 = vmatpush2.msra.mxu0 %v1567_v14  ;;  %1902 = vmatpush2.msra.mxu1 %v1599_v15 }
  0x63   : > { %1678 = vmatprep.subr.mxu0 %v7741_v10  ;;  %1903 = vmatprep.subr.mxu1 %v7741_v10 }
  0x64   : > { %1679 = vmatpush2.msra.mxu0 %v1566_v16  ;;  %1904 = vmatpush2.msra.mxu1 %v1598_v18 }
  0x65   : > { %1680 = vmatprep.subr.mxu0 %v7741_v10  ;;  %1905 = vmatprep.subr.mxu1 %v7741_v10 }
  0x66   : > { %4811 = vmatmul.mubr.msk.bf16.gmra.mxu0 %vm726_vm0, %v5012_v17  ;;  %4827 = vmatmul.mubr.msk.bf16.gmra.mxu1 %vm726_vm0, %v5012_v17 }
  0x67   : > { %917 = vmatprep.mubr.bf16.mxu0 %v5178_v2  ;;  %1110 = vmatprep.mubr.bf16.mxu1 %v5178_v2 }
  0x68   : > { %1681 = vmatpush2.msra.mxu0 %v1565_v19  ;;  %1906 = vmatpush2.msra.mxu1 %v1597_v20 }
  0x69   : > { %1682 = vmatprep.subr.mxu0 %v7741_v10  ;;  %1907 = vmatprep.subr.mxu1 %v7741_v10 }
  0x6a   : > { %1683 = vmatpush2.msra.mxu0 %v1564_v21  ;;  %1908 = vmatpush2.msra.mxu1 %v1596_v22 }
  0x6b   : > { %2227 = vmatprep.subr.mxu0 %v1617_v28  ;;  %2484 = vmatprep.subr.mxu1 %v1619_v29 }
  0x6e   : > { %4812 = vmatmul.mubr.msk.bf16.gmra.mxu0 %vm726_vm0, %v5013_v23  ;;  %4828 = vmatmul.mubr.msk.bf16.gmra.mxu1 %vm726_vm0, %v5013_v23 }
  0x6f   : > { %927 = vmatprep.mubr.bf16.mxu0 %v5178_v2  ;;  %1120 = vmatprep.mubr.bf16.mxu1 %v5178_v2 }
  0x76   : > { %4813 = vmatmul.mubr.msk.bf16.gmra.mxu0 %vm726_vm0, %v5014_v24  ;;  %4829 = vmatmul.mubr.msk.bf16.gmra.mxu1 %vm726_vm0, %v5014_v24 }
  0x77   : > { %937 = vmatprep.mubr.bf16.mxu0 %v5178_v2  ;;  %1130 = vmatprep.mubr.bf16.mxu1 %v5178_v2 }
  0x7e   : > { %4814 = vmatmul.mubr.msk.bf16.gmra.mxu0 %vm726_vm0, %v5015_v25  ;;  %4830 = vmatmul.mubr.msk.bf16.gmra.mxu1 %vm726_vm0, %v5015_v25 }
  0x7f   : > { %947 = vmatprep.mubr.bf16.mxu0 %v5178_v2  ;;  %1140 = vmatprep.mubr.bf16.mxu1 %v5178_v2 }
  0x86   : > { %4815 = vmatmul.mubr.msk.bf16.gmra.mxu0 %vm726_vm0, %v5016_v26  ;;  %4831 = vmatmul.mubr.msk.bf16.gmra.mxu1 %vm726_vm0, %v5016_v26 }
  0x87   : > { %957 = vmatprep.mubr.bf16.mxu0 %v5178_v2  ;;  %1150 = vmatprep.mubr.bf16.mxu1 %v5178_v2 }
  0x8e   : > { %4816 = vmatmul.mubr.msk.bf16.gmra.mxu0 %vm726_vm0, %v5017_v27  ;;  %4832 = vmatmul.mubr.msk.bf16.gmra.mxu1 %vm726_vm0, %v5017_v27 }
  0xd6   : > { %v5607_v30 = vpop.f32.mrf.mxu0  ;;  %v5609_v31 = vpop.f32.mrf.mxu1 }
  0xd8   : > { %v5611_v2 = vpop.f32.mrf.mxu0  ;;  %v5613_v32 = vpop.f32.mrf.mxu1 }
  0xd9   : > { %1684 = vmatprep.mubr.f32.mxu0 %v5611_v2  ;;  %1909 = vmatprep.mubr.f32.mxu1 %v5613_v32 }
  0xda   : > { %v5629_v37 = vpop.f32.mrf.mxu0  ;;  %v5631_v38 = vpop.f32.mrf.mxu1  ;;  %1685 = vmatmul.mubr.f32.vlgmr.msra.gmra.mxu0 %v5607_v30  ;;  %1910 = vmatmul.mubr.f32.vlgmr.msra.gmra.mxu1 %v5609_v31 }
  0xdb   : > { %2228 = vmatpush1.msra.mxu0 %v1616_v33  ;;  %2485 = vmatpush1.msra.mxu1 %v1618_v34 }
  0xdc   : > { %v5635_v39 = vpop.f32.mrf.mxu0  ;;  %v5637_v40 = vpop.f32.mrf.mxu1  ;;  %2229 = vmatprep.subr.mxu0 %v1613_v35  ;;  %2486 = vmatprep.subr.mxu1 %v1615_v36 }
  0xdd   : > { %1689 = vmatprep.mubr.f32.mxu0 %v5635_v39  ;;  %1914 = vmatprep.mubr.f32.mxu1 %v5637_v40 }
  0xde   : > { %v5647_v43 = vpop.f32.mrf.mxu0  ;;  %v5649_v44 = vpop.f32.mrf.mxu1  ;;  %1690 = vmatmul.mubr.f32.gmra.mxu0 %v5629_v37  ;;  %1915 = vmatmul.mubr.f32.gmra.mxu1 %v5631_v38 }
  0xdf   : > { %2230 = vmatpush1.msra.mxu0 %v1612_v41  ;;  %2487 = vmatpush1.msra.mxu1 %v1614_v42 }
  0xe0   : > { %v5653_v45 = vpop.f32.mrf.mxu0  ;;  %v5655_v46 = vpop.f32.mrf.mxu1  ;;  %2969 = vmatprep.subr.mxu0 %v7741_v10  ;;  %3194 = vmatprep.subr.mxu1 %v7741_v10 }
  0xe1   : > { %1694 = vmatprep.mubr.f32.mxu0 %v5653_v45  ;;  %1919 = vmatprep.mubr.f32.mxu1 %v5655_v46 }
  0xe2   : > { %v5661_v47 = vpop.f32.mrf.mxu0  ;;  %v5663_v48 = vpop.f32.mrf.mxu1  ;;  %1695 = vmatmul.mubr.f32.gmra.mxu0 %v5647_v43  ;;  %1920 = vmatmul.mubr.f32.gmra.mxu1 %v5649_v44 }
  0xe4   : > { %v5667_v49 = vpop.f32.mrf.mxu0  ;;  %v5669_v50 = vpop.f32.mrf.mxu1 }
  0xe5   : > { %1699 = vmatprep.mubr.f32.mxu0 %v5667_v49  ;;  %1924 = vmatprep.mubr.f32.mxu1 %v5669_v50 }
  0xe6   : > { %v5673_v51 = vpop.f32.mrf.mxu0  ;;  %v5675_v52 = vpop.f32.mrf.mxu1  ;;  %1700 = vmatmul.mubr.f32.gmra.mxu0 %v5661_v47  ;;  %1925 = vmatmul.mubr.f32.gmra.mxu1 %v5663_v48 }
  0xe8   : > { %v5679_v53 = vpop.f32.mrf.mxu0  ;;  %v5681_v54 = vpop.f32.mrf.mxu1 }
  0xe9   : > { %1704 = vmatprep.mubr.f32.mxu0 %v5679_v53  ;;  %1929 = vmatprep.mubr.f32.mxu1 %v5681_v54 }
  0xea   : > { %v5685_v55 = vpop.f32.mrf.mxu0  ;;  %v5687_v56 = vpop.f32.mrf.mxu1  ;;  %1705 = vmatmul.mubr.f32.gmra.mxu0 %v5673_v51  ;;  %1930 = vmatmul.mubr.f32.gmra.mxu1 %v5675_v52 }
  0xec   : > { %v5691_v57 = vpop.f32.mrf.mxu0  ;;  %v5693_v58 = vpop.f32.mrf.mxu1 }
  0xed   : > { %1709 = vmatprep.mubr.f32.mxu0 %v5691_v57  ;;  %1934 = vmatprep.mubr.f32.mxu1 %v5693_v58 }
  0xee   : > { %v5697_v59 = vpop.f32.mrf.mxu0  ;;  %v5699_v60 = vpop.f32.mrf.mxu1  ;;  %1710 = vmatmul.mubr.f32.gmra.mxu0 %v5685_v55  ;;  %1935 = vmatmul.mubr.f32.gmra.mxu1 %v5687_v56 }
  0xf0   : > { %v5703_v61 = vpop.f32.mrf.mxu0  ;;  %v5705_v62 = vpop.f32.mrf.mxu1 }
  0xf1   : > { %1714 = vmatprep.mubr.f32.mxu0 %v5703_v61  ;;  %1939 = vmatprep.mubr.f32.mxu1 %v5705_v62 }
  0xf2   : > { %v5709_v63 = vpop.f32.mrf.mxu0  ;;  %v5711_v0 = vpop.f32.mrf.mxu1  ;;  %1715 = vmatmul.mubr.f32.gmra.mxu0 %v5697_v59  ;;  %1940 = vmatmul.mubr.f32.gmra.mxu1 %v5699_v60 }
  0xf4   : > { %v5715_v1 = vpop.f32.mrf.mxu0  ;;  %v5717_v3 = vpop.f32.mrf.mxu1 }
  0xf5   : > { %1719 = vmatprep.mubr.f32.mxu0 %v5715_v1  ;;  %1944 = vmatprep.mubr.f32.mxu1 %v5717_v3 }
  0xf6   : > { %v5721_v4 = vpop.f32.mrf.mxu0  ;;  %v5723_v5 = vpop.f32.mrf.mxu1  ;;  %1720 = vmatmul.mubr.f32.gmra.mxu0 %v5709_v63  ;;  %1945 = vmatmul.mubr.f32.gmra.mxu1 %v5711_v0 }
  0xf8   : > { %v5727_v6 = vpop.f32.mrf.mxu0  ;;  %v5729_v7 = vpop.f32.mrf.mxu1 }
  0xf9   : > { %1724 = vmatprep.mubr.f32.mxu0 %v5727_v6  ;;  %1949 = vmatprep.mubr.f32.mxu1 %v5729_v7 }
  0xfa   : > { %v5733_v8 = vpop.f32.mrf.mxu0  ;;  %v5735_v9 = vpop.f32.mrf.mxu1  ;;  %1725 = vmatmul.mubr.f32.gmra.mxu0 %v5721_v4  ;;  %1950 = vmatmul.mubr.f32.gmra.mxu1 %v5723_v5 }
  0xfc   : > { %v5739_v11 = vpop.f32.mrf.mxu0  ;;  %v5741_v12 = vpop.f32.mrf.mxu1 }
  0xfd   : > { %1729 = vmatprep.mubr.f32.mxu0 %v5739_v11  ;;  %1954 = vmatprep.mubr.f32.mxu1 %v5741_v12 }
  0xfe   : > { %v5745_v13 = vpop.f32.mrf.mxu0  ;;  %v5747_v14 = vpop.f32.mrf.mxu1  ;;  %1730 = vmatmul.mubr.f32.gmra.mxu0 %v5733_v8  ;;  %1955 = vmatmul.mubr.f32.gmra.mxu1 %v5735_v9 }
 0x100   : > { %v5751_v15 = vpop.f32.mrf.mxu0  ;;  %v5753_v16 = vpop.f32.mrf.mxu1 }
 0x101   : > { %1734 = vmatprep.mubr.f32.mxu0 %v5751_v15  ;;  %1959 = vmatprep.mubr.f32.mxu1 %v5753_v16 }
 0x102   : > { %v5757_v17 = vpop.f32.mrf.mxu0  ;;  %v5759_v18 = vpop.f32.mrf.mxu1  ;;  %1735 = vmatmul.mubr.f32.gmra.mxu0 %v5745_v13  ;;  %1960 = vmatmul.mubr.f32.gmra.mxu1 %v5747_v14 }
 0x104   : > { %v5763_v19 = vpop.f32.mrf.mxu0  ;;  %v5765_v20 = vpop.f32.mrf.mxu1 }
 0x105   : > { %1739 = vmatprep.mubr.f32.mxu0 %v5763_v19  ;;  %1964 = vmatprep.mubr.f32.mxu1 %v5765_v20 }
 0x106   : > { %v5769_v21 = vpop.f32.mrf.mxu0  ;;  %v5771_v22 = vpop.f32.mrf.mxu1  ;;  %1740 = vmatmul.mubr.f32.gmra.mxu0 %v5757_v17  ;;  %1965 = vmatmul.mubr.f32.gmra.mxu1 %v5759_v18 }
 0x108   : > { %v5775_v23 = vpop.f32.mrf.mxu0  ;;  %v5777_v24 = vpop.f32.mrf.mxu1 }
 0x109   : > { %7907 = vst [vmem:[#allocation3_spill] sm:$0xff] %v5777_v24  ;;  %1744 = vmatprep.mubr.f32.mxu0 %v5775_v23  ;;  %1969 = vmatprep.mubr.f32.mxu1 %v5777_v24 }
 0x10a   : > { %v5781_v25 = vpop.f32.mrf.mxu0  ;;  %v5783_v26 = vpop.f32.mrf.mxu1  ;;  %1745 = vmatmul.mubr.f32.gmra.mxu0 %v5769_v21  ;;  %1970 = vmatmul.mubr.f32.gmra.mxu1 %v5771_v22 }
 0x10b   : > { %7908 = vst [vmem:[#allocation4_spill] sm:$0xff] %v5781_v25  ;;  %7909 = vst [vmem:[#allocation5_spill] sm:$0xff] %v5783_v26 }
 0x10c   : > { %v5787_v27 = vpop.f32.mrf.mxu0  ;;  %v5789_v28 = vpop.f32.mrf.mxu1 }
 0x10d   : > { %7910 = vst [vmem:[#allocation6_spill] sm:$0xff] %v5787_v27  ;;  %7911 = vst [vmem:[#allocation7_spill] sm:$0xff] %v5789_v28  ;;  %1749 = vmatprep.mubr.f32.mxu0 %v5787_v27  ;;  %1974 = vmatprep.mubr.f32.mxu1 %v5789_v28 }
 0x10e   : > { %v5793_v29 = vpop.f32.mrf.mxu0  ;;  %v5795_v33 = vpop.f32.mrf.mxu1  ;;  %1750 = vmatmul.mubr.f32.gmra.mxu0 %v5781_v25  ;;  %1975 = vmatmul.mubr.f32.gmra.mxu1 %v5783_v26 }
 0x10f   : > { %7912 = vst [vmem:[#allocation8_spill] sm:$0xff] %v5793_v29  ;;  %7913 = vst [vmem:[#allocation9_spill] sm:$0xff] %v5795_v33 }
 0x110   : > { %v5799_v34 = vpop.f32.mrf.mxu0  ;;  %v5801_v35 = vpop.f32.mrf.mxu1 }
 0x111   : > { %7914 = vst [vmem:[#allocation10_spill] sm:$0xff] %v5799_v34  ;;  %7915 = vst [vmem:[#allocation11_spill] sm:$0xff] %v5801_v35  ;;  %1754 = vmatprep.mubr.f32.mxu0 %v5799_v34  ;;  %1979 = vmatprep.mubr.f32.mxu1 %v5801_v35 }
 0x112   : > { %v5805_v36 = vpop.f32.mrf.mxu0  ;;  %v5807_v41 = vpop.f32.mrf.mxu1  ;;  %1755 = vmatmul.mubr.f32.gmra.mxu0 %v5793_v29  ;;  %1980 = vmatmul.mubr.f32.gmra.mxu1 %v5795_v33 }
 0x113   : > { %7916 = vst [vmem:[#allocation12_spill] sm:$0xff] %v5805_v36  ;;  %7917 = vst [vmem:[#allocation13_spill] sm:$0xff] %v5807_v41 }
 0x114   : > { %v5811_v42 = vpop.f32.mrf.mxu0  ;;  %v5813_v10 = vpop.f32.mrf.mxu1 }
 0x115   : > { %7918 = vst [vmem:[#allocation14_spill] sm:$0xff] %v5811_v42  ;;  %7919 = vst [vmem:[#allocation15_spill] sm:$0xff] %v5813_v10  ;;  %1759 = vmatprep.mubr.f32.mxu0 %v5811_v42  ;;  %1984 = vmatprep.mubr.f32.mxu1 %v5813_v10 }
 0x116   : > { %v5817_v28 = vpop.f32.mrf.mxu0  ;;  %v5819_v34 = vpop.f32.mrf.mxu1  ;;  %1760 = vmatmul.mubr.f32.gmra.mxu0 %v5805_v36  ;;  %1985 = vmatmul.mubr.f32.gmra.mxu1 %v5807_v41 }
 0x117   : > { %7920 = vst [vmem:[#allocation16_spill] sm:$0xff] %v5817_v28  ;;  %7921 = vst [vmem:[#allocation17_spill] sm:$0xff] %v5819_v34 }
 0x118   : > { %v5823_v35 = vpop.f32.mrf.mxu0  ;;  %v5825_v29 = vpop.f32.mrf.mxu1 }
 0x119   : > { %7922 = vst [vmem:[#allocation18_spill] sm:$0xff] %v5823_v35  ;;  %7923 = vst [vmem:[#allocation19_spill] sm:$0xff] %v5825_v29  ;;  %1764 = vmatprep.mubr.f32.mxu0 %v5823_v35  ;;  %1989 = vmatprep.mubr.f32.mxu1 %v5825_v29 }
 0x11a   : > { %v5829_v33 = vpop.f32.mrf.mxu0  ;;  %v5831_v42 = vpop.f32.mrf.mxu1  ;;  %1765 = vmatmul.mubr.f32.gmra.mxu0 %v5817_v28  ;;  %1990 = vmatmul.mubr.f32.gmra.mxu1 %v5819_v34 }
 0x11b   : > { %7924 = vst [vmem:[#allocation20_spill] sm:$0xff] %v5829_v33  ;;  %7925 = vst [vmem:[#allocation21_spill] sm:$0xff] %v5831_v42 }
 0x11c   : > { %v5835_v10 = vpop.f32.mrf.mxu0  ;;  %v5837_v36 = vpop.f32.mrf.mxu1 }
 0x11d   : > { %7926 = vst [vmem:[#allocation22_spill] sm:$0xff] %v5835_v10  ;;  %7927 = vst [vmem:[#allocation23_spill] sm:$0xff] %v5837_v36  ;;  %1769 = vmatprep.mubr.f32.mxu0 %v5835_v10  ;;  %1994 = vmatprep.mubr.f32.mxu1 %v5837_v36 }
 0x11e   : > { %v5841_v41 = vpop.f32.mrf.mxu0  ;;  %v5843_v35 = vpop.f32.mrf.mxu1  ;;  %1770 = vmatmul.mubr.f32.gmra.mxu0 %v5829_v33  ;;  %1995 = vmatmul.mubr.f32.gmra.mxu1 %v5831_v42 }
 0x11f   : > { %7928 = vst [vmem:[#allocation24_spill] sm:$0xff] %v5841_v41  ;;  %7929 = vst [vmem:[#allocation25_spill] sm:$0xff] %v5843_v35 }
 0x120   : > { %v5847_v29 = vpop.f32.mrf.mxu0  ;;  %v5849_v28 = vpop.f32.mrf.mxu1 }
 0x121   : > { %7930 = vst [vmem:[#allocation26_spill] sm:$0xff] %v5847_v29  ;;  %7931 = vst [vmem:[#allocation27_spill] sm:$0xff] %v5849_v28  ;;  %1774 = vmatprep.mubr.f32.mxu0 %v5847_v29  ;;  %1999 = vmatprep.mubr.f32.mxu1 %v5849_v28 }
 0x122   : > { %v5853_v34 = vpop.f32.mrf.mxu0  ;;  %v5855_v10 = vpop.f32.mrf.mxu1  ;;  %1775 = vmatmul.mubr.f32.gmra.mxu0 %v5841_v41  ;;  %2000 = vmatmul.mubr.f32.gmra.mxu1 %v5843_v35 }
 0x123   : > { %7932 = vst [vmem:[#allocation28_spill] sm:$0xff] %v5853_v34  ;;  %7933 = vst [vmem:[#allocation29_spill] sm:$0xff] %v5855_v10 }
 0x124   : > { %v5859_v36 = vpop.f32.mrf.mxu0  ;;  %v5861_v33 = vpop.f32.mrf.mxu1 }
 0x125   : > { %7934 = vst [vmem:[#allocation30_spill] sm:$0xff] %v5859_v36  ;;  %7935 = vst [vmem:[#allocation31_spill] sm:$0xff] %v5861_v33  ;;  %1779 = vmatprep.mubr.f32.mxu0 %v5859_v36  ;;  %2004 = vmatprep.mubr.f32.mxu1 %v5861_v33 }
 0x126   : > { %v5865_v42 = vpop.f32.mrf.mxu0  ;;  %v5867_v29 = vpop.f32.mrf.mxu1  ;;  %1780 = vmatmul.mubr.f32.gmra.mxu0 %v5853_v34  ;;  %2005 = vmatmul.mubr.f32.gmra.mxu1 %v5855_v10 }
 0x127   : > { %7936 = vst [vmem:[#allocation32_spill] sm:$0xff] %v5865_v42  ;;  %7937 = vst [vmem:[#allocation33_spill] sm:$0xff] %v5867_v29 }
 0x128   : > { %v5871_v28 = vpop.f32.mrf.mxu0  ;;  %v5873_v41 = vpop.f32.mrf.mxu1 }
 0x129   : > { %7938 = vst [vmem:[#allocation34_spill] sm:$0xff] %v5871_v28  ;;  %7939 = vst [vmem:[#allocation35_spill] sm:$0xff] %v5873_v41  ;;  %1784 = vmatprep.mubr.f32.mxu0 %v5871_v28  ;;  %2009 = vmatprep.mubr.f32.mxu1 %v5873_v41 }
 0x12a   : > { %v5877_v35 = vpop.f32.mrf.mxu0  ;;  %v5879_v36 = vpop.f32.mrf.mxu1  ;;  %1785 = vmatmul.mubr.f32.gmra.mxu0 %v5865_v42  ;;  %2010 = vmatmul.mubr.f32.gmra.mxu1 %v5867_v29 }
 0x12b   : > { %7940 = vst [vmem:[#allocation36_spill] sm:$0xff] %v5877_v35  ;;  %7941 = vst [vmem:[#allocation37_spill] sm:$0xff] %v5879_v36 }
 0x12c   : > { %v5883_v33 = vpop.f32.mrf.mxu0  ;;  %v5885_v34 = vpop.f32.mrf.mxu1 }
 0x12d   : > { %7942 = vst [vmem:[#allocation38_spill] sm:$0xff] %v5883_v33  ;;  %7943 = vst [vmem:[#allocation39_spill] sm:$0xff] %v5885_v34  ;;  %1789 = vmatprep.mubr.f32.mxu0 %v5883_v33  ;;  %2014 = vmatprep.mubr.f32.mxu1 %v5885_v34 }
 0x12e   : > { %v5889_v10 = vpop.f32.mrf.mxu0  ;;  %v5891_v28 = vpop.f32.mrf.mxu1  ;;  %1790 = vmatmul.mubr.f32.gmra.mxu0 %v5877_v35  ;;  %2015 = vmatmul.mubr.f32.gmra.mxu1 %v5879_v36 }
 0x12f   : > { %7944 = vst [vmem:[#allocation40_spill] sm:$0xff] %v5889_v10  ;;  %7945 = vst [vmem:[#allocation41_spill] sm:$0xff] %v5891_v28 }
 0x130   : > { %v5895_v41 = vpop.f32.mrf.mxu0  ;;  %v5897_v42 = vpop.f32.mrf.mxu1 }
 0x131   : > { %7946 = vst [vmem:[#allocation42_spill] sm:$0xff] %v5895_v41  ;;  %7947 = vst [vmem:[#allocation43_spill] sm:$0xff] %v5897_v42  ;;  %1794 = vmatprep.mubr.f32.mxu0 %v5895_v41  ;;  %2019 = vmatprep.mubr.f32.mxu1 %v5897_v42 }
 0x132   : > { %v5901_v29 = vpop.f32.mrf.mxu0  ;;  %v5903_v33 = vpop.f32.mrf.mxu1  ;;  %1795 = vmatmul.mubr.f32.gmra.mxu0 %v5889_v10  ;;  %2020 = vmatmul.mubr.f32.gmra.mxu1 %v5891_v28 }
 0x133   : > { %7948 = vst [vmem:[#allocation44_spill] sm:$0xff] %v5901_v29  ;;  %7949 = vst [vmem:[#allocation45_spill] sm:$0xff] %v5903_v33 }
 0x134   : > { %v5907_v34 = vpop.f32.mrf.mxu0  ;;  %v5909_v35 = vpop.f32.mrf.mxu1 }
 0x135   : > { %7950 = vst [vmem:[#allocation46_spill] sm:$0xff] %v5907_v34  ;;  %7951 = vst [vmem:[#allocation47_spill] sm:$0xff] %v5909_v35  ;;  %1799 = vmatprep.mubr.f32.mxu0 %v5907_v34  ;;  %2024 = vmatprep.mubr.f32.mxu1 %v5909_v35 }
 0x136   : > { %v5913_v36 = vpop.f32.mrf.mxu0  ;;  %v5915_v41 = vpop.f32.mrf.mxu1  ;;  %1800 = vmatmul.mubr.f32.gmra.mxu0 %v5901_v29  ;;  %2025 = vmatmul.mubr.f32.gmra.mxu1 %v5903_v33 }
 0x137   : > { %7952 = vst [vmem:[#allocation48_spill] sm:$0xff] %v5913_v36  ;;  %7953 = vst [vmem:[#allocation49_spill] sm:$0xff] %v5915_v41 }
 0x138   : > { %v5919_v42 = vpop.f32.mrf.mxu0  ;;  %v5921_v10 = vpop.f32.mrf.mxu1 }
 0x139   : > { %7954 = vst [vmem:[#allocation50_spill] sm:$0xff] %v5919_v42  ;;  %7955 = vst [vmem:[#allocation51_spill] sm:$0xff] %v5921_v10  ;;  %1804 = vmatprep.mubr.f32.mxu0 %v5919_v42  ;;  %2029 = vmatprep.mubr.f32.mxu1 %v5921_v10 }
 0x13a   : > { %v5925_v28 = vpop.f32.mrf.mxu0  ;;  %v5927_v34 = vpop.f32.mrf.mxu1  ;;  %1805 = vmatmul.mubr.f32.gmra.mxu0 %v5913_v36  ;;  %2030 = vmatmul.mubr.f32.gmra.mxu1 %v5915_v41 }
 0x13b   : > { %7956 = vst [vmem:[#allocation52_spill] sm:$0xff] %v5925_v28  ;;  %7957 = vst [vmem:[#allocation53_spill] sm:$0xff] %v5927_v34 }
 0x13c   : > { %v5931_v35 = vpop.f32.mrf.mxu0  ;;  %v5933_v29 = vpop.f32.mrf.mxu1 }
 0x13d   : > { %7958 = vst [vmem:[#allocation54_spill] sm:$0xff] %v5931_v35  ;;  %7959 = vst [vmem:[#allocation55_spill] sm:$0xff] %v5933_v29  ;;  %1809 = vmatprep.mubr.f32.mxu0 %v5931_v35  ;;  %2034 = vmatprep.mubr.f32.mxu1 %v5933_v29 }
 0x13e   : > { %v5937_v33 = vpop.f32.mrf.mxu0  ;;  %v5939_v42 = vpop.f32.mrf.mxu1  ;;  %1810 = vmatmul.mubr.f32.gmra.mxu0 %v5925_v28  ;;  %2035 = vmatmul.mubr.f32.gmra.mxu1 %v5927_v34 }
 0x13f   : > { %7960 = vst [vmem:[#allocation56_spill] sm:$0xff] %v5937_v33  ;;  %7961 = vst [vmem:[#allocation57_spill] sm:$0xff] %v5939_v42 }
 0x140   : > { %v5943_v10 = vpop.f32.mrf.mxu0  ;;  %v5945_v36 = vpop.f32.mrf.mxu1 }
 0x141   : > { %7962 = vst [vmem:[#allocation58_spill] sm:$0xff] %v5943_v10  ;;  %7963 = vst [vmem:[#allocation59_spill] sm:$0xff] %v5945_v36  ;;  %1814 = vmatprep.mubr.f32.mxu0 %v5943_v10  ;;  %2039 = vmatprep.mubr.f32.mxu1 %v5945_v36 }
 0x142   : > { %v5949_v41 = vpop.f32.mrf.mxu0  ;;  %v5951_v35 = vpop.f32.mrf.mxu1  ;;  %1815 = vmatmul.mubr.f32.gmra.mxu0 %v5937_v33  ;;  %2040 = vmatmul.mubr.f32.gmra.mxu1 %v5939_v42 }
 0x143   : > { %7964 = vst [vmem:[#allocation60_spill] sm:$0xff] %v5949_v41  ;;  %7965 = vst [vmem:[#allocation61_spill] sm:$0xff] %v5951_v35 }
 0x144   : > { %v5955_v29 = vpop.f32.mrf.mxu0  ;;  %v5957_v28 = vpop.f32.mrf.mxu1 }
 0x145   : > { %7966 = vst [vmem:[#allocation62_spill] sm:$0xff] %v5955_v29  ;;  %7967 = vst [vmem:[#allocation63_spill] sm:$0xff] %v5957_v28  ;;  %1819 = vmatprep.mubr.f32.mxu0 %v5955_v29  ;;  %2044 = vmatprep.mubr.f32.mxu1 %v5957_v28 }
 0x146   : > { %v5961_v34 = vpop.f32.mrf.mxu0  ;;  %v5963_v10 = vpop.f32.mrf.mxu1  ;;  %1820 = vmatmul.mubr.f32.gmra.mxu0 %v5949_v41  ;;  %2045 = vmatmul.mubr.f32.gmra.mxu1 %v5951_v35 }
 0x147   : > { %7968 = vst [vmem:[#allocation64_spill] sm:$0xff] %v5961_v34  ;;  %7969 = vst [vmem:[#allocation65_spill] sm:$0xff] %v5963_v10 }
 0x148   : > { %v5967_v36 = vpop.f32.mrf.mxu0  ;;  %v5969_v33 = vpop.f32.mrf.mxu1 }
 0x149   : > { %7970 = vst [vmem:[#allocation66_spill] sm:$0xff] %v5967_v36  ;;  %7971 = vst [vmem:[#allocation67_spill] sm:$0xff] %v5969_v33  ;;  %1824 = vmatprep.mubr.f32.mxu0 %v5967_v36  ;;  %2049 = vmatprep.mubr.f32.mxu1 %v5969_v33 }
 0x14a   : > { %v5973_v42 = vpop.f32.mrf.mxu0  ;;  %v5975_v29 = vpop.f32.mrf.mxu1  ;;  %1825 = vmatmul.mubr.f32.gmra.mxu0 %v5961_v34  ;;  %2050 = vmatmul.mubr.f32.gmra.mxu1 %v5963_v10 }
 0x14b   : > { %7972 = vst [vmem:[#allocation68_spill] sm:$0xff] %v5973_v42  ;;  %7973 = vst [vmem:[#allocation69_spill] sm:$0xff] %v5975_v29 }
 0x14c   : > { %v5979_v28 = vpop.f32.mrf.mxu0  ;;  %v5981_v41 = vpop.f32.mrf.mxu1 }
 0x14d   : > { %7974 = vst [vmem:[#allocation70_spill] sm:$0xff] %v5979_v28  ;;  %7975 = vst [vmem:[#allocation71_spill] sm:$0xff] %v5981_v41  ;;  %1829 = vmatprep.mubr.f32.mxu0 %v5979_v28  ;;  %2054 = vmatprep.mubr.f32.mxu1 %v5981_v41 }
 0x14e   : > { %v5985_v35 = vpop.f32.mrf.mxu0  ;;  %v5987_v36 = vpop.f32.mrf.mxu1  ;;  %1830 = vmatmul.mubr.f32.gmra.mxu0 %v5973_v42  ;;  %2055 = vmatmul.mubr.f32.gmra.mxu1 %v5975_v29 }
 0x14f   : > { %7976 = vst [vmem:[#allocation72_spill] sm:$0xff] %v5985_v35  ;;  %7977 = vst [vmem:[#allocation73_spill] sm:$0xff] %v5987_v36 }
 0x150   : > { %v5991_v33 = vpop.f32.mrf.mxu0  ;;  %v5993_v34 = vpop.f32.mrf.mxu1 }
 0x151   : > { %7978 = vst [vmem:[#allocation74_spill] sm:$0xff] %v5991_v33  ;;  %7979 = vst [vmem:[#allocation75_spill] sm:$0xff] %v5993_v34  ;;  %1834 = vmatprep.mubr.f32.mxu0 %v5991_v33  ;;  %2059 = vmatprep.mubr.f32.mxu1 %v5993_v34  ;;  %v7984_v34 = vmov 0.0  }
 0x152   : > { %v5997_v10 = vpop.f32.mrf.mxu0  ;;  %v5999_v28 = vpop.f32.mrf.mxu1  ;;  %1835 = vmatmul.mubr.f32.gmra.mxu0 %v5985_v35  ;;  %2060 = vmatmul.mubr.f32.gmra.mxu1 %v5987_v36 }
 0x153   : > { %7980 = vst [vmem:[#allocation76_spill] sm:$0xff] %v5997_v10  ;;  %7981 = vst [vmem:[#allocation77_spill] sm:$0xff] %v5999_v28 }
 0x154   : > { %v6003_v41 = vpop.f32.mrf.mxu0  ;;  %v6005_v42 = vpop.f32.mrf.mxu1 }
 0x155   : > { %7982 = vst [vmem:[#allocation78_spill] sm:$0xff] %v6003_v41  ;;  %7983 = vst [vmem:[#allocation79_spill] sm:$0xff] %v6005_v42  ;;  %1839 = vmatprep.mubr.f32.mxu0 %v6003_v41  ;;  %2064 = vmatprep.mubr.f32.mxu1 %v6005_v42 }
 0x156   : > { %1840 = vmatmul.mubr.f32.gmra.mxu0 %v5997_v10  ;;  %2065 = vmatmul.mubr.f32.gmra.mxu1 %v5999_v28 }
 0x157   : > { %2263 = vmatprep.mubr.f32.mxu0 %v7984_v34  ;;  %2520 = vmatprep.mubr.f32.mxu1 %v7984_v34 }
 0x19a   : > { %v1686_v33 = vpop.f32.mrf.mxu0  ;;  %v1911_v35 = vpop.f32.mrf.mxu1 }
 0x19b   : > { %v1912_v29 = vadd.f32 %v1911_v35, %v1686_v33 }
 0x19c   : > { %v1688_v36 = vpop.f32.mrf.mxu0  ;;  %v1913_v27 = vpop.f32.mrf.mxu1 }
 0x19d   : > { %v2070_v26 = vmul.f32 0.03125, %v1912_v29  ;;  %v5082_v27 = vld [vmem:[%s7736_s2 + $0x78] sm:$0xff]  ;;  %v5084_v36 = vld [vmem:[%s7736_s2 + $0x70] sm:$0xff] }
 0x19e   : > { %v1691_v25 = vpop.f32.mrf.mxu0  ;;  %v1916_v24 = vpop.f32.mrf.mxu1 }
 0x19f   : > { %v1917_v41 = vadd.f32 %v1916_v24, %v1691_v25  ;;  %4833 = vmatmul.mubr.msk.f32.vlgmr.msra.gmra.mxu0 %vm2102_vm1, %v2070_v26  ;;  %4865 = vmatmul.mubr.msk.f32.vlgmr.msra.gmra.mxu1 %vm2102_vm1, %v2070_v26  ;;  %v5083_v24 = vld [vmem:[%s7736_s2 + $0x178] sm:$0xff] }
 0x1a0   : > { %v1693_v42 = vpop.f32.mrf.mxu0  ;;  %v1918_v28 = vpop.f32.mrf.mxu1  ;;  %2269 = vmatprep.mubr.f32.mxu0 %v7984_v34  ;;  %2526 = vmatprep.mubr.f32.mxu1 %v7984_v34 }
 0x1a1   : > { %v2071_v10 = vmul.f32 0.03125, %v1917_v41  ;;  %2970 = vmatpush1.msra.mxu0 %v5082_v27  ;;  %3195 = vmatpush1.msra.mxu1 %v5083_v24  ;;  %v5085_v41 = vld [vmem:[%s7736_s2 + $0x170] sm:$0xff] }
 0x1a2   : > { %v1696_v25 = vpop.f32.mrf.mxu0  ;;  %v1921_v29 = vpop.f32.mrf.mxu1  ;;  %2971 = vmatprep.subr.mxu0 %v7984_v34  ;;  %3196 = vmatprep.subr.mxu1 %v7984_v34 }
 0x1a3   : > { %v1922_v26 = vadd.f32 %v1921_v29, %v1696_v25  ;;  %4834 = vmatmul.mubr.msk.f32.gmra.mxu0 %vm2102_vm1, %v2071_v10  ;;  %4866 = vmatmul.mubr.msk.f32.gmra.mxu1 %vm2102_vm1, %v2071_v10 }
 0x1a4   : > { %v1698_v28 = vpop.f32.mrf.mxu0  ;;  %v1923_v33 = vpop.f32.mrf.mxu1  ;;  %2275 = vmatprep.mubr.f32.mxu0 %v7984_v34  ;;  %2532 = vmatprep.mubr.f32.mxu1 %v7984_v34 }
 0x1a5   : > { %v2072_v35 = vmul.f32 0.03125, %v1922_v26  ;;  %2972 = vmatpush1.msra.mxu0 %v5084_v36  ;;  %3197 = vmatpush1.msra.mxu1 %v5085_v41  ;;  %v5086_v26 = vld [vmem:[%s7736_s2 + $0x68] sm:$0xff] }
 0x1a6   : > { %v1701_v42 = vpop.f32.mrf.mxu0  ;;  %v1926_v27 = vpop.f32.mrf.mxu1  ;;  %2973 = vmatprep.subr.mxu0 %v7984_v34  ;;  %3198 = vmatprep.subr.mxu1 %v7984_v34  ;;  %v5087_v28 = vld [vmem:[%s7736_s2 + $0x168] sm:$0xff] }
 0x1a7   : > { %v1927_v10 = vadd.f32 %v1926_v27, %v1701_v42  ;;  %4835 = vmatmul.mubr.msk.f32.gmra.mxu0 %vm2102_vm1, %v2072_v35  ;;  %4867 = vmatmul.mubr.msk.f32.gmra.mxu1 %vm2102_vm1, %v2072_v35 }
 0x1a8   : > { %v1703_v24 = vpop.f32.mrf.mxu0  ;;  %v1928_v25 = vpop.f32.mrf.mxu1  ;;  %2281 = vmatprep.mubr.f32.mxu0 %v7984_v34  ;;  %2538 = vmatprep.mubr.f32.mxu1 %v7984_v34 }
 0x1a9   : > { %v2073_v29 = vmul.f32 0.03125, %v1927_v10  ;;  %2974 = vmatpush1.msra.mxu0 %v5086_v26  ;;  %3199 = vmatpush1.msra.mxu1 %v5087_v28  ;;  %v5088_v10 = vld [vmem:[%s7736_s2 + $0x60] sm:$0xff] }
 0x1aa   : > { %v1706_v33 = vpop.f32.mrf.mxu0  ;;  %v1931_v36 = vpop.f32.mrf.mxu1  ;;  %2975 = vmatprep.subr.mxu0 %v7984_v34  ;;  %3200 = vmatprep.subr.mxu1 %v7984_v34  ;;  %v5089_v24 = vld [vmem:[%s7736_s2 + $0x160] sm:$0xff] }
 0x1ab   : > { %v1932_v35 = vadd.f32 %v1931_v36, %v1706_v33  ;;  %4836 = vmatmul.mubr.msk.f32.gmra.mxu0 %vm2102_vm1, %v2073_v29  ;;  %4868 = vmatmul.mubr.msk.f32.gmra.mxu1 %vm2102_vm1, %v2073_v29 }
 0x1ac   : > { %v1708_v41 = vpop.f32.mrf.mxu0  ;;  %v1933_v42 = vpop.f32.mrf.mxu1  ;;  %2287 = vmatprep.mubr.f32.mxu0 %v7984_v34  ;;  %2544 = vmatprep.mubr.f32.mxu1 %v7984_v34 }
 0x1ad   : > { %v2074_v27 = vmul.f32 0.03125, %v1932_v35  ;;  %2976 = vmatpush1.msra.mxu0 %v5088_v10  ;;  %3201 = vmatpush1.msra.mxu1 %v5089_v24  ;;  %v5090_v35 = vld [vmem:[%s7736_s2 + $0x58] sm:$0xff] }
 0x1ae   : > { %v1711_v25 = vpop.f32.mrf.mxu0  ;;  %v1936_v26 = vpop.f32.mrf.mxu1  ;;  %2977 = vmatprep.subr.mxu0 %v7984_v34  ;;  %3202 = vmatprep.subr.mxu1 %v7984_v34  ;;  %v5091_v41 = vld [vmem:[%s7736_s2 + $0x158] sm:$0xff] }
 0x1af   : > { %v1937_v29 = vadd.f32 %v1936_v26, %v1711_v25  ;;  %4837 = vmatmul.mubr.msk.f32.gmra.mxu0 %vm2102_vm1, %v2074_v27  ;;  %4869 = vmatmul.mubr.msk.f32.gmra.mxu1 %vm2102_vm1, %v2074_v27 }
 0x1b0   : > { %v1713_v28 = vpop.f32.mrf.mxu0  ;;  %v1938_v33 = vpop.f32.mrf.mxu1  ;;  %2293 = vmatprep.mubr.f32.mxu0 %v7984_v34  ;;  %2550 = vmatprep.mubr.f32.mxu1 %v7984_v34 }
 0x1b1   : > { %v2075_v36 = vmul.f32 0.03125, %v1937_v29  ;;  %2978 = vmatpush1.msra.mxu0 %v5090_v35  ;;  %3203 = vmatpush1.msra.mxu1 %v5091_v41  ;;  %v5092_v29 = vld [vmem:[%s7736_s2 + $0x50] sm:$0xff] }
 0x1b2   : > { %v1716_v42 = vpop.f32.mrf.mxu0  ;;  %v1941_v10 = vpop.f32.mrf.mxu1  ;;  %2979 = vmatprep.subr.mxu0 %v7984_v34  ;;  %3204 = vmatprep.subr.mxu1 %v7984_v34  ;;  %v5093_v28 = vld [vmem:[%s7736_s2 + $0x150] sm:$0xff] }
 0x1b3   : > { %v1942_v27 = vadd.f32 %v1941_v10, %v1716_v42  ;;  %4838 = vmatmul.mubr.msk.f32.gmra.mxu0 %vm2102_vm1, %v2075_v36  ;;  %4870 = vmatmul.mubr.msk.f32.gmra.mxu1 %vm2102_vm1, %v2075_v36 }
 0x1b4   : > { %v1718_v24 = vpop.f32.mrf.mxu0  ;;  %v1943_v25 = vpop.f32.mrf.mxu1  ;;  %2299 = vmatprep.mubr.f32.mxu0 %v7984_v34  ;;  %2556 = vmatprep.mubr.f32.mxu1 %v7984_v34 }
 0x1b5   : > { %v2076_v26 = vmul.f32 0.03125, %v1942_v27  ;;  %2980 = vmatpush1.msra.mxu0 %v5092_v29  ;;  %3205 = vmatpush1.msra.mxu1 %v5093_v28  ;;  %v5094_v27 = vld [vmem:[%s7736_s2 + $0x48] sm:$0xff] }
 0x1b6   : > { %v1721_v33 = vpop.f32.mrf.mxu0  ;;  %v1946_v35 = vpop.f32.mrf.mxu1  ;;  %2981 = vmatprep.subr.mxu0 %v7984_v34  ;;  %3206 = vmatprep.subr.mxu1 %v7984_v34  ;;  %v5095_v24 = vld [vmem:[%s7736_s2 + $0x148] sm:$0xff] }
 0x1b7   : > { %v1947_v36 = vadd.f32 %v1946_v35, %v1721_v33  ;;  %4839 = vmatmul.mubr.msk.f32.gmra.mxu0 %vm2102_vm1, %v2076_v26  ;;  %4871 = vmatmul.mubr.msk.f32.gmra.mxu1 %vm2102_vm1, %v2076_v26 }
 0x1b8   : > { %v1723_v41 = vpop.f32.mrf.mxu0  ;;  %v1948_v42 = vpop.f32.mrf.mxu1  ;;  %2305 = vmatprep.mubr.f32.mxu0 %v7984_v34  ;;  %2562 = vmatprep.mubr.f32.mxu1 %v7984_v34 }
 0x1b9   : > { %v2077_v10 = vmul.f32 0.03125, %v1947_v36  ;;  %2982 = vmatpush1.msra.mxu0 %v5094_v27  ;;  %3207 = vmatpush1.msra.mxu1 %v5095_v24  ;;  %v5096_v36 = vld [vmem:[%s7736_s2 + $0x40] sm:$0xff] }
 0x1ba   : > { %v1726_v25 = vpop.f32.mrf.mxu0  ;;  %v1951_v29 = vpop.f32.mrf.mxu1  ;;  %2983 = vmatprep.subr.mxu0 %v7984_v34  ;;  %3208 = vmatprep.subr.mxu1 %v7984_v34  ;;  %v5097_v41 = vld [vmem:[%s7736_s2 + $0x140] sm:$0xff] }
 0x1bb   : > { %v1952_v26 = vadd.f32 %v1951_v29, %v1726_v25  ;;  %4840 = vmatmul.mubr.msk.f32.gmra.mxu0 %vm2102_vm1, %v2077_v10  ;;  %4872 = vmatmul.mubr.msk.f32.gmra.mxu1 %vm2102_vm1, %v2077_v10 }
 0x1bc   : > { %v1728_v28 = vpop.f32.mrf.mxu0  ;;  %v1953_v33 = vpop.f32.mrf.mxu1  ;;  %2311 = vmatprep.mubr.f32.mxu0 %v7984_v34  ;;  %2568 = vmatprep.mubr.f32.mxu1 %v7984_v34 }
 0x1bd   : > { %v2078_v35 = vmul.f32 0.03125, %v1952_v26  ;;  %2984 = vmatpush1.msra.mxu0 %v5096_v36  ;;  %3209 = vmatpush1.msra.mxu1 %v5097_v41  ;;  %v5098_v26 = vld [vmem:[%s7736_s2 + $0x38] sm:$0xff] }
 0x1be   : > { %v1731_v42 = vpop.f32.mrf.mxu0  ;;  %v1956_v27 = vpop.f32.mrf.mxu1  ;;  %2985 = vmatprep.subr.mxu0 %v7984_v34  ;;  %3210 = vmatprep.subr.mxu1 %v7984_v34  ;;  %v5099_v28 = vld [vmem:[%s7736_s2 + $0x138] sm:$0xff] }
 0x1bf   : > { %v1957_v10 = vadd.f32 %v1956_v27, %v1731_v42  ;;  %4841 = vmatmul.mubr.msk.f32.gmra.mxu0 %vm2102_vm1, %v2078_v35  ;;  %4873 = vmatmul.mubr.msk.f32.gmra.mxu1 %vm2102_vm1, %v2078_v35 }
 0x1c0   : > { %v1733_v24 = vpop.f32.mrf.mxu0  ;;  %v1958_v25 = vpop.f32.mrf.mxu1  ;;  %2317 = vmatprep.mubr.f32.mxu0 %v7984_v34  ;;  %2574 = vmatprep.mubr.f32.mxu1 %v7984_v34 }
 0x1c1   : > { %v2079_v29 = vmul.f32 0.03125, %v1957_v10  ;;  %2986 = vmatpush1.msra.mxu0 %v5098_v26  ;;  %3211 = vmatpush1.msra.mxu1 %v5099_v28  ;;  %v5100_v10 = vld [vmem:[%s7736_s2 + $0x30] sm:$0xff] }
 0x1c2   : > { %v1736_v33 = vpop.f32.mrf.mxu0  ;;  %v1961_v36 = vpop.f32.mrf.mxu1  ;;  %2987 = vmatprep.subr.mxu0 %v7984_v34  ;;  %3212 = vmatprep.subr.mxu1 %v7984_v34  ;;  %v5101_v24 = vld [vmem:[%s7736_s2 + $0x130] sm:$0xff] }
 0x1c3   : > { %v1962_v35 = vadd.f32 %v1961_v36, %v1736_v33  ;;  %4842 = vmatmul.mubr.msk.f32.gmra.mxu0 %vm2102_vm1, %v2079_v29  ;;  %4874 = vmatmul.mubr.msk.f32.gmra.mxu1 %vm2102_vm1, %v2079_v29 }
 0x1c4   : > { %v1738_v41 = vpop.f32.mrf.mxu0  ;;  %v1963_v42 = vpop.f32.mrf.mxu1  ;;  %2323 = vmatprep.mubr.f32.mxu0 %v7984_v34  ;;  %2580 = vmatprep.mubr.f32.mxu1 %v7984_v34 }
 0x1c5   : > { %v2080_v27 = vmul.f32 0.03125, %v1962_v35  ;;  %2988 = vmatpush1.msra.mxu0 %v5100_v10  ;;  %3213 = vmatpush1.msra.mxu1 %v5101_v24  ;;  %v5102_v35 = vld [vmem:[%s7736_s2 + $0x28] sm:$0xff] }
 0x1c6   : > { %v1741_v25 = vpop.f32.mrf.mxu0  ;;  %v1966_v26 = vpop.f32.mrf.mxu1  ;;  %2989 = vmatprep.subr.mxu0 %v7984_v34  ;;  %3214 = vmatprep.subr.mxu1 %v7984_v34  ;;  %v5103_v41 = vld [vmem:[%s7736_s2 + $0x128] sm:$0xff] }
 0x1c7   : > { %v1967_v29 = vadd.f32 %v1966_v26, %v1741_v25  ;;  %4843 = vmatmul.mubr.msk.f32.gmra.mxu0 %vm2102_vm1, %v2080_v27  ;;  %4875 = vmatmul.mubr.msk.f32.gmra.mxu1 %vm2102_vm1, %v2080_v27 }
 0x1c8   : > { %v1743_v28 = vpop.f32.mrf.mxu0  ;;  %v1968_v33 = vpop.f32.mrf.mxu1  ;;  %2329 = vmatprep.mubr.f32.mxu0 %v7984_v34  ;;  %2586 = vmatprep.mubr.f32.mxu1 %v7984_v34 }
 0x1c9   : > { %v2081_v36 = vmul.f32 0.03125, %v1967_v29  ;;  %2990 = vmatpush1.msra.mxu0 %v5102_v35  ;;  %3215 = vmatpush1.msra.mxu1 %v5103_v41  ;;  %v5104_v29 = vld [vmem:[%s7736_s2 + $0x20] sm:$0xff] }
 0x1ca   : > { %v1746_v42 = vpop.f32.mrf.mxu0  ;;  %v1971_v10 = vpop.f32.mrf.mxu1  ;;  %2991 = vmatprep.subr.mxu0 %v7984_v34  ;;  %3216 = vmatprep.subr.mxu1 %v7984_v34  ;;  %v5105_v28 = vld [vmem:[%s7736_s2 + $0x120] sm:$0xff] }
 0x1cb   : > { %v1972_v27 = vadd.f32 %v1971_v10, %v1746_v42  ;;  %4844 = vmatmul.mubr.msk.f32.gmra.mxu0 %vm2102_vm1, %v2081_v36  ;;  %4876 = vmatmul.mubr.msk.f32.gmra.mxu1 %vm2102_vm1, %v2081_v36 }
 0x1cc   : > { %v1748_v24 = vpop.f32.mrf.mxu0  ;;  %v1973_v25 = vpop.f32.mrf.mxu1  ;;  %2335 = vmatprep.mubr.f32.mxu0 %v7984_v34  ;;  %2592 = vmatprep.mubr.f32.mxu1 %v7984_v34 }
 0x1cd   : > { %v2082_v26 = vmul.f32 0.03125, %v1972_v27  ;;  %2992 = vmatpush1.msra.mxu0 %v5104_v29  ;;  %3217 = vmatpush1.msra.mxu1 %v5105_v28  ;;  %v5106_v27 = vld [vmem:[%s7736_s2 + $0x18] sm:$0xff] }
 0x1ce   : > { %v1751_v33 = vpop.f32.mrf.mxu0  ;;  %v1976_v35 = vpop.f32.mrf.mxu1  ;;  %2993 = vmatprep.subr.mxu0 %v7984_v34  ;;  %3218 = vmatprep.subr.mxu1 %v7984_v34  ;;  %v5107_v24 = vld [vmem:[%s7736_s2 + $0x118] sm:$0xff] }
 0x1cf   : > { %v1977_v36 = vadd.f32 %v1976_v35, %v1751_v33  ;;  %4845 = vmatmul.mubr.msk.f32.gmra.mxu0 %vm2102_vm1, %v2082_v26  ;;  %4877 = vmatmul.mubr.msk.f32.gmra.mxu1 %vm2102_vm1, %v2082_v26 }
 0x1d0   : > { %v1753_v41 = vpop.f32.mrf.mxu0  ;;  %v1978_v42 = vpop.f32.mrf.mxu1  ;;  %2341 = vmatprep.mubr.f32.mxu0 %v7984_v34  ;;  %2598 = vmatprep.mubr.f32.mxu1 %v7984_v34 }
 0x1d1   : > { %v2083_v10 = vmul.f32 0.03125, %v1977_v36  ;;  %2994 = vmatpush1.msra.mxu0 %v5106_v27  ;;  %3219 = vmatpush1.msra.mxu1 %v5107_v24  ;;  %v5108_v36 = vld [vmem:[%s7736_s2 + $0x10] sm:$0xff] }
 0x1d2   : > { %v1756_v25 = vpop.f32.mrf.mxu0  ;;  %v1981_v29 = vpop.f32.mrf.mxu1  ;;  %2995 = vmatprep.subr.mxu0 %v7984_v34  ;;  %3220 = vmatprep.subr.mxu1 %v7984_v34  ;;  %v5109_v41 = vld [vmem:[%s7736_s2 + $0x110] sm:$0xff] }
 0x1d3   : > { %v1982_v26 = vadd.f32 %v1981_v29, %v1756_v25  ;;  %4846 = vmatmul.mubr.msk.f32.gmra.mxu0 %vm2102_vm1, %v2083_v10  ;;  %4878 = vmatmul.mubr.msk.f32.gmra.mxu1 %vm2102_vm1, %v2083_v10 }
 0x1d4   : > { %v1758_v28 = vpop.f32.mrf.mxu0  ;;  %v1983_v33 = vpop.f32.mrf.mxu1  ;;  %2347 = vmatprep.mubr.f32.mxu0 %v7984_v34  ;;  %2604 = vmatprep.mubr.f32.mxu1 %v7984_v34 }
 0x1d5   : > { %v2084_v35 = vmul.f32 0.03125, %v1982_v26  ;;  %2996 = vmatpush1.msra.mxu0 %v5108_v36  ;;  %3221 = vmatpush1.msra.mxu1 %v5109_v41  ;;  %v5110_v26 = vld [vmem:[%s7736_s2 + $0x8] sm:$0xff] }
 0x1d6   : > { %v1761_v42 = vpop.f32.mrf.mxu0  ;;  %v1986_v27 = vpop.f32.mrf.mxu1  ;;  %2997 = vmatprep.subr.mxu0 %v7984_v34  ;;  %3222 = vmatprep.subr.mxu1 %v7984_v34  ;;  %v5111_v28 = vld [vmem:[%s7736_s2 + $0x108] sm:$0xff] }
 0x1d7   : > { %v1987_v10 = vadd.f32 %v1986_v27, %v1761_v42  ;;  %4847 = vmatmul.mubr.msk.f32.gmra.mxu0 %vm2102_vm1, %v2084_v35  ;;  %4879 = vmatmul.mubr.msk.f32.gmra.mxu1 %vm2102_vm1, %v2084_v35 }
 0x1d8   : > { %v1763_v24 = vpop.f32.mrf.mxu0  ;;  %v1988_v25 = vpop.f32.mrf.mxu1  ;;  %2353 = vmatprep.mubr.f32.mxu0 %v7984_v34  ;;  %2610 = vmatprep.mubr.f32.mxu1 %v7984_v34 }
 0x1d9   : > { %v2085_v29 = vmul.f32 0.03125, %v1987_v10  ;;  %2998 = vmatpush1.msra.mxu0 %v5110_v26  ;;  %3223 = vmatpush1.msra.mxu1 %v5111_v28  ;;  %v5112_v10 = vld [vmem:[%s7736_s2] sm:$0xff] }
 0x1da   : > { %v1766_v33 = vpop.f32.mrf.mxu0  ;;  %v1991_v36 = vpop.f32.mrf.mxu1  ;;  %2999 = vmatprep.subr.mxu0 %v7984_v34  ;;  %3224 = vmatprep.subr.mxu1 %v7984_v34  ;;  %v5113_v24 = vld [vmem:[%s7736_s2 + $0x100] sm:$0xff] }
 0x1db   : > { %v1992_v35 = vadd.f32 %v1991_v36, %v1766_v33  ;;  %4848 = vmatmul.mubr.msk.f32.gmra.mxu0 %vm2102_vm1, %v2085_v29  ;;  %4880 = vmatmul.mubr.msk.f32.gmra.mxu1 %vm2102_vm1, %v2085_v29 }
 0x1dc   : > { %v1768_v41 = vpop.f32.mrf.mxu0  ;;  %v1993_v42 = vpop.f32.mrf.mxu1  ;;  %2359 = vmatprep.mubr.f32.mxu0 %v7984_v34  ;;  %2616 = vmatprep.mubr.f32.mxu1 %v7984_v34 }
 0x1dd   : > { %v2086_v27 = vmul.f32 0.03125, %v1992_v35  ;;  %3000 = vmatpush1.msra.mxu0 %v5112_v10  ;;  %3225 = vmatpush1.msra.mxu1 %v5113_v24  ;;  %v5114_v35 = vld [vmem:[%s7736_s2 + $0xf8] sm:$0xff] }
 0x1de   : > { %v1771_v25 = vpop.f32.mrf.mxu0  ;;  %v1996_v26 = vpop.f32.mrf.mxu1  ;;  %3001 = vmatprep.subr.mxu0 %v7984_v34  ;;  %3226 = vmatprep.subr.mxu1 %v7984_v34  ;;  %v5115_v41 = vld [vmem:[%s7736_s2 + $0x1f8] sm:$0xff] }
 0x1df   : > { %v1997_v29 = vadd.f32 %v1996_v26, %v1771_v25  ;;  %4849 = vmatmul.mubr.msk.f32.gmra.mxu0 %vm2102_vm1, %v2086_v27  ;;  %4881 = vmatmul.mubr.msk.f32.gmra.mxu1 %vm2102_vm1, %v2086_v27 }
 0x1e0   : > { %v1773_v28 = vpop.f32.mrf.mxu0  ;;  %v1998_v33 = vpop.f32.mrf.mxu1  ;;  %2365 = vmatprep.mubr.f32.mxu0 %v7984_v34  ;;  %2622 = vmatprep.mubr.f32.mxu1 %v7984_v34 }
 0x1e1   : > { %v2087_v36 = vmul.f32 0.03125, %v1997_v29  ;;  %3002 = vmatpush2.msra.mxu0 %v5114_v35  ;;  %3227 = vmatpush2.msra.mxu1 %v5115_v41  ;;  %v5116_v29 = vld [vmem:[%s7736_s2 + $0xf0] sm:$0xff] }
 0x1e2   : > { %v1776_v42 = vpop.f32.mrf.mxu0  ;;  %v2001_v10 = vpop.f32.mrf.mxu1  ;;  %3003 = vmatprep.subr.mxu0 %v7984_v34  ;;  %3228 = vmatprep.subr.mxu1 %v7984_v34  ;;  %v5117_v28 = vld [vmem:[%s7736_s2 + $0x1f0] sm:$0xff] }
 0x1e3   : > { %v2002_v27 = vadd.f32 %v2001_v10, %v1776_v42  ;;  %4850 = vmatmul.mubr.msk.f32.gmra.mxu0 %vm2102_vm1, %v2087_v36  ;;  %4882 = vmatmul.mubr.msk.f32.gmra.mxu1 %vm2102_vm1, %v2087_v36 }
 0x1e4   : > { %v1778_v24 = vpop.f32.mrf.mxu0  ;;  %v2003_v25 = vpop.f32.mrf.mxu1  ;;  %2371 = vmatprep.mubr.f32.mxu0 %v7984_v34  ;;  %2628 = vmatprep.mubr.f32.mxu1 %v7984_v34 }
 0x1e5   : > { %v2088_v26 = vmul.f32 0.03125, %v2002_v27  ;;  %3004 = vmatpush2.msra.mxu0 %v5116_v29  ;;  %3229 = vmatpush2.msra.mxu1 %v5117_v28  ;;  %v5118_v27 = vld [vmem:[%s7736_s2 + $0xe8] sm:$0xff] }
 0x1e6   : > { %v1781_v33 = vpop.f32.mrf.mxu0  ;;  %v2006_v35 = vpop.f32.mrf.mxu1  ;;  %3005 = vmatprep.subr.mxu0 %v7984_v34  ;;  %3230 = vmatprep.subr.mxu1 %v7984_v34  ;;  %v5119_v24 = vld [vmem:[%s7736_s2 + $0x1e8] sm:$0xff] }
 0x1e7   : > { %v2007_v36 = vadd.f32 %v2006_v35, %v1781_v33  ;;  %4851 = vmatmul.mubr.msk.f32.gmra.mxu0 %vm2102_vm1, %v2088_v26  ;;  %4883 = vmatmul.mubr.msk.f32.gmra.mxu1 %vm2102_vm1, %v2088_v26 }
 0x1e8   : > { %v1783_v41 = vpop.f32.mrf.mxu0  ;;  %v2008_v42 = vpop.f32.mrf.mxu1  ;;  %2377 = vmatprep.mubr.f32.mxu0 %v7984_v34  ;;  %2634 = vmatprep.mubr.f32.mxu1 %v7984_v34 }
 0x1e9   : > { %v2089_v10 = vmul.f32 0.03125, %v2007_v36  ;;  %3006 = vmatpush2.msra.mxu0 %v5118_v27  ;;  %3231 = vmatpush2.msra.mxu1 %v5119_v24  ;;  %v5120_v36 = vld [vmem:[%s7736_s2 + $0xe0] sm:$0xff] }
 0x1ea   : > { %v1786_v25 = vpop.f32.mrf.mxu0  ;;  %v2011_v29 = vpop.f32.mrf.mxu1  ;;  %3007 = vmatprep.subr.mxu0 %v7984_v34  ;;  %3232 = vmatprep.subr.mxu1 %v7984_v34  ;;  %v5121_v41 = vld [vmem:[%s7736_s2 + $0x1e0] sm:$0xff] }
 0x1eb   : > { %v2012_v26 = vadd.f32 %v2011_v29, %v1786_v25  ;;  %4852 = vmatmul.mubr.msk.f32.gmra.mxu0 %vm2102_vm1, %v2089_v10  ;;  %4884 = vmatmul.mubr.msk.f32.gmra.mxu1 %vm2102_vm1, %v2089_v10 }
 0x1ec   : > { %v1788_v28 = vpop.f32.mrf.mxu0  ;;  %v2013_v33 = vpop.f32.mrf.mxu1  ;;  %2383 = vmatprep.mubr.f32.mxu0 %v7984_v34  ;;  %2640 = vmatprep.mubr.f32.mxu1 %v7984_v34 }
 0x1ed   : > { %v2090_v35 = vmul.f32 0.03125, %v2012_v26  ;;  %3008 = vmatpush2.msra.mxu0 %v5120_v36  ;;  %3233 = vmatpush2.msra.mxu1 %v5121_v41  ;;  %v5122_v26 = vld [vmem:[%s7736_s2 + $0xd8] sm:$0xff] }
 0x1ee   : > { %v1791_v42 = vpop.f32.mrf.mxu0  ;;  %v2016_v27 = vpop.f32.mrf.mxu1  ;;  %3009 = vmatprep.subr.mxu0 %v7984_v34  ;;  %3234 = vmatprep.subr.mxu1 %v7984_v34  ;;  %v5123_v28 = vld [vmem:[%s7736_s2 + $0x1d8] sm:$0xff] }
 0x1ef   : > { %v2017_v10 = vadd.f32 %v2016_v27, %v1791_v42  ;;  %4853 = vmatmul.mubr.msk.f32.gmra.mxu0 %vm2102_vm1, %v2090_v35  ;;  %4885 = vmatmul.mubr.msk.f32.gmra.mxu1 %vm2102_vm1, %v2090_v35 }
 0x1f0   : > { %v1793_v24 = vpop.f32.mrf.mxu0  ;;  %v2018_v25 = vpop.f32.mrf.mxu1  ;;  %2389 = vmatprep.mubr.f32.mxu0 %v7984_v34  ;;  %2646 = vmatprep.mubr.f32.mxu1 %v7984_v34 }
 0x1f1   : > { %v2091_v29 = vmul.f32 0.03125, %v2017_v10  ;;  %3010 = vmatpush2.msra.mxu0 %v5122_v26  ;;  %3235 = vmatpush2.msra.mxu1 %v5123_v28  ;;  %v5124_v10 = vld [vmem:[%s7736_s2 + $0xd0] sm:$0xff] }
 0x1f2   : > { %v1796_v33 = vpop.f32.mrf.mxu0  ;;  %v2021_v36 = vpop.f32.mrf.mxu1  ;;  %3011 = vmatprep.subr.mxu0 %v7984_v34  ;;  %3236 = vmatprep.subr.mxu1 %v7984_v34  ;;  %v5125_v24 = vld [vmem:[%s7736_s2 + $0x1d0] sm:$0xff] }
 0x1f3   : > { %v2022_v35 = vadd.f32 %v2021_v36, %v1796_v33  ;;  %4854 = vmatmul.mubr.msk.f32.gmra.mxu0 %vm2102_vm1, %v2091_v29  ;;  %4886 = vmatmul.mubr.msk.f32.gmra.mxu1 %vm2102_vm1, %v2091_v29 }
 0x1f4   : > { %v1798_v41 = vpop.f32.mrf.mxu0  ;;  %v2023_v42 = vpop.f32.mrf.mxu1  ;;  %2395 = vmatprep.mubr.f32.mxu0 %v7984_v34  ;;  %2652 = vmatprep.mubr.f32.mxu1 %v7984_v34 }
 0x1f5   : > { %v2092_v27 = vmul.f32 0.03125, %v2022_v35  ;;  %3012 = vmatpush2.msra.mxu0 %v5124_v10  ;;  %3237 = vmatpush2.msra.mxu1 %v5125_v24  ;;  %v5126_v35 = vld [vmem:[%s7736_s2 + $0xc8] sm:$0xff] }
 0x1f6   : > { %v1801_v25 = vpop.f32.mrf.mxu0  ;;  %v2026_v26 = vpop.f32.mrf.mxu1  ;;  %3013 = vmatprep.subr.mxu0 %v7984_v34  ;;  %3238 = vmatprep.subr.mxu1 %v7984_v34  ;;  %v5127_v41 = vld [vmem:[%s7736_s2 + $0x1c8] sm:$0xff] }
 0x1f7   : > { %v2027_v29 = vadd.f32 %v2026_v26, %v1801_v25  ;;  %4855 = vmatmul.mubr.msk.f32.gmra.mxu0 %vm2102_vm1, %v2092_v27  ;;  %4887 = vmatmul.mubr.msk.f32.gmra.mxu1 %vm2102_vm1, %v2092_v27 }
 0x1f8   : > { %v1803_v28 = vpop.f32.mrf.mxu0  ;;  %v2028_v33 = vpop.f32.mrf.mxu1  ;;  %2401 = vmatprep.mubr.f32.mxu0 %v7984_v34  ;;  %2658 = vmatprep.mubr.f32.mxu1 %v7984_v34 }
 0x1f9   : > { %v2093_v36 = vmul.f32 0.03125, %v2027_v29  ;;  %3014 = vmatpush2.msra.mxu0 %v5126_v35  ;;  %3239 = vmatpush2.msra.mxu1 %v5127_v41  ;;  %v5128_v29 = vld [vmem:[%s7736_s2 + $0xc0] sm:$0xff] }
 0x1fa   : > { %v1806_v42 = vpop.f32.mrf.mxu0  ;;  %v2031_v10 = vpop.f32.mrf.mxu1  ;;  %3015 = vmatprep.subr.mxu0 %v7984_v34  ;;  %3240 = vmatprep.subr.mxu1 %v7984_v34  ;;  %v5129_v28 = vld [vmem:[%s7736_s2 + $0x1c0] sm:$0xff] }
 0x1fb   : > { %v2032_v27 = vadd.f32 %v2031_v10, %v1806_v42  ;;  %4856 = vmatmul.mubr.msk.f32.gmra.mxu0 %vm2102_vm1, %v2093_v36  ;;  %4888 = vmatmul.mubr.msk.f32.gmra.mxu1 %vm2102_vm1, %v2093_v36 }
 0x1fc   : > { %v1808_v24 = vpop.f32.mrf.mxu0  ;;  %v2033_v25 = vpop.f32.mrf.mxu1  ;;  %2407 = vmatprep.mubr.f32.mxu0 %v7984_v34  ;;  %2664 = vmatprep.mubr.f32.mxu1 %v7984_v34 }
 0x1fd   : > { %v2094_v26 = vmul.f32 0.03125, %v2032_v27  ;;  %3016 = vmatpush2.msra.mxu0 %v5128_v29  ;;  %3241 = vmatpush2.msra.mxu1 %v5129_v28  ;;  %v5130_v27 = vld [vmem:[%s7736_s2 + $0xb8] sm:$0xff] }
 0x1fe   : > { %v1811_v33 = vpop.f32.mrf.mxu0  ;;  %v2036_v35 = vpop.f32.mrf.mxu1  ;;  %3017 = vmatprep.subr.mxu0 %v7984_v34  ;;  %3242 = vmatprep.subr.mxu1 %v7984_v34  ;;  %v5131_v24 = vld [vmem:[%s7736_s2 + $0x1b8] sm:$0xff] }
 0x1ff   : > { %v2037_v36 = vadd.f32 %v2036_v35, %v1811_v33  ;;  %4857 = vmatmul.mubr.msk.f32.gmra.mxu0 %vm2102_vm1, %v2094_v26  ;;  %4889 = vmatmul.mubr.msk.f32.gmra.mxu1 %vm2102_vm1, %v2094_v26 }
 0x200   : > { %v1813_v41 = vpop.f32.mrf.mxu0  ;;  %v2038_v42 = vpop.f32.mrf.mxu1  ;;  %2413 = vmatprep.mubr.f32.mxu0 %v7984_v34  ;;  %2670 = vmatprep.mubr.f32.mxu1 %v7984_v34 }
 0x201   : > { %v2095_v10 = vmul.f32 0.03125, %v2037_v36  ;;  %3018 = vmatpush2.msra.mxu0 %v5130_v27  ;;  %3243 = vmatpush2.msra.mxu1 %v5131_v24  ;;  %v5132_v36 = vld [vmem:[%s7736_s2 + $0xb0] sm:$0xff] }
 0x202   : > { %v1816_v25 = vpop.f32.mrf.mxu0  ;;  %v2041_v29 = vpop.f32.mrf.mxu1  ;;  %3019 = vmatprep.subr.mxu0 %v7984_v34  ;;  %3244 = vmatprep.subr.mxu1 %v7984_v34  ;;  %v5133_v41 = vld [vmem:[%s7736_s2 + $0x1b0] sm:$0xff] }
 0x203   : > { %v2042_v26 = vadd.f32 %v2041_v29, %v1816_v25  ;;  %4858 = vmatmul.mubr.msk.f32.gmra.mxu0 %vm2102_vm1, %v2095_v10  ;;  %4890 = vmatmul.mubr.msk.f32.gmra.mxu1 %vm2102_vm1, %v2095_v10 }
 0x204   : > { %v1818_v28 = vpop.f32.mrf.mxu0  ;;  %v2043_v33 = vpop.f32.mrf.mxu1  ;;  %2419 = vmatprep.mubr.f32.mxu0 %v7984_v34  ;;  %2676 = vmatprep.mubr.f32.mxu1 %v7984_v34 }
 0x205   : > { %v2096_v35 = vmul.f32 0.03125, %v2042_v26  ;;  %3020 = vmatpush2.msra.mxu0 %v5132_v36  ;;  %3245 = vmatpush2.msra.mxu1 %v5133_v41  ;;  %v5134_v26 = vld [vmem:[%s7736_s2 + $0xa8] sm:$0xff] }
 0x206   : > { %v1821_v42 = vpop.f32.mrf.mxu0  ;;  %v2046_v27 = vpop.f32.mrf.mxu1  ;;  %3021 = vmatprep.subr.mxu0 %v7984_v34  ;;  %3246 = vmatprep.subr.mxu1 %v7984_v34  ;;  %v5135_v28 = vld [vmem:[%s7736_s2 + $0x1a8] sm:$0xff] }
 0x207   : > { %v2047_v10 = vadd.f32 %v2046_v27, %v1821_v42  ;;  %4859 = vmatmul.mubr.msk.f32.gmra.mxu0 %vm2102_vm1, %v2096_v35  ;;  %4891 = vmatmul.mubr.msk.f32.gmra.mxu1 %vm2102_vm1, %v2096_v35 }
 0x208   : > { %v1823_v24 = vpop.f32.mrf.mxu0  ;;  %v2048_v25 = vpop.f32.mrf.mxu1  ;;  %2425 = vmatprep.mubr.f32.mxu0 %v7984_v34  ;;  %2682 = vmatprep.mubr.f32.mxu1 %v7984_v34 }
 0x209   : > { %v2097_v29 = vmul.f32 0.03125, %v2047_v10  ;;  %3022 = vmatpush2.msra.mxu0 %v5134_v26  ;;  %3247 = vmatpush2.msra.mxu1 %v5135_v28  ;;  %v5136_v10 = vld [vmem:[%s7736_s2 + $0xa0] sm:$0xff] }
 0x20a   : > { %v1826_v33 = vpop.f32.mrf.mxu0  ;;  %v2051_v36 = vpop.f32.mrf.mxu1  ;;  %3023 = vmatprep.subr.mxu0 %v7984_v34  ;;  %3248 = vmatprep.subr.mxu1 %v7984_v34  ;;  %v5137_v24 = vld [vmem:[%s7736_s2 + $0x1a0] sm:$0xff] }
 0x20b   : > { %v2052_v35 = vadd.f32 %v2051_v36, %v1826_v33  ;;  %4860 = vmatmul.mubr.msk.f32.gmra.mxu0 %vm2102_vm1, %v2097_v29  ;;  %4892 = vmatmul.mubr.msk.f32.gmra.mxu1 %vm2102_vm1, %v2097_v29 }
 0x20c   : > { %v1828_v41 = vpop.f32.mrf.mxu0  ;;  %v2053_v42 = vpop.f32.mrf.mxu1  ;;  %2431 = vmatprep.mubr.f32.mxu0 %v7984_v34  ;;  %2688 = vmatprep.mubr.f32.mxu1 %v7984_v34 }
 0x20d   : > { %v2098_v27 = vmul.f32 0.03125, %v2052_v35  ;;  %3024 = vmatpush2.msra.mxu0 %v5136_v10  ;;  %3249 = vmatpush2.msra.mxu1 %v5137_v24  ;;  %v5138_v35 = vld [vmem:[%s7736_s2 + $0x98] sm:$0xff] }
 0x20e   : > { %v1831_v25 = vpop.f32.mrf.mxu0  ;;  %v2056_v26 = vpop.f32.mrf.mxu1  ;;  %3025 = vmatprep.subr.mxu0 %v7984_v34  ;;  %3250 = vmatprep.subr.mxu1 %v7984_v34  ;;  %v5139_v41 = vld [vmem:[%s7736_s2 + $0x198] sm:$0xff] }
 0x20f   : > { %v2057_v29 = vadd.f32 %v2056_v26, %v1831_v25  ;;  %4861 = vmatmul.mubr.msk.f32.gmra.mxu0 %vm2102_vm1, %v2098_v27  ;;  %4893 = vmatmul.mubr.msk.f32.gmra.mxu1 %vm2102_vm1, %v2098_v27 }
 0x210   : > { %v1833_v28 = vpop.f32.mrf.mxu0  ;;  %v2058_v33 = vpop.f32.mrf.mxu1  ;;  %2437 = vmatprep.mubr.f32.mxu0 %v7984_v34  ;;  %2694 = vmatprep.mubr.f32.mxu1 %v7984_v34 }
 0x211   : > { %v2099_v36 = vmul.f32 0.03125, %v2057_v29  ;;  %3026 = vmatpush2.msra.mxu0 %v5138_v35  ;;  %3251 = vmatpush2.msra.mxu1 %v5139_v41  ;;  %v5140_v29 = vld [vmem:[%s7736_s2 + $0x90] sm:$0xff] }
 0x212   : > { %v1836_v42 = vpop.f32.mrf.mxu0  ;;  %v2061_v10 = vpop.f32.mrf.mxu1  ;;  %3027 = vmatprep.subr.mxu0 %v7984_v34  ;;  %3252 = vmatprep.subr.mxu1 %v7984_v34  ;;  %v5141_v28 = vld [vmem:[%s7736_s2 + $0x190] sm:$0xff] }
 0x213   : > { %v2062_v27 = vadd.f32 %v2061_v10, %v1836_v42  ;;  %4862 = vmatmul.mubr.msk.f32.gmra.mxu0 %vm2102_vm1, %v2099_v36  ;;  %4894 = vmatmul.mubr.msk.f32.gmra.mxu1 %vm2102_vm1, %v2099_v36 }
 0x214   : > { %v1838_v24 = vpop.f32.mrf.mxu0  ;;  %v2063_v25 = vpop.f32.mrf.mxu1  ;;  %2443 = vmatprep.mubr.f32.mxu0 %v7984_v34  ;;  %2700 = vmatprep.mubr.f32.mxu1 %v7984_v34 }
 0x215   : > { %v2100_v26 = vmul.f32 0.03125, %v2062_v27  ;;  %3028 = vmatpush2.msra.mxu0 %v5140_v29  ;;  %3253 = vmatpush2.msra.mxu1 %v5141_v28  ;;  %v5142_v27 = vld [vmem:[%s7736_s2 + $0x88] sm:$0xff]  ;;  %v5144_v25 = vld [vmem:[%s7736_s2 + $0x80] sm:$0xff]  ;;  %v5147_v28 = vld [vmem:[%s7737_s3 + $0x38] sm:$0xff] }
 0x216   : > { %v1841_v33 = vpop.f32.mrf.mxu0  ;;  %v2066_v35 = vpop.f32.mrf.mxu1  ;;  %3029 = vmatprep.subr.mxu0 %v7984_v34  ;;  %3254 = vmatprep.subr.mxu1 %v7984_v34  ;;  %v5143_v24 = vld [vmem:[%s7736_s2 + $0x188] sm:$0xff] }
 0x217   : > { %v2067_v36 = vadd.f32 %v2066_v35, %v1841_v33  ;;  %4863 = vmatmul.mubr.msk.f32.gmra.mxu0 %vm2102_vm1, %v2100_v26  ;;  %4895 = vmatmul.mubr.msk.f32.gmra.mxu1 %vm2102_vm1, %v2100_v26  ;;  %v5145_v26 = vld [vmem:[%s7736_s2 + $0x180] sm:$0xff]  ;;  %v5146_v29 = vld [vmem:[%s7737_s3 + $0x28] sm:$0xff] }
 0x218   : > { %v1843_v41 = vpop.f32.mrf.mxu0  ;;  %v2068_v42 = vpop.f32.mrf.mxu1  ;;  %2449 = vmatprep.mubr.f32.mxu0 %v7984_v34  ;;  %2706 = vmatprep.mubr.f32.mxu1 %v7984_v34 }
 0x219   : > { %v2101_v10 = vmul.f32 0.03125, %v2067_v36  ;;  %3030 = vmatpush2.msra.mxu0 %v5142_v27  ;;  %3255 = vmatpush2.msra.mxu1 %v5143_v24 }
 0x21a   : > { %3031 = vmatprep.subr.mxu0 %v7984_v34  ;;  %3256 = vmatprep.subr.mxu1 %v7984_v34 }
 0x21b   : > { %4864 = vmatmul.mubr.msk.f32.gmra.mxu0 %vm2102_vm1, %v2101_v10  ;;  %4896 = vmatmul.mubr.msk.f32.gmra.mxu1 %vm2102_vm1, %v2101_v10 }
 0x21c   : > { %3032 = vmatpush2.msra.mxu0 %v5144_v25  ;;  %3257 = vmatpush2.msra.mxu1 %v5145_v26 }
 0x21d   : > { %3639 = vmatprep.subr.mxu0 %v5146_v29  ;;  %3896 = vmatprep.subr.mxu1 %v5147_v28 }
 0x25f   : > { %v2265_v33 = vpop.f32.mrf.mxu0  ;;  %v2522_v35 = vpop.f32.mrf.mxu1 }
 0x260   : > { %v6400_v36 = vsub.f32 %v5607_v30, %v2265_v33  ;;  %v6403_v10 = vsub.f32 %v5609_v31, %v2522_v35 }
 0x261   : > { %v2267_v41 = vpop.f32.mrf.mxu0  ;;  %v2524_v42 = vpop.f32.mrf.mxu1 }
 0x262   : > { %v6406_v27 = vsub.f32 %v5611_v2, %v2267_v41  ;;  %v6409_v24 = vsub.f32 %v5613_v32, %v2524_v42  ;;  %v2841_v28 = vmul.f32 %v6400_v36, %v6400_v36  ;;  %v2843_v32 = vmul.f32 %v6403_v10, %v6403_v10 }
 0x263   : > { %v2271_v25 = vpop.f32.mrf.mxu0  ;;  %v2528_v26 = vpop.f32.mrf.mxu1 }
 0x264   : > { %7985 = vst [vmem:[#allocation80_spill] sm:$0xff] %v6406_v27  ;;  %7986 = vst [vmem:[#allocation81_spill] sm:$0xff] %v6409_v24  ;;  %v2842_v29 = vmul.f32 %v6406_v27, %v6406_v27  ;;  %v2844_v30 = vmul.f32 %v6409_v24, %v6409_v24  ;;  %v6418_v31 = vsub.f32 %v5629_v37, %v2271_v25 }
 0x265   : > { %v2273_v33 = vpop.f32.mrf.mxu0  ;;  %v2530_v2 = vpop.f32.mrf.mxu1  ;;  %v6423_v35 = vsub.f32 %v5631_v38, %v2528_v26 }
 0x266   : > { %v6426_v41 = vsub.f32 %v5635_v39, %v2273_v33  ;;  %v6429_v42 = vsub.f32 %v5637_v40, %v2530_v2  ;;  %3033 = vmatprep.mubr.f32.mxu0 %v2842_v29  ;;  %3258 = vmatprep.mubr.f32.mxu1 %v2844_v30  ;;  %v2845_v38 = vmul.f32 %v6418_v31, %v6418_v31  ;;  %v5148_v29 = vld [vmem:[%s7737_s3 + $0x20] sm:$0xff]  ;;  %v5149_v30 = vld [vmem:[%s7737_s3 + $0x30] sm:$0xff] }
 0x267   : > { %v2277_v24 = vpop.f32.mrf.mxu0  ;;  %v2534_v27 = vpop.f32.mrf.mxu1  ;;  %3034 = vmatmul.mubr.f32.vlgmr.msra.gmra.mxu0 %v2841_v28  ;;  %3259 = vmatmul.mubr.f32.vlgmr.msra.gmra.mxu1 %v2843_v32  ;;  %v2847_v28 = vmul.f32 %v6423_v35, %v6423_v35 }
 0x268   : > { %v2846_v37 = vmul.f32 %v6426_v41, %v6426_v41  ;;  %v2848_v25 = vmul.f32 %v6429_v42, %v6429_v42  ;;  %v6438_v39 = vsub.f32 %v5647_v43, %v2277_v24  ;;  %3640 = vmatpush1.msra.mxu0 %v5148_v29  ;;  %3897 = vmatpush1.msra.mxu1 %v5149_v30 }
 0x269   : > { %v2279_v40 = vpop.f32.mrf.mxu0  ;;  %v2536_v26 = vpop.f32.mrf.mxu1  ;;  %v6449_v33 = vsub.f32 %v5649_v44, %v2534_v27 }
 0x26a   : > { %v6452_v43 = vsub.f32 %v5653_v45, %v2279_v40  ;;  %v6455_v24 = vsub.f32 %v5655_v46, %v2536_v26  ;;  %3038 = vmatprep.mubr.f32.mxu0 %v2846_v37  ;;  %3263 = vmatprep.mubr.f32.mxu1 %v2848_v25  ;;  %v2849_v44 = vmul.f32 %v6438_v39, %v6438_v39  ;;  %v5150_v37 = vld [vmem:[%s7737_s3 + $0x8] sm:$0xff]  ;;  %v5151_v25 = vld [vmem:[%s7737_s3 + $0x18] sm:$0xff] }
 0x26b   : > { %v2283_v2 = vpop.f32.mrf.mxu0  ;;  %v2540_v32 = vpop.f32.mrf.mxu1  ;;  %3039 = vmatmul.mubr.f32.gmra.mxu0 %v2845_v38  ;;  %3264 = vmatmul.mubr.f32.gmra.mxu1 %v2847_v28  ;;  %v2851_v38 = vmul.f32 %v6449_v33, %v6449_v33 }
 0x26c   : > { %v2850_v29 = vmul.f32 %v6452_v43, %v6452_v43  ;;  %v2852_v30 = vmul.f32 %v6455_v24, %v6455_v24  ;;  %v6464_v45 = vsub.f32 %v5661_v47, %v2283_v2  ;;  %3641 = vmatprep.subr.mxu0 %v5150_v37  ;;  %3898 = vmatprep.subr.mxu1 %v5151_v25 }
 0x26d   : > { %v2285_v46 = vpop.f32.mrf.mxu0  ;;  %v2542_v27 = vpop.f32.mrf.mxu1  ;;  %v6475_v40 = vsub.f32 %v5663_v48, %v2540_v32 }
 0x26e   : > { %v6478_v47 = vsub.f32 %v5667_v49, %v2285_v46  ;;  %v6481_v26 = vsub.f32 %v5669_v50, %v2542_v27  ;;  %3043 = vmatprep.mubr.f32.mxu0 %v2850_v29  ;;  %3268 = vmatprep.mubr.f32.mxu1 %v2852_v30  ;;  %v2853_v48 = vmul.f32 %v6464_v45, %v6464_v45  ;;  %v5152_v29 = vld [vmem:[%s7737_s3] sm:$0xff]  ;;  %v5153_v30 = vld [vmem:[%s7737_s3 + $0x10] sm:$0xff] }
 0x26f   : > { %v2289_v28 = vpop.f32.mrf.mxu0  ;;  %v2546_v2 = vpop.f32.mrf.mxu1  ;;  %3044 = vmatmul.mubr.f32.gmra.mxu0 %v2849_v44  ;;  %3269 = vmatmul.mubr.f32.gmra.mxu1 %v2851_v38  ;;  %v2855_v44 = vmul.f32 %v6475_v40, %v6475_v40 }
 0x270   : > { %v2854_v37 = vmul.f32 %v6478_v47, %v6478_v47  ;;  %v2856_v25 = vmul.f32 %v6481_v26, %v6481_v26  ;;  %v6490_v49 = vsub.f32 %v5673_v51, %v2289_v28  ;;  %3642 = vmatpush1.msra.mxu0 %v5152_v29  ;;  %3899 = vmatpush1.msra.mxu1 %v5153_v30 }
 0x271   : > { %v2291_v50 = vpop.f32.mrf.mxu0  ;;  %v2548_v32 = vpop.f32.mrf.mxu1  ;;  %v6501_v46 = vsub.f32 %v5675_v52, %v2546_v2 }
 0x272   : > { %v6504_v51 = vsub.f32 %v5679_v53, %v2291_v50  ;;  %v6507_v27 = vsub.f32 %v5681_v54, %v2548_v32  ;;  %3048 = vmatprep.mubr.f32.mxu0 %v2854_v37  ;;  %3273 = vmatprep.mubr.f32.mxu1 %v2856_v25  ;;  %v2857_v52 = vmul.f32 %v6490_v49, %v6490_v49 }
 0x273   : > { %v2295_v38 = vpop.f32.mrf.mxu0  ;;  %v2552_v28 = vpop.f32.mrf.mxu1  ;;  %3049 = vmatmul.mubr.f32.gmra.mxu0 %v2853_v48  ;;  %3274 = vmatmul.mubr.f32.gmra.mxu1 %v2855_v44  ;;  %v2859_v37 = vmul.f32 %v6501_v46, %v6501_v46 }
 0x274   : > { %v2858_v29 = vmul.f32 %v6504_v51, %v6504_v51  ;;  %v2860_v30 = vmul.f32 %v6507_v27, %v6507_v27  ;;  %v6516_v53 = vsub.f32 %v5685_v55, %v2295_v38  ;;  %v6521_v25 = vsub.f32 %v5687_v56, %v2552_v28 }
 0x275   : > { %v2297_v54 = vpop.f32.mrf.mxu0  ;;  %v2554_v2 = vpop.f32.mrf.mxu1 }
 0x276   : > { %v6524_v48 = vsub.f32 %v5691_v57, %v2297_v54  ;;  %v6527_v50 = vsub.f32 %v5693_v58, %v2554_v2  ;;  %3053 = vmatprep.mubr.f32.mxu0 %v2858_v29  ;;  %3278 = vmatprep.mubr.f32.mxu1 %v2860_v30  ;;  %v2861_v56 = vmul.f32 %v6516_v53, %v6516_v53 }
 0x277   : > { %v2301_v32 = vpop.f32.mrf.mxu0  ;;  %v2558_v44 = vpop.f32.mrf.mxu1  ;;  %3054 = vmatmul.mubr.f32.gmra.mxu0 %v2857_v52  ;;  %3279 = vmatmul.mubr.f32.gmra.mxu1 %v2859_v37  ;;  %v2863_v29 = vmul.f32 %v6521_v25, %v6521_v25 }
 0x278   : > { %v2862_v55 = vmul.f32 %v6524_v48, %v6524_v48  ;;  %v2864_v38 = vmul.f32 %v6527_v50, %v6527_v50  ;;  %v6536_v57 = vsub.f32 %v5697_v59, %v2301_v32  ;;  %v6541_v30 = vsub.f32 %v5699_v60, %v2558_v44 }
 0x279   : > { %v2303_v58 = vpop.f32.mrf.mxu0  ;;  %v2560_v28 = vpop.f32.mrf.mxu1 }
 0x27a   : > { %v6544_v52 = vsub.f32 %v5703_v61, %v2303_v58  ;;  %v6547_v54 = vsub.f32 %v5705_v62, %v2560_v28  ;;  %3058 = vmatprep.mubr.f32.mxu0 %v2862_v55  ;;  %3283 = vmatprep.mubr.f32.mxu1 %v2864_v38  ;;  %v2865_v60 = vmul.f32 %v6536_v57, %v6536_v57 }
 0x27b   : > { %v2307_v2 = vpop.f32.mrf.mxu0  ;;  %v2564_v37 = vpop.f32.mrf.mxu1  ;;  %3059 = vmatmul.mubr.f32.gmra.mxu0 %v2861_v56  ;;  %3284 = vmatmul.mubr.f32.gmra.mxu1 %v2863_v29  ;;  %v2867_v55 = vmul.f32 %v6541_v30, %v6541_v30 }
 0x27c   : > { %v2866_v59 = vmul.f32 %v6544_v52, %v6544_v52  ;;  %v2868_v32 = vmul.f32 %v6547_v54, %v6547_v54  ;;  %v6556_v61 = vsub.f32 %v5709_v63, %v2307_v2  ;;  %v6561_v38 = vsub.f32 %v5711_v0, %v2564_v37 }
 0x27d   : > { %v2309_v62 = vpop.f32.mrf.mxu0  ;;  %v2566_v44 = vpop.f32.mrf.mxu1 }
 0x27e   : > { %v6564_v56 = vsub.f32 %v5715_v1, %v2309_v62  ;;  %v6567_v58 = vsub.f32 %v5717_v3, %v2566_v44  ;;  %3063 = vmatprep.mubr.f32.mxu0 %v2866_v59  ;;  %3288 = vmatprep.mubr.f32.mxu1 %v2868_v32  ;;  %v2869_v0 = vmul.f32 %v6556_v61, %v6556_v61 }
 0x27f   : > { %v2313_v28 = vpop.f32.mrf.mxu0  ;;  %v2570_v29 = vpop.f32.mrf.mxu1  ;;  %3064 = vmatmul.mubr.f32.gmra.mxu0 %v2865_v60  ;;  %3289 = vmatmul.mubr.f32.gmra.mxu1 %v2867_v55  ;;  %v2871_v59 = vmul.f32 %v6561_v38, %v6561_v38 }
 0x280   : > { %v2870_v63 = vmul.f32 %v6564_v56, %v6564_v56  ;;  %v2872_v2 = vmul.f32 %v6567_v58, %v6567_v58  ;;  %v6576_v1 = vsub.f32 %v5721_v4, %v2313_v28  ;;  %v6581_v32 = vsub.f32 %v5723_v5, %v2570_v29 }
 0x281   : > { %v2315_v3 = vpop.f32.mrf.mxu0  ;;  %v2572_v37 = vpop.f32.mrf.mxu1 }
 0x282   : > { %v6584_v60 = vsub.f32 %v5727_v6, %v2315_v3  ;;  %v6587_v62 = vsub.f32 %v5729_v7, %v2572_v37  ;;  %3068 = vmatprep.mubr.f32.mxu0 %v2870_v63  ;;  %3293 = vmatprep.mubr.f32.mxu1 %v2872_v2  ;;  %v2873_v5 = vmul.f32 %v6576_v1, %v6576_v1 }
 0x283   : > { %v2319_v44 = vpop.f32.mrf.mxu0  ;;  %v2576_v55 = vpop.f32.mrf.mxu1  ;;  %3069 = vmatmul.mubr.f32.gmra.mxu0 %v2869_v0  ;;  %3294 = vmatmul.mubr.f32.gmra.mxu1 %v2871_v59  ;;  %v2875_v63 = vmul.f32 %v6581_v32, %v6581_v32 }
 0x284   : > { %v2874_v4 = vmul.f32 %v6584_v60, %v6584_v60  ;;  %v2876_v28 = vmul.f32 %v6587_v62, %v6587_v62  ;;  %v6596_v6 = vsub.f32 %v5733_v8, %v2319_v44  ;;  %v6601_v2 = vsub.f32 %v5735_v9, %v2576_v55 }
 0x285   : > { %v2321_v7 = vpop.f32.mrf.mxu0  ;;  %v2578_v29 = vpop.f32.mrf.mxu1 }
 0x286   : > { %v6604_v0 = vsub.f32 %v5739_v11, %v2321_v7  ;;  %v6607_v3 = vsub.f32 %v5741_v12, %v2578_v29  ;;  %3073 = vmatprep.mubr.f32.mxu0 %v2874_v4  ;;  %3298 = vmatprep.mubr.f32.mxu1 %v2876_v28  ;;  %v2877_v9 = vmul.f32 %v6596_v6, %v6596_v6 }
 0x287   : > { %v2325_v37 = vpop.f32.mrf.mxu0  ;;  %v2582_v59 = vpop.f32.mrf.mxu1  ;;  %3074 = vmatmul.mubr.f32.gmra.mxu0 %v2873_v5  ;;  %3299 = vmatmul.mubr.f32.gmra.mxu1 %v2875_v63  ;;  %v2879_v4 = vmul.f32 %v6601_v2, %v6601_v2 }
 0x288   : > { %v2878_v8 = vmul.f32 %v6604_v0, %v6604_v0  ;;  %v2880_v44 = vmul.f32 %v6607_v3, %v6607_v3  ;;  %v6616_v11 = vsub.f32 %v5745_v13, %v2325_v37  ;;  %v6621_v28 = vsub.f32 %v5747_v14, %v2582_v59 }
 0x289   : > { %v2327_v12 = vpop.f32.mrf.mxu0  ;;  %v2584_v55 = vpop.f32.mrf.mxu1 }
 0x28a   : > { %v6624_v5 = vsub.f32 %v5751_v15, %v2327_v12  ;;  %v6627_v7 = vsub.f32 %v5753_v16, %v2584_v55  ;;  %3078 = vmatprep.mubr.f32.mxu0 %v2878_v8  ;;  %3303 = vmatprep.mubr.f32.mxu1 %v2880_v44  ;;  %v2881_v14 = vmul.f32 %v6616_v11, %v6616_v11 }
 0x28b   : > { %v2331_v29 = vpop.f32.mrf.mxu0  ;;  %v2588_v63 = vpop.f32.mrf.mxu1  ;;  %3079 = vmatmul.mubr.f32.gmra.mxu0 %v2877_v9  ;;  %3304 = vmatmul.mubr.f32.gmra.mxu1 %v2879_v4  ;;  %v2883_v8 = vmul.f32 %v6621_v28, %v6621_v28 }
 0x28c   : > { %7987 = vst [vmem:[#allocation82_spill] sm:$0xff] %v6627_v7  ;;  %v2882_v13 = vmul.f32 %v6624_v5, %v6624_v5  ;;  %v2884_v37 = vmul.f32 %v6627_v7, %v6627_v7  ;;  %v6636_v15 = vsub.f32 %v5757_v17, %v2331_v29  ;;  %v6641_v44 = vsub.f32 %v5759_v18, %v2588_v63  ;;  %v8150_v7 = vld [vmem:[#allocation81_spill] sm:$0xff] }
 0x28d   : > { %v2333_v16 = vpop.f32.mrf.mxu0  ;;  %v2590_v59 = vpop.f32.mrf.mxu1 }
 0x28e   : > { %7988 = vst [vmem:[#allocation83_spill] sm:$0xff] %v6636_v15  ;;  %7989 = vst [vmem:[#allocation84_spill] sm:$0xff] %v6641_v44  ;;  %v6644_v9 = vsub.f32 %v5763_v19, %v2333_v16  ;;  %v6647_v12 = vsub.f32 %v5765_v20, %v2590_v59  ;;  %3083 = vmatprep.mubr.f32.mxu0 %v2882_v13  ;;  %3308 = vmatprep.mubr.f32.mxu1 %v2884_v37  ;;  %v7995_v16 = vld [vmem:[#allocation3_spill] sm:$0xff] }
 0x28f   : > { %v2337_v55 = vpop.f32.mrf.mxu0  ;;  %v2594_v4 = vpop.f32.mrf.mxu1  ;;  %3084 = vmatmul.mubr.f32.gmra.mxu0 %v2881_v14  ;;  %3309 = vmatmul.mubr.f32.gmra.mxu1 %v2883_v8  ;;  %v2885_v18 = vmul.f32 %v6636_v15, %v6636_v15  ;;  %v2887_v13 = vmul.f32 %v6641_v44, %v6641_v44 }
 0x290   : > { %7990 = vst [vmem:[#allocation85_spill] sm:$0xff] %v6644_v9  ;;  %7991 = vst [vmem:[#allocation86_spill] sm:$0xff] %v6647_v12  ;;  %v2886_v17 = vmul.f32 %v6644_v9, %v6644_v9  ;;  %v2888_v29 = vmul.f32 %v6647_v12, %v6647_v12  ;;  %v6656_v19 = vsub.f32 %v5769_v21, %v2337_v55  ;;  %v8003_v9 = vld [vmem:[#allocation7_spill] sm:$0xff] }
 0x291   : > { %v2339_v20 = vpop.f32.mrf.mxu0  ;;  %v2596_v63 = vpop.f32.mrf.mxu1  ;;  %v6661_v37 = vsub.f32 %v5771_v22, %v2594_v4 }
 0x292   : > { %7992 = vst [vmem:[#allocation87_spill] sm:$0xff] %v6656_v19  ;;  %v6664_v14 = vsub.f32 %v5775_v23, %v2339_v20  ;;  %v6667_v59 = vsub.f32 %v7995_v16, %v2596_v63  ;;  %3088 = vmatprep.mubr.f32.mxu0 %v2886_v17  ;;  %3313 = vmatprep.mubr.f32.mxu1 %v2888_v29  ;;  %v7997_v23 = vld [vmem:[#allocation4_spill] sm:$0xff]  ;;  %v7999_v29 = vld [vmem:[#allocation5_spill] sm:$0xff]  ;;  %v8001_v16 = vld [vmem:[#allocation6_spill] sm:$0xff] }
 0x293   : > { %7993 = vst [vmem:[#allocation88_spill] sm:$0xff] %v6661_v37  ;;  %v2343_v8 = vpop.f32.mrf.mxu0  ;;  %v2600_v12 = vpop.f32.mrf.mxu1  ;;  %3089 = vmatmul.mubr.f32.gmra.mxu0 %v2885_v18  ;;  %3314 = vmatmul.mubr.f32.gmra.mxu1 %v2887_v13  ;;  %v2889_v22 = vmul.f32 %v6656_v19, %v6656_v19  ;;  %v2891_v17 = vmul.f32 %v6661_v37, %v6661_v37  ;;  %v8011_v37 = vld [vmem:[#allocation11_spill] sm:$0xff] }
 0x294   : > { %7994 = vst [vmem:[#allocation89_spill] sm:$0xff] %v6664_v14  ;;  %7996 = vst [vmem:[#allocation3_spill] sm:$0xff] %v6667_v59  ;;  %v2890_v21 = vmul.f32 %v6664_v14, %v6664_v14  ;;  %v2892_v55 = vmul.f32 %v6667_v59, %v6667_v59  ;;  %v6676_v4 = vsub.f32 %v7997_v23, %v2343_v8 }
 0x295   : > { %v2345_v20 = vpop.f32.mrf.mxu0  ;;  %v2602_v63 = vpop.f32.mrf.mxu1  ;;  %v6681_v18 = vsub.f32 %v7999_v29, %v2600_v12 }
 0x296   : > { %7998 = vst [vmem:[#allocation4_spill] sm:$0xff] %v6676_v4  ;;  %v6684_v14 = vsub.f32 %v8001_v16, %v2345_v20  ;;  %v6687_v59 = vsub.f32 %v8003_v9, %v2602_v63  ;;  %3093 = vmatprep.mubr.f32.mxu0 %v2890_v21  ;;  %3318 = vmatprep.mubr.f32.mxu1 %v2892_v55  ;;  %v8005_v20 = vld [vmem:[#allocation8_spill] sm:$0xff]  ;;  %v8007_v55 = vld [vmem:[#allocation9_spill] sm:$0xff]  ;;  %v8009_v16 = vld [vmem:[#allocation10_spill] sm:$0xff] }
 0x297   : > { %8000 = vst [vmem:[#allocation5_spill] sm:$0xff] %v6681_v18  ;;  %v2349_v13 = vpop.f32.mrf.mxu0  ;;  %v2606_v19 = vpop.f32.mrf.mxu1  ;;  %3094 = vmatmul.mubr.f32.gmra.mxu0 %v2889_v22  ;;  %3319 = vmatmul.mubr.f32.gmra.mxu1 %v2891_v17  ;;  %v2893_v12 = vmul.f32 %v6676_v4, %v6676_v4  ;;  %v2895_v21 = vmul.f32 %v6681_v18, %v6681_v18  ;;  %v8019_v18 = vld [vmem:[#allocation15_spill] sm:$0xff] }
 0x298   : > { %8002 = vst [vmem:[#allocation6_spill] sm:$0xff] %v6684_v14  ;;  %8004 = vst [vmem:[#allocation7_spill] sm:$0xff] %v6687_v59  ;;  %v2894_v8 = vmul.f32 %v6684_v14, %v6684_v14  ;;  %v2896_v23 = vmul.f32 %v6687_v59, %v6687_v59  ;;  %v6696_v29 = vsub.f32 %v8005_v20, %v2349_v13 }
 0x299   : > { %v2351_v9 = vpop.f32.mrf.mxu0  ;;  %v2608_v63 = vpop.f32.mrf.mxu1  ;;  %v6701_v22 = vsub.f32 %v8007_v55, %v2606_v19 }
 0x29a   : > { %8006 = vst [vmem:[#allocation8_spill] sm:$0xff] %v6696_v29  ;;  %v6704_v14 = vsub.f32 %v8009_v16, %v2351_v9  ;;  %v6707_v59 = vsub.f32 %v8011_v37, %v2608_v63  ;;  %3098 = vmatprep.mubr.f32.mxu0 %v2894_v8  ;;  %3323 = vmatprep.mubr.f32.mxu1 %v2896_v23  ;;  %v8013_v9 = vld [vmem:[#allocation12_spill] sm:$0xff]  ;;  %v8015_v23 = vld [vmem:[#allocation13_spill] sm:$0xff]  ;;  %v8017_v16 = vld [vmem:[#allocation14_spill] sm:$0xff] }
 0x29b   : > { %8008 = vst [vmem:[#allocation9_spill] sm:$0xff] %v6701_v22  ;;  %v2355_v17 = vpop.f32.mrf.mxu0  ;;  %v2612_v4 = vpop.f32.mrf.mxu1  ;;  %3099 = vmatmul.mubr.f32.gmra.mxu0 %v2893_v12  ;;  %3324 = vmatmul.mubr.f32.gmra.mxu1 %v2895_v21  ;;  %v2897_v19 = vmul.f32 %v6696_v29, %v6696_v29  ;;  %v2899_v8 = vmul.f32 %v6701_v22, %v6701_v22  ;;  %v8027_v22 = vld [vmem:[#allocation19_spill] sm:$0xff] }
 0x29c   : > { %8010 = vst [vmem:[#allocation10_spill] sm:$0xff] %v6704_v14  ;;  %8012 = vst [vmem:[#allocation11_spill] sm:$0xff] %v6707_v59  ;;  %v2898_v13 = vmul.f32 %v6704_v14, %v6704_v14  ;;  %v2900_v20 = vmul.f32 %v6707_v59, %v6707_v59  ;;  %v6716_v55 = vsub.f32 %v8013_v9, %v2355_v17 }
 0x29d   : > { %v2357_v37 = vpop.f32.mrf.mxu0  ;;  %v2614_v63 = vpop.f32.mrf.mxu1  ;;  %v6721_v12 = vsub.f32 %v8015_v23, %v2612_v4 }
 0x29e   : > { %8014 = vst [vmem:[#allocation12_spill] sm:$0xff] %v6716_v55  ;;  %v6724_v14 = vsub.f32 %v8017_v16, %v2357_v37  ;;  %v6727_v59 = vsub.f32 %v8019_v18, %v2614_v63  ;;  %3103 = vmatprep.mubr.f32.mxu0 %v2898_v13  ;;  %3328 = vmatprep.mubr.f32.mxu1 %v2900_v20  ;;  %v8021_v37 = vld [vmem:[#allocation16_spill] sm:$0xff]  ;;  %v8023_v20 = vld [vmem:[#allocation17_spill] sm:$0xff]  ;;  %v8025_v16 = vld [vmem:[#allocation18_spill] sm:$0xff] }
 0x29f   : > { %8016 = vst [vmem:[#allocation13_spill] sm:$0xff] %v6721_v12  ;;  %v2361_v21 = vpop.f32.mrf.mxu0  ;;  %v2618_v29 = vpop.f32.mrf.mxu1  ;;  %3104 = vmatmul.mubr.f32.gmra.mxu0 %v2897_v19  ;;  %3329 = vmatmul.mubr.f32.gmra.mxu1 %v2899_v8  ;;  %v2901_v4 = vmul.f32 %v6716_v55, %v6716_v55  ;;  %v2903_v13 = vmul.f32 %v6721_v12, %v6721_v12  ;;  %v8035_v12 = vld [vmem:[#allocation23_spill] sm:$0xff] }
 0x2a0   : > { %8018 = vst [vmem:[#allocation14_spill] sm:$0xff] %v6724_v14  ;;  %8020 = vst [vmem:[#allocation15_spill] sm:$0xff] %v6727_v59  ;;  %v2902_v17 = vmul.f32 %v6724_v14, %v6724_v14  ;;  %v2904_v9 = vmul.f32 %v6727_v59, %v6727_v59  ;;  %v6736_v23 = vsub.f32 %v8021_v37, %v2361_v21 }
 0x2a1   : > { %v2363_v18 = vpop.f32.mrf.mxu0  ;;  %v2620_v63 = vpop.f32.mrf.mxu1  ;;  %v6741_v19 = vsub.f32 %v8023_v20, %v2618_v29 }
 0x2a2   : > { %8022 = vst [vmem:[#allocation16_spill] sm:$0xff] %v6736_v23  ;;  %v6744_v14 = vsub.f32 %v8025_v16, %v2363_v18  ;;  %v6747_v59 = vsub.f32 %v8027_v22, %v2620_v63  ;;  %3108 = vmatprep.mubr.f32.mxu0 %v2902_v17  ;;  %3333 = vmatprep.mubr.f32.mxu1 %v2904_v9  ;;  %v8029_v18 = vld [vmem:[#allocation20_spill] sm:$0xff]  ;;  %v8031_v9 = vld [vmem:[#allocation21_spill] sm:$0xff]  ;;  %v8033_v16 = vld [vmem:[#allocation22_spill] sm:$0xff] }
 0x2a3   : > { %8024 = vst [vmem:[#allocation17_spill] sm:$0xff] %v6741_v19  ;;  %v2367_v8 = vpop.f32.mrf.mxu0  ;;  %v2624_v55 = vpop.f32.mrf.mxu1  ;;  %3109 = vmatmul.mubr.f32.gmra.mxu0 %v2901_v4  ;;  %3334 = vmatmul.mubr.f32.gmra.mxu1 %v2903_v13  ;;  %v2905_v29 = vmul.f32 %v6736_v23, %v6736_v23  ;;  %v2907_v17 = vmul.f32 %v6741_v19, %v6741_v19  ;;  %v8043_v19 = vld [vmem:[#allocation27_spill] sm:$0xff] }
 0x2a4   : > { %8026 = vst [vmem:[#allocation18_spill] sm:$0xff] %v6744_v14  ;;  %8028 = vst [vmem:[#allocation19_spill] sm:$0xff] %v6747_v59  ;;  %v2906_v21 = vmul.f32 %v6744_v14, %v6744_v14  ;;  %v2908_v37 = vmul.f32 %v6747_v59, %v6747_v59  ;;  %v6756_v20 = vsub.f32 %v8029_v18, %v2367_v8 }
 0x2a5   : > { %v2369_v22 = vpop.f32.mrf.mxu0  ;;  %v2626_v63 = vpop.f32.mrf.mxu1  ;;  %v6761_v4 = vsub.f32 %v8031_v9, %v2624_v55 }
 0x2a6   : > { %8030 = vst [vmem:[#allocation20_spill] sm:$0xff] %v6756_v20  ;;  %v6764_v14 = vsub.f32 %v8033_v16, %v2369_v22  ;;  %v6767_v59 = vsub.f32 %v8035_v12, %v2626_v63  ;;  %3113 = vmatprep.mubr.f32.mxu0 %v2906_v21  ;;  %3338 = vmatprep.mubr.f32.mxu1 %v2908_v37  ;;  %v8037_v22 = vld [vmem:[#allocation24_spill] sm:$0xff]  ;;  %v8039_v37 = vld [vmem:[#allocation25_spill] sm:$0xff]  ;;  %v8041_v16 = vld [vmem:[#allocation26_spill] sm:$0xff] }
 0x2a7   : > { %8032 = vst [vmem:[#allocation21_spill] sm:$0xff] %v6761_v4  ;;  %v2373_v13 = vpop.f32.mrf.mxu0  ;;  %v2630_v23 = vpop.f32.mrf.mxu1  ;;  %3114 = vmatmul.mubr.f32.gmra.mxu0 %v2905_v29  ;;  %3339 = vmatmul.mubr.f32.gmra.mxu1 %v2907_v17  ;;  %v2909_v55 = vmul.f32 %v6756_v20, %v6756_v20  ;;  %v2911_v21 = vmul.f32 %v6761_v4, %v6761_v4  ;;  %v8051_v4 = vld [vmem:[#allocation31_spill] sm:$0xff] }
 0x2a8   : > { %8034 = vst [vmem:[#allocation22_spill] sm:$0xff] %v6764_v14  ;;  %8036 = vst [vmem:[#allocation23_spill] sm:$0xff] %v6767_v59  ;;  %v2910_v8 = vmul.f32 %v6764_v14, %v6764_v14  ;;  %v2912_v18 = vmul.f32 %v6767_v59, %v6767_v59  ;;  %v6776_v9 = vsub.f32 %v8037_v22, %v2373_v13 }
 0x2a9   : > { %v2375_v12 = vpop.f32.mrf.mxu0  ;;  %v2632_v63 = vpop.f32.mrf.mxu1  ;;  %v6781_v29 = vsub.f32 %v8039_v37, %v2630_v23 }
 0x2aa   : > { %8038 = vst [vmem:[#allocation24_spill] sm:$0xff] %v6776_v9  ;;  %v6784_v14 = vsub.f32 %v8041_v16, %v2375_v12  ;;  %v6787_v59 = vsub.f32 %v8043_v19, %v2632_v63  ;;  %3118 = vmatprep.mubr.f32.mxu0 %v2910_v8  ;;  %3343 = vmatprep.mubr.f32.mxu1 %v2912_v18  ;;  %v8045_v12 = vld [vmem:[#allocation28_spill] sm:$0xff]  ;;  %v8047_v18 = vld [vmem:[#allocation29_spill] sm:$0xff]  ;;  %v8049_v16 = vld [vmem:[#allocation30_spill] sm:$0xff] }
 0x2ab   : > { %8040 = vst [vmem:[#allocation25_spill] sm:$0xff] %v6781_v29  ;;  %v2379_v17 = vpop.f32.mrf.mxu0  ;;  %v2636_v20 = vpop.f32.mrf.mxu1  ;;  %3119 = vmatmul.mubr.f32.gmra.mxu0 %v2909_v55  ;;  %3344 = vmatmul.mubr.f32.gmra.mxu1 %v2911_v21  ;;  %v2913_v23 = vmul.f32 %v6776_v9, %v6776_v9  ;;  %v2915_v8 = vmul.f32 %v6781_v29, %v6781_v29  ;;  %v8059_v29 = vld [vmem:[#allocation35_spill] sm:$0xff] }
 0x2ac   : > { %8042 = vst [vmem:[#allocation26_spill] sm:$0xff] %v6784_v14  ;;  %8044 = vst [vmem:[#allocation27_spill] sm:$0xff] %v6787_v59  ;;  %v2914_v13 = vmul.f32 %v6784_v14, %v6784_v14  ;;  %v2916_v22 = vmul.f32 %v6787_v59, %v6787_v59  ;;  %v6796_v37 = vsub.f32 %v8045_v12, %v2379_v17 }
 0x2ad   : > { %v2381_v19 = vpop.f32.mrf.mxu0  ;;  %v2638_v63 = vpop.f32.mrf.mxu1  ;;  %v6801_v55 = vsub.f32 %v8047_v18, %v2636_v20 }
 0x2ae   : > { %8046 = vst [vmem:[#allocation28_spill] sm:$0xff] %v6796_v37  ;;  %v6804_v14 = vsub.f32 %v8049_v16, %v2381_v19  ;;  %v6807_v59 = vsub.f32 %v8051_v4, %v2638_v63  ;;  %3123 = vmatprep.mubr.f32.mxu0 %v2914_v13  ;;  %3348 = vmatprep.mubr.f32.mxu1 %v2916_v22  ;;  %v8053_v19 = vld [vmem:[#allocation32_spill] sm:$0xff]  ;;  %v8055_v22 = vld [vmem:[#allocation33_spill] sm:$0xff]  ;;  %v8057_v16 = vld [vmem:[#allocation34_spill] sm:$0xff] }
 0x2af   : > { %8048 = vst [vmem:[#allocation29_spill] sm:$0xff] %v6801_v55  ;;  %v2385_v21 = vpop.f32.mrf.mxu0  ;;  %v2642_v9 = vpop.f32.mrf.mxu1  ;;  %3124 = vmatmul.mubr.f32.gmra.mxu0 %v2913_v23  ;;  %3349 = vmatmul.mubr.f32.gmra.mxu1 %v2915_v8  ;;  %v2917_v20 = vmul.f32 %v6796_v37, %v6796_v37  ;;  %v2919_v13 = vmul.f32 %v6801_v55, %v6801_v55  ;;  %v8067_v55 = vld [vmem:[#allocation39_spill] sm:$0xff] }
 0x2b0   : > { %8050 = vst [vmem:[#allocation30_spill] sm:$0xff] %v6804_v14  ;;  %8052 = vst [vmem:[#allocation31_spill] sm:$0xff] %v6807_v59  ;;  %v2918_v17 = vmul.f32 %v6804_v14, %v6804_v14  ;;  %v2920_v12 = vmul.f32 %v6807_v59, %v6807_v59  ;;  %v6816_v18 = vsub.f32 %v8053_v19, %v2385_v21 }
 0x2b1   : > { %v2387_v4 = vpop.f32.mrf.mxu0  ;;  %v2644_v63 = vpop.f32.mrf.mxu1  ;;  %v6821_v23 = vsub.f32 %v8055_v22, %v2642_v9 }
 0x2b2   : > { %8054 = vst [vmem:[#allocation32_spill] sm:$0xff] %v6816_v18  ;;  %v6824_v14 = vsub.f32 %v8057_v16, %v2387_v4  ;;  %v6827_v59 = vsub.f32 %v8059_v29, %v2644_v63  ;;  %3128 = vmatprep.mubr.f32.mxu0 %v2918_v17  ;;  %3353 = vmatprep.mubr.f32.mxu1 %v2920_v12  ;;  %v8061_v4 = vld [vmem:[#allocation36_spill] sm:$0xff]  ;;  %v8063_v12 = vld [vmem:[#allocation37_spill] sm:$0xff]  ;;  %v8065_v16 = vld [vmem:[#allocation38_spill] sm:$0xff] }
 0x2b3   : > { %8056 = vst [vmem:[#allocation33_spill] sm:$0xff] %v6821_v23  ;;  %v2391_v8 = vpop.f32.mrf.mxu0  ;;  %v2648_v37 = vpop.f32.mrf.mxu1  ;;  %3129 = vmatmul.mubr.f32.gmra.mxu0 %v2917_v20  ;;  %3354 = vmatmul.mubr.f32.gmra.mxu1 %v2919_v13  ;;  %v2921_v9 = vmul.f32 %v6816_v18, %v6816_v18  ;;  %v2923_v17 = vmul.f32 %v6821_v23, %v6821_v23  ;;  %v8075_v23 = vld [vmem:[#allocation43_spill] sm:$0xff] }
 0x2b4   : > { %8058 = vst [vmem:[#allocation34_spill] sm:$0xff] %v6824_v14  ;;  %8060 = vst [vmem:[#allocation35_spill] sm:$0xff] %v6827_v59  ;;  %v2922_v21 = vmul.f32 %v6824_v14, %v6824_v14  ;;  %v2924_v19 = vmul.f32 %v6827_v59, %v6827_v59  ;;  %v6836_v22 = vsub.f32 %v8061_v4, %v2391_v8 }
 0x2b5   : > { %v2393_v29 = vpop.f32.mrf.mxu0  ;;  %v2650_v63 = vpop.f32.mrf.mxu1  ;;  %v6841_v20 = vsub.f32 %v8063_v12, %v2648_v37 }
 0x2b6   : > { %8062 = vst [vmem:[#allocation36_spill] sm:$0xff] %v6836_v22  ;;  %v6844_v14 = vsub.f32 %v8065_v16, %v2393_v29  ;;  %v6847_v59 = vsub.f32 %v8067_v55, %v2650_v63  ;;  %3133 = vmatprep.mubr.f32.mxu0 %v2922_v21  ;;  %3358 = vmatprep.mubr.f32.mxu1 %v2924_v19  ;;  %v8069_v29 = vld [vmem:[#allocation40_spill] sm:$0xff]  ;;  %v8071_v19 = vld [vmem:[#allocation41_spill] sm:$0xff]  ;;  %v8073_v16 = vld [vmem:[#allocation42_spill] sm:$0xff] }
 0x2b7   : > { %8064 = vst [vmem:[#allocation37_spill] sm:$0xff] %v6841_v20  ;;  %v2397_v13 = vpop.f32.mrf.mxu0  ;;  %v2654_v18 = vpop.f32.mrf.mxu1  ;;  %3134 = vmatmul.mubr.f32.gmra.mxu0 %v2921_v9  ;;  %3359 = vmatmul.mubr.f32.gmra.mxu1 %v2923_v17  ;;  %v2925_v37 = vmul.f32 %v6836_v22, %v6836_v22  ;;  %v2927_v21 = vmul.f32 %v6841_v20, %v6841_v20  ;;  %v8083_v20 = vld [vmem:[#allocation47_spill] sm:$0xff] }
 0x2b8   : > { %8066 = vst [vmem:[#allocation38_spill] sm:$0xff] %v6844_v14  ;;  %8068 = vst [vmem:[#allocation39_spill] sm:$0xff] %v6847_v59  ;;  %v2926_v8 = vmul.f32 %v6844_v14, %v6844_v14  ;;  %v2928_v4 = vmul.f32 %v6847_v59, %v6847_v59  ;;  %v6856_v12 = vsub.f32 %v8069_v29, %v2397_v13 }
 0x2b9   : > { %v2399_v55 = vpop.f32.mrf.mxu0  ;;  %v2656_v63 = vpop.f32.mrf.mxu1  ;;  %v6861_v9 = vsub.f32 %v8071_v19, %v2654_v18 }
 0x2ba   : > { %8070 = vst [vmem:[#allocation40_spill] sm:$0xff] %v6856_v12  ;;  %v6864_v14 = vsub.f32 %v8073_v16, %v2399_v55  ;;  %v6867_v59 = vsub.f32 %v8075_v23, %v2656_v63  ;;  %3138 = vmatprep.mubr.f32.mxu0 %v2926_v8  ;;  %3363 = vmatprep.mubr.f32.mxu1 %v2928_v4  ;;  %v8077_v55 = vld [vmem:[#allocation44_spill] sm:$0xff]  ;;  %v8079_v4 = vld [vmem:[#allocation45_spill] sm:$0xff]  ;;  %v8081_v16 = vld [vmem:[#allocation46_spill] sm:$0xff] }
 0x2bb   : > { %8072 = vst [vmem:[#allocation41_spill] sm:$0xff] %v6861_v9  ;;  %v2403_v17 = vpop.f32.mrf.mxu0  ;;  %v2660_v22 = vpop.f32.mrf.mxu1  ;;  %3139 = vmatmul.mubr.f32.gmra.mxu0 %v2925_v37  ;;  %3364 = vmatmul.mubr.f32.gmra.mxu1 %v2927_v21  ;;  %v2929_v18 = vmul.f32 %v6856_v12, %v6856_v12  ;;  %v2931_v8 = vmul.f32 %v6861_v9, %v6861_v9  ;;  %v8091_v9 = vld [vmem:[#allocation51_spill] sm:$0xff] }
 0x2bc   : > { %8074 = vst [vmem:[#allocation42_spill] sm:$0xff] %v6864_v14  ;;  %8076 = vst [vmem:[#allocation43_spill] sm:$0xff] %v6867_v59  ;;  %v2930_v13 = vmul.f32 %v6864_v14, %v6864_v14  ;;  %v2932_v29 = vmul.f32 %v6867_v59, %v6867_v59  ;;  %v6876_v19 = vsub.f32 %v8077_v55, %v2403_v17 }
 0x2bd   : > { %v2405_v23 = vpop.f32.mrf.mxu0  ;;  %v2662_v63 = vpop.f32.mrf.mxu1  ;;  %v6881_v37 = vsub.f32 %v8079_v4, %v2660_v22 }
 0x2be   : > { %8078 = vst [vmem:[#allocation44_spill] sm:$0xff] %v6876_v19  ;;  %v6884_v14 = vsub.f32 %v8081_v16, %v2405_v23  ;;  %v6887_v59 = vsub.f32 %v8083_v20, %v2662_v63  ;;  %3143 = vmatprep.mubr.f32.mxu0 %v2930_v13  ;;  %3368 = vmatprep.mubr.f32.mxu1 %v2932_v29  ;;  %v8085_v23 = vld [vmem:[#allocation48_spill] sm:$0xff]  ;;  %v8087_v29 = vld [vmem:[#allocation49_spill] sm:$0xff]  ;;  %v8089_v16 = vld [vmem:[#allocation50_spill] sm:$0xff] }
 0x2bf   : > { %8080 = vst [vmem:[#allocation45_spill] sm:$0xff] %v6881_v37  ;;  %v2409_v21 = vpop.f32.mrf.mxu0  ;;  %v2666_v12 = vpop.f32.mrf.mxu1  ;;  %3144 = vmatmul.mubr.f32.gmra.mxu0 %v2929_v18  ;;  %3369 = vmatmul.mubr.f32.gmra.mxu1 %v2931_v8  ;;  %v2933_v22 = vmul.f32 %v6876_v19, %v6876_v19  ;;  %v2935_v13 = vmul.f32 %v6881_v37, %v6881_v37  ;;  %v8099_v37 = vld [vmem:[#allocation55_spill] sm:$0xff] }
 0x2c0   : > { %8082 = vst [vmem:[#allocation46_spill] sm:$0xff] %v6884_v14  ;;  %8084 = vst [vmem:[#allocation47_spill] sm:$0xff] %v6887_v59  ;;  %v2934_v17 = vmul.f32 %v6884_v14, %v6884_v14  ;;  %v2936_v55 = vmul.f32 %v6887_v59, %v6887_v59  ;;  %v6896_v4 = vsub.f32 %v8085_v23, %v2409_v21 }
 0x2c1   : > { %v2411_v20 = vpop.f32.mrf.mxu0  ;;  %v2668_v63 = vpop.f32.mrf.mxu1  ;;  %v6901_v18 = vsub.f32 %v8087_v29, %v2666_v12 }
 0x2c2   : > { %8086 = vst [vmem:[#allocation48_spill] sm:$0xff] %v6896_v4  ;;  %v6904_v14 = vsub.f32 %v8089_v16, %v2411_v20  ;;  %v6907_v59 = vsub.f32 %v8091_v9, %v2668_v63  ;;  %3148 = vmatprep.mubr.f32.mxu0 %v2934_v17  ;;  %3373 = vmatprep.mubr.f32.mxu1 %v2936_v55  ;;  %v8093_v20 = vld [vmem:[#allocation52_spill] sm:$0xff]  ;;  %v8095_v55 = vld [vmem:[#allocation53_spill] sm:$0xff]  ;;  %v8097_v16 = vld [vmem:[#allocation54_spill] sm:$0xff] }
 0x2c3   : > { %8088 = vst [vmem:[#allocation49_spill] sm:$0xff] %v6901_v18  ;;  %v2415_v8 = vpop.f32.mrf.mxu0  ;;  %v2672_v19 = vpop.f32.mrf.mxu1  ;;  %3149 = vmatmul.mubr.f32.gmra.mxu0 %v2933_v22  ;;  %3374 = vmatmul.mubr.f32.gmra.mxu1 %v2935_v13  ;;  %v2937_v12 = vmul.f32 %v6896_v4, %v6896_v4  ;;  %v2939_v17 = vmul.f32 %v6901_v18, %v6901_v18  ;;  %v8107_v18 = vld [vmem:[#allocation59_spill] sm:$0xff] }
 0x2c4   : > { %8090 = vst [vmem:[#allocation50_spill] sm:$0xff] %v6904_v14  ;;  %8092 = vst [vmem:[#allocation51_spill] sm:$0xff] %v6907_v59  ;;  %v2938_v21 = vmul.f32 %v6904_v14, %v6904_v14  ;;  %v2940_v23 = vmul.f32 %v6907_v59, %v6907_v59  ;;  %v6916_v29 = vsub.f32 %v8093_v20, %v2415_v8 }
 0x2c5   : > { %v2417_v9 = vpop.f32.mrf.mxu0  ;;  %v2674_v63 = vpop.f32.mrf.mxu1  ;;  %v6921_v22 = vsub.f32 %v8095_v55, %v2672_v19 }
 0x2c6   : > { %8094 = vst [vmem:[#allocation52_spill] sm:$0xff] %v6916_v29  ;;  %v6924_v14 = vsub.f32 %v8097_v16, %v2417_v9  ;;  %v6927_v59 = vsub.f32 %v8099_v37, %v2674_v63  ;;  %3153 = vmatprep.mubr.f32.mxu0 %v2938_v21  ;;  %3378 = vmatprep.mubr.f32.mxu1 %v2940_v23  ;;  %v8101_v9 = vld [vmem:[#allocation56_spill] sm:$0xff]  ;;  %v8103_v23 = vld [vmem:[#allocation57_spill] sm:$0xff]  ;;  %v8105_v16 = vld [vmem:[#allocation58_spill] sm:$0xff] }
 0x2c7   : > { %8096 = vst [vmem:[#allocation53_spill] sm:$0xff] %v6921_v22  ;;  %v2421_v13 = vpop.f32.mrf.mxu0  ;;  %v2678_v4 = vpop.f32.mrf.mxu1  ;;  %3154 = vmatmul.mubr.f32.gmra.mxu0 %v2937_v12  ;;  %3379 = vmatmul.mubr.f32.gmra.mxu1 %v2939_v17  ;;  %v2941_v19 = vmul.f32 %v6916_v29, %v6916_v29  ;;  %v2943_v21 = vmul.f32 %v6921_v22, %v6921_v22  ;;  %v8115_v22 = vld [vmem:[#allocation63_spill] sm:$0xff] }
 0x2c8   : > { %8098 = vst [vmem:[#allocation54_spill] sm:$0xff] %v6924_v14  ;;  %8100 = vst [vmem:[#allocation55_spill] sm:$0xff] %v6927_v59  ;;  %v2942_v8 = vmul.f32 %v6924_v14, %v6924_v14  ;;  %v2944_v20 = vmul.f32 %v6927_v59, %v6927_v59  ;;  %v6936_v55 = vsub.f32 %v8101_v9, %v2421_v13 }
 0x2c9   : > { %v2423_v37 = vpop.f32.mrf.mxu0  ;;  %v2680_v63 = vpop.f32.mrf.mxu1  ;;  %v6941_v12 = vsub.f32 %v8103_v23, %v2678_v4 }
 0x2ca   : > { %8102 = vst [vmem:[#allocation56_spill] sm:$0xff] %v6936_v55  ;;  %v6944_v14 = vsub.f32 %v8105_v16, %v2423_v37  ;;  %v6947_v59 = vsub.f32 %v8107_v18, %v2680_v63  ;;  %3158 = vmatprep.mubr.f32.mxu0 %v2942_v8  ;;  %3383 = vmatprep.mubr.f32.mxu1 %v2944_v20  ;;  %v8109_v37 = vld [vmem:[#allocation60_spill] sm:$0xff]  ;;  %v8111_v20 = vld [vmem:[#allocation61_spill] sm:$0xff]  ;;  %v8113_v16 = vld [vmem:[#allocation62_spill] sm:$0xff] }
 0x2cb   : > { %8104 = vst [vmem:[#allocation57_spill] sm:$0xff] %v6941_v12  ;;  %v2427_v17 = vpop.f32.mrf.mxu0  ;;  %v2684_v29 = vpop.f32.mrf.mxu1  ;;  %3159 = vmatmul.mubr.f32.gmra.mxu0 %v2941_v19  ;;  %3384 = vmatmul.mubr.f32.gmra.mxu1 %v2943_v21  ;;  %v2945_v4 = vmul.f32 %v6936_v55, %v6936_v55  ;;  %v2947_v8 = vmul.f32 %v6941_v12, %v6941_v12  ;;  %v8123_v12 = vld [vmem:[#allocation67_spill] sm:$0xff] }
 0x2cc   : > { %8106 = vst [vmem:[#allocation58_spill] sm:$0xff] %v6944_v14  ;;  %8108 = vst [vmem:[#allocation59_spill] sm:$0xff] %v6947_v59  ;;  %v2946_v13 = vmul.f32 %v6944_v14, %v6944_v14  ;;  %v2948_v9 = vmul.f32 %v6947_v59, %v6947_v59  ;;  %v6956_v23 = vsub.f32 %v8109_v37, %v2427_v17 }
 0x2cd   : > { %v2429_v18 = vpop.f32.mrf.mxu0  ;;  %v2686_v63 = vpop.f32.mrf.mxu1  ;;  %v6961_v19 = vsub.f32 %v8111_v20, %v2684_v29 }
 0x2ce   : > { %8110 = vst [vmem:[#allocation60_spill] sm:$0xff] %v6956_v23  ;;  %v6964_v14 = vsub.f32 %v8113_v16, %v2429_v18  ;;  %v6967_v59 = vsub.f32 %v8115_v22, %v2686_v63  ;;  %3163 = vmatprep.mubr.f32.mxu0 %v2946_v13  ;;  %3388 = vmatprep.mubr.f32.mxu1 %v2948_v9  ;;  %v8117_v18 = vld [vmem:[#allocation64_spill] sm:$0xff]  ;;  %v8119_v9 = vld [vmem:[#allocation65_spill] sm:$0xff]  ;;  %v8121_v16 = vld [vmem:[#allocation66_spill] sm:$0xff] }
 0x2cf   : > { %8112 = vst [vmem:[#allocation61_spill] sm:$0xff] %v6961_v19  ;;  %v2433_v21 = vpop.f32.mrf.mxu0  ;;  %v2690_v55 = vpop.f32.mrf.mxu1  ;;  %3164 = vmatmul.mubr.f32.gmra.mxu0 %v2945_v4  ;;  %3389 = vmatmul.mubr.f32.gmra.mxu1 %v2947_v8  ;;  %v2949_v29 = vmul.f32 %v6956_v23, %v6956_v23  ;;  %v2951_v13 = vmul.f32 %v6961_v19, %v6961_v19  ;;  %v8131_v19 = vld [vmem:[#allocation71_spill] sm:$0xff] }
 0x2d0   : > { %8114 = vst [vmem:[#allocation62_spill] sm:$0xff] %v6964_v14  ;;  %8116 = vst [vmem:[#allocation63_spill] sm:$0xff] %v6967_v59  ;;  %v2950_v17 = vmul.f32 %v6964_v14, %v6964_v14  ;;  %v2952_v37 = vmul.f32 %v6967_v59, %v6967_v59  ;;  %v6976_v20 = vsub.f32 %v8117_v18, %v2433_v21 }
 0x2d1   : > { %v2435_v22 = vpop.f32.mrf.mxu0  ;;  %v2692_v63 = vpop.f32.mrf.mxu1  ;;  %v6981_v4 = vsub.f32 %v8119_v9, %v2690_v55 }
 0x2d2   : > { %8118 = vst [vmem:[#allocation64_spill] sm:$0xff] %v6976_v20  ;;  %v6984_v14 = vsub.f32 %v8121_v16, %v2435_v22  ;;  %v6987_v59 = vsub.f32 %v8123_v12, %v2692_v63  ;;  %3168 = vmatprep.mubr.f32.mxu0 %v2950_v17  ;;  %3393 = vmatprep.mubr.f32.mxu1 %v2952_v37  ;;  %v8125_v22 = vld [vmem:[#allocation68_spill] sm:$0xff]  ;;  %v8127_v37 = vld [vmem:[#allocation69_spill] sm:$0xff]  ;;  %v8129_v16 = vld [vmem:[#allocation70_spill] sm:$0xff] }
 0x2d3   : > { %8120 = vst [vmem:[#allocation65_spill] sm:$0xff] %v6981_v4  ;;  %v2439_v8 = vpop.f32.mrf.mxu0  ;;  %v2696_v23 = vpop.f32.mrf.mxu1  ;;  %3169 = vmatmul.mubr.f32.gmra.mxu0 %v2949_v29  ;;  %3394 = vmatmul.mubr.f32.gmra.mxu1 %v2951_v13  ;;  %v2953_v55 = vmul.f32 %v6976_v20, %v6976_v20  ;;  %v2955_v17 = vmul.f32 %v6981_v4, %v6981_v4  ;;  %v8139_v4 = vld [vmem:[#allocation75_spill] sm:$0xff] }
 0x2d4   : > { %8122 = vst [vmem:[#allocation66_spill] sm:$0xff] %v6984_v14  ;;  %8124 = vst [vmem:[#allocation67_spill] sm:$0xff] %v6987_v59  ;;  %v2954_v21 = vmul.f32 %v6984_v14, %v6984_v14  ;;  %v2956_v18 = vmul.f32 %v6987_v59, %v6987_v59  ;;  %v6996_v9 = vsub.f32 %v8125_v22, %v2439_v8 }
 0x2d5   : > { %v2441_v12 = vpop.f32.mrf.mxu0  ;;  %v2698_v63 = vpop.f32.mrf.mxu1  ;;  %v7001_v29 = vsub.f32 %v8127_v37, %v2696_v23 }
 0x2d6   : > { %8126 = vst [vmem:[#allocation68_spill] sm:$0xff] %v6996_v9  ;;  %v7004_v14 = vsub.f32 %v8129_v16, %v2441_v12  ;;  %v7007_v59 = vsub.f32 %v8131_v19, %v2698_v63  ;;  %3173 = vmatprep.mubr.f32.mxu0 %v2954_v21  ;;  %3398 = vmatprep.mubr.f32.mxu1 %v2956_v18  ;;  %v8133_v12 = vld [vmem:[#allocation72_spill] sm:$0xff]  ;;  %v8135_v18 = vld [vmem:[#allocation73_spill] sm:$0xff]  ;;  %v8137_v16 = vld [vmem:[#allocation74_spill] sm:$0xff] }
 0x2d7   : > { %8128 = vst [vmem:[#allocation69_spill] sm:$0xff] %v7001_v29  ;;  %v2445_v13 = vpop.f32.mrf.mxu0  ;;  %v2702_v20 = vpop.f32.mrf.mxu1  ;;  %3174 = vmatmul.mubr.f32.gmra.mxu0 %v2953_v55  ;;  %3399 = vmatmul.mubr.f32.gmra.mxu1 %v2955_v17  ;;  %v2957_v23 = vmul.f32 %v6996_v9, %v6996_v9  ;;  %v2959_v21 = vmul.f32 %v7001_v29, %v7001_v29  ;;  %v8147_v29 = vld [vmem:[#allocation79_spill] sm:$0xff] }
 0x2d8   : > { %8130 = vst [vmem:[#allocation70_spill] sm:$0xff] %v7004_v14  ;;  %8132 = vst [vmem:[#allocation71_spill] sm:$0xff] %v7007_v59  ;;  %v2958_v8 = vmul.f32 %v7004_v14, %v7004_v14  ;;  %v2960_v22 = vmul.f32 %v7007_v59, %v7007_v59  ;;  %v7016_v37 = vsub.f32 %v8133_v12, %v2445_v13 }
 0x2d9   : > { %v2447_v19 = vpop.f32.mrf.mxu0  ;;  %v2704_v63 = vpop.f32.mrf.mxu1  ;;  %v7021_v55 = vsub.f32 %v8135_v18, %v2702_v20 }
 0x2da   : > { %8134 = vst [vmem:[#allocation72_spill] sm:$0xff] %v7016_v37  ;;  %v7024_v14 = vsub.f32 %v8137_v16, %v2447_v19  ;;  %v7027_v59 = vsub.f32 %v8139_v4, %v2704_v63  ;;  %3178 = vmatprep.mubr.f32.mxu0 %v2958_v8  ;;  %3403 = vmatprep.mubr.f32.mxu1 %v2960_v22  ;;  %v8141_v19 = vld [vmem:[#allocation76_spill] sm:$0xff]  ;;  %v8143_v22 = vld [vmem:[#allocation77_spill] sm:$0xff]  ;;  %v8145_v16 = vld [vmem:[#allocation78_spill] sm:$0xff] }
 0x2db   : > { %8136 = vst [vmem:[#allocation73_spill] sm:$0xff] %v7021_v55  ;;  %v2451_v17 = vpop.f32.mrf.mxu0  ;;  %v2708_v9 = vpop.f32.mrf.mxu1  ;;  %3179 = vmatmul.mubr.f32.gmra.mxu0 %v2957_v23  ;;  %3404 = vmatmul.mubr.f32.gmra.mxu1 %v2959_v21  ;;  %v2961_v20 = vmul.f32 %v7016_v37, %v7016_v37  ;;  %v2963_v8 = vmul.f32 %v7021_v55, %v7021_v55 }
 0x2dc   : > { %8138 = vst [vmem:[#allocation74_spill] sm:$0xff] %v7024_v14  ;;  %8140 = vst [vmem:[#allocation75_spill] sm:$0xff] %v7027_v59  ;;  %v2962_v13 = vmul.f32 %v7024_v14, %v7024_v14  ;;  %v2964_v12 = vmul.f32 %v7027_v59, %v7027_v59  ;;  %v7036_v18 = vsub.f32 %v8141_v19, %v2451_v17 }
 0x2dd   : > { %v2453_v4 = vpop.f32.mrf.mxu0  ;;  %v2710_v63 = vpop.f32.mrf.mxu1  ;;  %v7041_v23 = vsub.f32 %v8143_v22, %v2708_v9 }
 0x2de   : > { %8142 = vst [vmem:[#allocation76_spill] sm:$0xff] %v7036_v18  ;;  %v7044_v14 = vsub.f32 %v8145_v16, %v2453_v4  ;;  %v7047_v59 = vsub.f32 %v8147_v29, %v2710_v63  ;;  %3183 = vmatprep.mubr.f32.mxu0 %v2962_v13  ;;  %3408 = vmatprep.mubr.f32.mxu1 %v2964_v12 }
 0x2df   : > { %8144 = vst [vmem:[#allocation77_spill] sm:$0xff] %v7041_v23  ;;  %3184 = vmatmul.mubr.f32.gmra.mxu0 %v2961_v20  ;;  %3409 = vmatmul.mubr.f32.gmra.mxu1 %v2963_v8  ;;  %v2965_v9 = vmul.f32 %v7036_v18, %v7036_v18  ;;  %v2967_v19 = vmul.f32 %v7041_v23, %v7041_v23 }
 0x2e0   : > { %8146 = vst [vmem:[#allocation78_spill] sm:$0xff] %v7044_v14  ;;  %8148 = vst [vmem:[#allocation79_spill] sm:$0xff] %v7047_v59  ;;  %v2966_v21 = vmul.f32 %v7044_v14, %v7044_v14  ;;  %v2968_v17 = vmul.f32 %v7047_v59, %v7047_v59 }
 0x2e2   : > { %3188 = vmatprep.mubr.f32.mxu0 %v2966_v21  ;;  %3413 = vmatprep.mubr.f32.mxu1 %v2968_v17 }
 0x2e3   : > { %3189 = vmatmul.mubr.f32.gmra.mxu0 %v2965_v9  ;;  %3414 = vmatmul.mubr.f32.gmra.mxu1 %v2967_v19 }
 0x2e4   : > { %3675 = vmatprep.mubr.f32.mxu0 %v7984_v34  ;;  %3932 = vmatprep.mubr.f32.mxu1 %v7984_v34 }
 0x327   : > { %v3035_v29 = vpop.f32.mrf.mxu0  ;;  %v3260_v13 = vpop.f32.mrf.mxu1 }
 0x328   : > { %v3261_v12 = vadd.f32 %v3260_v13, %v3035_v29 }
 0x329   : > { %v3037_v20 = vpop.f32.mrf.mxu0  ;;  %v3262_v4 = vpop.f32.mrf.mxu1 }
 0x32a   : > { %v3419_v63 = vmul.f32 0.03125, %v3261_v12 }
 0x32b   : > { %v3040_v8 = vpop.f32.mrf.mxu0  ;;  %v3265_v22 = vpop.f32.mrf.mxu1 }
 0x32c   : > { %v3451_v16 = vadd.f32 1e-05, %v3419_v63  ;;  %v3266_v59 = vadd.f32 %v3265_v22, %v3040_v8 }
 0x32d   : > { %v3042_v14 = vpop.f32.mrf.mxu0  ;;  %v3267_v23 = vpop.f32.mrf.mxu1 }
 0x32e   : > { %5018 = vrsqrt.f32 %v3451_v16  ;;  %v3420_v21 = vmul.f32 0.03125, %v3266_v59 }
 0x32f   : > { %v3045_v17 = vpop.f32.mrf.mxu0  ;;  %v3270_v9 = vpop.f32.mrf.mxu1 }
 0x330   : > { %v3452_v19 = vadd.f32 1e-05, %v3420_v21  ;;  %v3271_v18 = vadd.f32 %v3270_v9, %v3045_v17 }
 0x331   : > { %v3047_v55 = vpop.f32.mrf.mxu0  ;;  %v3272_v37 = vpop.f32.mrf.mxu1 }
 0x332   : > { %5020 = vrsqrt.f32 %v3452_v19  ;;  %v3421_v44 = vmul.f32 0.03125, %v3271_v18 }
 0x333   : > { %v3050_v29 = vpop.f32.mrf.mxu0  ;;  %v3275_v13 = vpop.f32.mrf.mxu1 }
 0x334   : > { %v3453_v20 = vadd.f32 1e-05, %v3421_v44  ;;  %v3276_v12 = vadd.f32 %v3275_v13, %v3050_v29 }
 0x335   : > { %v3052_v4 = vpop.f32.mrf.mxu0  ;;  %v3277_v15 = vpop.f32.mrf.mxu1 }
 0x336   : > { %5022 = vrsqrt.f32 %v3453_v20  ;;  %v3422_v63 = vmul.f32 0.03125, %v3276_v12 }
 0x337   : > { %v3055_v14 = vpop.f32.mrf.mxu0  ;;  %v3280_v23 = vpop.f32.mrf.mxu1 }
 0x338   : > { %v3454_v8 = vadd.f32 1e-05, %v3422_v63  ;;  %v3281_v59 = vadd.f32 %v3280_v23, %v3055_v14 }
 0x339   : > { %v3057_v22 = vpop.f32.mrf.mxu0  ;;  %v3282_v16 = vpop.f32.mrf.mxu1 }
 0x33a   : > { %5024 = vrsqrt.f32 %v3454_v8  ;;  %v3423_v21 = vmul.f32 0.03125, %v3281_v59 }
 0x33b   : > { %v3060_v55 = vpop.f32.mrf.mxu0  ;;  %v5019_v37 = vpop.eup %5018 }
 0x33c   : > { %v3285_v17 = vpop.f32.mrf.mxu1  ;;  %v3455_v18 = vadd.f32 1e-05, %v3423_v21  ;;  %4897 = vmatmul.mubr.msk.f32.vlgmr.msra.gmra.mxu0 %vm2102_vm1, %v5019_v37  ;;  %4929 = vmatmul.mubr.msk.f32.vlgmr.msra.gmra.mxu1 %vm2102_vm1, %v5019_v37 }
 0x33d   : > { %v3286_v9 = vadd.f32 %v3285_v17, %v3060_v55  ;;  %v3062_v15 = vpop.f32.mrf.mxu0  ;;  %3681 = vmatprep.mubr.f32.mxu0 %v7984_v34  ;;  %3938 = vmatprep.mubr.f32.mxu1 %v7984_v34 }
 0x33e   : > { %v3287_v44 = vpop.f32.mrf.mxu1  ;;  %5026 = vrsqrt.f32 %v3455_v18 }
 0x33f   : > { %v3424_v19 = vmul.f32 0.03125, %v3286_v9  ;;  %v3065_v29 = vpop.f32.mrf.mxu0  ;;  %v5021_v13 = vpop.eup %5020 }
 0x340   : > { %v3290_v20 = vpop.f32.mrf.mxu1  ;;  %4898 = vmatmul.mubr.msk.f32.gmra.mxu0 %vm2102_vm1, %v5021_v13  ;;  %4930 = vmatmul.mubr.msk.f32.gmra.mxu1 %vm2102_vm1, %v5021_v13 }
 0x341   : > { %v3456_v12 = vadd.f32 1e-05, %v3424_v19  ;;  %v3291_v4 = vadd.f32 %v3290_v20, %v3065_v29  ;;  %v3067_v63 = vpop.f32.mrf.mxu0  ;;  %3687 = vmatprep.mubr.f32.mxu0 %v7984_v34  ;;  %3944 = vmatprep.mubr.f32.mxu1 %v7984_v34 }
 0x342   : > { %v3292_v14 = vpop.f32.mrf.mxu1 }
 0x343   : > { %5028 = vrsqrt.f32 %v3456_v12  ;;  %v3425_v23 = vmul.f32 0.03125, %v3291_v4  ;;  %v3070_v8 = vpop.f32.mrf.mxu0  ;;  %v5023_v59 = vpop.eup %5022 }
 0x344   : > { %v3295_v22 = vpop.f32.mrf.mxu1  ;;  %4899 = vmatmul.mubr.msk.f32.gmra.mxu0 %vm2102_vm1, %v5023_v59  ;;  %4931 = vmatmul.mubr.msk.f32.gmra.mxu1 %vm2102_vm1, %v5023_v59 }
 0x345   : > { %v3457_v16 = vadd.f32 1e-05, %v3425_v23  ;;  %v3296_v21 = vadd.f32 %v3295_v22, %v3070_v8  ;;  %v3072_v55 = vpop.f32.mrf.mxu0  ;;  %3693 = vmatprep.mubr.f32.mxu0 %v7984_v34  ;;  %3950 = vmatprep.mubr.f32.mxu1 %v7984_v34 }
 0x346   : > { %v3297_v37 = vpop.f32.mrf.mxu1 }
 0x347   : > { %5030 = vrsqrt.f32 %v3457_v16  ;;  %v3426_v17 = vmul.f32 0.03125, %v3296_v21  ;;  %v3075_v18 = vpop.f32.mrf.mxu0  ;;  %v5025_v9 = vpop.eup %5024 }
 0x348   : > { %v3300_v15 = vpop.f32.mrf.mxu1  ;;  %4900 = vmatmul.mubr.msk.f32.gmra.mxu0 %vm2102_vm1, %v5025_v9  ;;  %4932 = vmatmul.mubr.msk.f32.gmra.mxu1 %vm2102_vm1, %v5025_v9 }
 0x349   : > { %v3458_v44 = vadd.f32 1e-05, %v3426_v17  ;;  %v3301_v19 = vadd.f32 %v3300_v15, %v3075_v18  ;;  %v3077_v29 = vpop.f32.mrf.mxu0  ;;  %3699 = vmatprep.mubr.f32.mxu0 %v7984_v34  ;;  %3956 = vmatprep.mubr.f32.mxu1 %v7984_v34 }
 0x34a   : > { %v3302_v13 = vpop.f32.mrf.mxu1 }
 0x34b   : > { %5032 = vrsqrt.f32 %v3458_v44  ;;  %v3427_v20 = vmul.f32 0.03125, %v3301_v19  ;;  %v3080_v12 = vpop.f32.mrf.mxu0  ;;  %v5027_v4 = vpop.eup %5026 }
 0x34c   : > { %v3305_v63 = vpop.f32.mrf.mxu1  ;;  %4901 = vmatmul.mubr.msk.f32.gmra.mxu0 %vm2102_vm1, %v5027_v4  ;;  %4933 = vmatmul.mubr.msk.f32.gmra.mxu1 %vm2102_vm1, %v5027_v4 }
 0x34d   : > { %v3459_v14 = vadd.f32 1e-05, %v3427_v20  ;;  %v3306_v23 = vadd.f32 %v3305_v63, %v3080_v12  ;;  %v3082_v8 = vpop.f32.mrf.mxu0  ;;  %3705 = vmatprep.mubr.f32.mxu0 %v7984_v34  ;;  %3962 = vmatprep.mubr.f32.mxu1 %v7984_v34 }
 0x34e   : > { %v3307_v59 = vpop.f32.mrf.mxu1 }
 0x34f   : > { %5034 = vrsqrt.f32 %v3459_v14  ;;  %v3428_v22 = vmul.f32 0.03125, %v3306_v23  ;;  %v3085_v16 = vpop.f32.mrf.mxu0 }
 0x350   : > { %v5029_v21 = vpop.eup %5028  ;;  %v3310_v55 = vpop.f32.mrf.mxu1 }
 0x351   : > { %v3460_v37 = vadd.f32 1e-05, %v3428_v22  ;;  %v3311_v17 = vadd.f32 %v3310_v55, %v3085_v16  ;;  %4902 = vmatmul.mubr.msk.f32.gmra.mxu0 %vm2102_vm1, %v5029_v21  ;;  %4934 = vmatmul.mubr.msk.f32.gmra.mxu1 %vm2102_vm1, %v5029_v21  ;;  %v3087_v18 = vpop.f32.mrf.mxu0 }
 0x352   : > { %v3312_v9 = vpop.f32.mrf.mxu1  ;;  %3711 = vmatprep.mubr.f32.mxu0 %v7984_v34  ;;  %3968 = vmatprep.mubr.f32.mxu1 %v7984_v34 }
 0x353   : > { %5036 = vrsqrt.f32 %v3460_v37  ;;  %v3429_v15 = vmul.f32 0.03125, %v3311_v17  ;;  %v3090_v44 = vpop.f32.mrf.mxu0 }
 0x354   : > { %v5031_v19 = vpop.eup %5030  ;;  %v3315_v29 = vpop.f32.mrf.mxu1 }
 0x355   : > { %v3461_v13 = vadd.f32 1e-05, %v3429_v15  ;;  %v3316_v20 = vadd.f32 %v3315_v29, %v3090_v44  ;;  %4903 = vmatmul.mubr.msk.f32.gmra.mxu0 %vm2102_vm1, %v5031_v19  ;;  %4935 = vmatmul.mubr.msk.f32.gmra.mxu1 %vm2102_vm1, %v5031_v19  ;;  %v3092_v12 = vpop.f32.mrf.mxu0 }
 0x356   : > { %v3317_v4 = vpop.f32.mrf.mxu1  ;;  %3717 = vmatprep.mubr.f32.mxu0 %v7984_v34  ;;  %3974 = vmatprep.mubr.f32.mxu1 %v7984_v34 }
 0x357   : > { %5038 = vrsqrt.f32 %v3461_v13  ;;  %v3430_v63 = vmul.f32 0.03125, %v3316_v20  ;;  %v3095_v14 = vpop.f32.mrf.mxu0 }
 0x358   : > { %v5033_v23 = vpop.eup %5032  ;;  %v3320_v8 = vpop.f32.mrf.mxu1 }
 0x359   : > { %v3462_v59 = vadd.f32 1e-05, %v3430_v63  ;;  %v3321_v22 = vadd.f32 %v3320_v8, %v3095_v14  ;;  %4904 = vmatmul.mubr.msk.f32.gmra.mxu0 %vm2102_vm1, %v5033_v23  ;;  %4936 = vmatmul.mubr.msk.f32.gmra.mxu1 %vm2102_vm1, %v5033_v23  ;;  %v3097_v16 = vpop.f32.mrf.mxu0 }
 0x35a   : > { %v3322_v21 = vpop.f32.mrf.mxu1  ;;  %3723 = vmatprep.mubr.f32.mxu0 %v7984_v34  ;;  %3980 = vmatprep.mubr.f32.mxu1 %v7984_v34 }
 0x35b   : > { %5040 = vrsqrt.f32 %v3462_v59  ;;  %v3431_v55 = vmul.f32 0.03125, %v3321_v22  ;;  %v3100_v37 = vpop.f32.mrf.mxu0 }
 0x35c   : > { %v5035_v17 = vpop.eup %5034  ;;  %v3325_v18 = vpop.f32.mrf.mxu1 }
 0x35d   : > { %v3463_v9 = vadd.f32 1e-05, %v3431_v55  ;;  %v3326_v15 = vadd.f32 %v3325_v18, %v3100_v37  ;;  %4905 = vmatmul.mubr.msk.f32.gmra.mxu0 %vm2102_vm1, %v5035_v17  ;;  %4937 = vmatmul.mubr.msk.f32.gmra.mxu1 %vm2102_vm1, %v5035_v17  ;;  %v3102_v44 = vpop.f32.mrf.mxu0 }
 0x35e   : > { %v3327_v19 = vpop.f32.mrf.mxu1  ;;  %3729 = vmatprep.mubr.f32.mxu0 %v7984_v34  ;;  %3986 = vmatprep.mubr.f32.mxu1 %v7984_v34 }
 0x35f   : > { %5042 = vrsqrt.f32 %v3463_v9  ;;  %v3432_v29 = vmul.f32 0.03125, %v3326_v15  ;;  %v3105_v13 = vpop.f32.mrf.mxu0 }
 0x360   : > { %v5037_v20 = vpop.eup %5036  ;;  %v3330_v12 = vpop.f32.mrf.mxu1 }
 0x361   : > { %v3464_v4 = vadd.f32 1e-05, %v3432_v29  ;;  %v3331_v63 = vadd.f32 %v3330_v12, %v3105_v13  ;;  %4906 = vmatmul.mubr.msk.f32.gmra.mxu0 %vm2102_vm1, %v5037_v20  ;;  %4938 = vmatmul.mubr.msk.f32.gmra.mxu1 %vm2102_vm1, %v5037_v20  ;;  %v3107_v14 = vpop.f32.mrf.mxu0 }
 0x362   : > { %v3332_v23 = vpop.f32.mrf.mxu1  ;;  %3735 = vmatprep.mubr.f32.mxu0 %v7984_v34  ;;  %3992 = vmatprep.mubr.f32.mxu1 %v7984_v34 }
 0x363   : > { %5044 = vrsqrt.f32 %v3464_v4  ;;  %v3433_v8 = vmul.f32 0.03125, %v3331_v63  ;;  %v3110_v59 = vpop.f32.mrf.mxu0 }
 0x364   : > { %v5039_v22 = vpop.eup %5038  ;;  %v3335_v16 = vpop.f32.mrf.mxu1 }
 0x365   : > { %v3465_v21 = vadd.f32 1e-05, %v3433_v8  ;;  %v3336_v55 = vadd.f32 %v3335_v16, %v3110_v59  ;;  %4907 = vmatmul.mubr.msk.f32.gmra.mxu0 %vm2102_vm1, %v5039_v22  ;;  %4939 = vmatmul.mubr.msk.f32.gmra.mxu1 %vm2102_vm1, %v5039_v22  ;;  %v3112_v37 = vpop.f32.mrf.mxu0 }
 0x366   : > { %v3337_v17 = vpop.f32.mrf.mxu1  ;;  %3741 = vmatprep.mubr.f32.mxu0 %v7984_v34  ;;  %3998 = vmatprep.mubr.f32.mxu1 %v7984_v34 }
 0x367   : > { %5046 = vrsqrt.f32 %v3465_v21  ;;  %v3434_v18 = vmul.f32 0.03125, %v3336_v55  ;;  %v3115_v9 = vpop.f32.mrf.mxu0 }
 0x368   : > { %v5041_v15 = vpop.eup %5040  ;;  %v3340_v44 = vpop.f32.mrf.mxu1 }
 0x369   : > { %v3466_v19 = vadd.f32 1e-05, %v3434_v18  ;;  %v3341_v29 = vadd.f32 %v3340_v44, %v3115_v9  ;;  %4908 = vmatmul.mubr.msk.f32.gmra.mxu0 %vm2102_vm1, %v5041_v15  ;;  %4940 = vmatmul.mubr.msk.f32.gmra.mxu1 %vm2102_vm1, %v5041_v15  ;;  %v3117_v13 = vpop.f32.mrf.mxu0 }
 0x36a   : > { %v3342_v20 = vpop.f32.mrf.mxu1  ;;  %3747 = vmatprep.mubr.f32.mxu0 %v7984_v34  ;;  %4004 = vmatprep.mubr.f32.mxu1 %v7984_v34 }
 0x36b   : > { %5048 = vrsqrt.f32 %v3466_v19  ;;  %v3435_v12 = vmul.f32 0.03125, %v3341_v29  ;;  %v3120_v4 = vpop.f32.mrf.mxu0 }
 0x36c   : > { %v5043_v63 = vpop.eup %5042  ;;  %v3345_v14 = vpop.f32.mrf.mxu1 }
 0x36d   : > { %v3467_v23 = vadd.f32 1e-05, %v3435_v12  ;;  %v3346_v8 = vadd.f32 %v3345_v14, %v3120_v4  ;;  %4909 = vmatmul.mubr.msk.f32.gmra.mxu0 %vm2102_vm1, %v5043_v63  ;;  %4941 = vmatmul.mubr.msk.f32.gmra.mxu1 %vm2102_vm1, %v5043_v63  ;;  %v3122_v59 = vpop.f32.mrf.mxu0 }
 0x36e   : > { %v3347_v22 = vpop.f32.mrf.mxu1  ;;  %3753 = vmatprep.mubr.f32.mxu0 %v7984_v34  ;;  %4010 = vmatprep.mubr.f32.mxu1 %v7984_v34 }
 0x36f   : > { %5050 = vrsqrt.f32 %v3467_v23  ;;  %v3436_v16 = vmul.f32 0.03125, %v3346_v8  ;;  %v3125_v21 = vpop.f32.mrf.mxu0 }
 0x370   : > { %v5045_v55 = vpop.eup %5044  ;;  %v3350_v37 = vpop.f32.mrf.mxu1 }
 0x371   : > { %v3468_v17 = vadd.f32 1e-05, %v3436_v16  ;;  %v3351_v18 = vadd.f32 %v3350_v37, %v3125_v21  ;;  %4910 = vmatmul.mubr.msk.f32.gmra.mxu0 %vm2102_vm1, %v5045_v55  ;;  %4942 = vmatmul.mubr.msk.f32.gmra.mxu1 %vm2102_vm1, %v5045_v55  ;;  %v3127_v9 = vpop.f32.mrf.mxu0 }
 0x372   : > { %v3352_v15 = vpop.f32.mrf.mxu1  ;;  %3759 = vmatprep.mubr.f32.mxu0 %v7984_v34  ;;  %4016 = vmatprep.mubr.f32.mxu1 %v7984_v34 }
 0x373   : > { %5052 = vrsqrt.f32 %v3468_v17  ;;  %v3437_v44 = vmul.f32 0.03125, %v3351_v18  ;;  %v3130_v19 = vpop.f32.mrf.mxu0 }
 0x374   : > { %v5047_v29 = vpop.eup %5046  ;;  %v3355_v13 = vpop.f32.mrf.mxu1 }
 0x375   : > { %v3469_v20 = vadd.f32 1e-05, %v3437_v44  ;;  %v3356_v12 = vadd.f32 %v3355_v13, %v3130_v19  ;;  %4911 = vmatmul.mubr.msk.f32.gmra.mxu0 %vm2102_vm1, %v5047_v29  ;;  %4943 = vmatmul.mubr.msk.f32.gmra.mxu1 %vm2102_vm1, %v5047_v29  ;;  %v3132_v4 = vpop.f32.mrf.mxu0 }
 0x376   : > { %v3357_v63 = vpop.f32.mrf.mxu1  ;;  %3765 = vmatprep.mubr.f32.mxu0 %v7984_v34  ;;  %4022 = vmatprep.mubr.f32.mxu1 %v7984_v34 }
 0x377   : > { %5054 = vrsqrt.f32 %v3469_v20  ;;  %v3438_v14 = vmul.f32 0.03125, %v3356_v12  ;;  %v3135_v23 = vpop.f32.mrf.mxu0 }
 0x378   : > { %v5049_v8 = vpop.eup %5048  ;;  %v3360_v59 = vpop.f32.mrf.mxu1 }
 0x379   : > { %v3470_v22 = vadd.f32 1e-05, %v3438_v14  ;;  %v3361_v16 = vadd.f32 %v3360_v59, %v3135_v23  ;;  %4912 = vmatmul.mubr.msk.f32.gmra.mxu0 %vm2102_vm1, %v5049_v8  ;;  %4944 = vmatmul.mubr.msk.f32.gmra.mxu1 %vm2102_vm1, %v5049_v8  ;;  %v3137_v21 = vpop.f32.mrf.mxu0 }
 0x37a   : > { %v3362_v55 = vpop.f32.mrf.mxu1  ;;  %3771 = vmatprep.mubr.f32.mxu0 %v7984_v34  ;;  %4028 = vmatprep.mubr.f32.mxu1 %v7984_v34 }
 0x37b   : > { %5056 = vrsqrt.f32 %v3470_v22  ;;  %v3439_v37 = vmul.f32 0.03125, %v3361_v16  ;;  %v3140_v17 = vpop.f32.mrf.mxu0 }
 0x37c   : > { %v5051_v18 = vpop.eup %5050  ;;  %v3365_v9 = vpop.f32.mrf.mxu1 }
 0x37d   : > { %v3471_v15 = vadd.f32 1e-05, %v3439_v37  ;;  %v3366_v44 = vadd.f32 %v3365_v9, %v3140_v17  ;;  %4913 = vmatmul.mubr.msk.f32.gmra.mxu0 %vm2102_vm1, %v5051_v18  ;;  %4945 = vmatmul.mubr.msk.f32.gmra.mxu1 %vm2102_vm1, %v5051_v18  ;;  %v3142_v19 = vpop.f32.mrf.mxu0 }
 0x37e   : > { %v3367_v29 = vpop.f32.mrf.mxu1  ;;  %3777 = vmatprep.mubr.f32.mxu0 %v7984_v34  ;;  %4034 = vmatprep.mubr.f32.mxu1 %v7984_v34 }
 0x37f   : > { %5058 = vrsqrt.f32 %v3471_v15  ;;  %v3440_v13 = vmul.f32 0.03125, %v3366_v44  ;;  %v3145_v20 = vpop.f32.mrf.mxu0 }
 0x380   : > { %v5053_v12 = vpop.eup %5052  ;;  %v3370_v4 = vpop.f32.mrf.mxu1 }
 0x381   : > { %v3472_v63 = vadd.f32 1e-05, %v3440_v13  ;;  %v3371_v14 = vadd.f32 %v3370_v4, %v3145_v20  ;;  %4914 = vmatmul.mubr.msk.f32.gmra.mxu0 %vm2102_vm1, %v5053_v12  ;;  %4946 = vmatmul.mubr.msk.f32.gmra.mxu1 %vm2102_vm1, %v5053_v12  ;;  %v3147_v23 = vpop.f32.mrf.mxu0 }
 0x382   : > { %v3372_v8 = vpop.f32.mrf.mxu1  ;;  %3783 = vmatprep.mubr.f32.mxu0 %v7984_v34  ;;  %4040 = vmatprep.mubr.f32.mxu1 %v7984_v34 }
 0x383   : > { %5060 = vrsqrt.f32 %v3472_v63  ;;  %v3441_v59 = vmul.f32 0.03125, %v3371_v14  ;;  %v3150_v22 = vpop.f32.mrf.mxu0 }
 0x384   : > { %v5055_v16 = vpop.eup %5054  ;;  %v3375_v21 = vpop.f32.mrf.mxu1 }
 0x385   : > { %v3473_v55 = vadd.f32 1e-05, %v3441_v59  ;;  %v3376_v37 = vadd.f32 %v3375_v21, %v3150_v22  ;;  %4915 = vmatmul.mubr.msk.f32.gmra.mxu0 %vm2102_vm1, %v5055_v16  ;;  %4947 = vmatmul.mubr.msk.f32.gmra.mxu1 %vm2102_vm1, %v5055_v16  ;;  %v3152_v17 = vpop.f32.mrf.mxu0 }
 0x386   : > { %v3377_v18 = vpop.f32.mrf.mxu1  ;;  %3789 = vmatprep.mubr.f32.mxu0 %v7984_v34  ;;  %4046 = vmatprep.mubr.f32.mxu1 %v7984_v34 }
 0x387   : > { %5062 = vrsqrt.f32 %v3473_v55  ;;  %v3442_v9 = vmul.f32 0.03125, %v3376_v37  ;;  %v3155_v15 = vpop.f32.mrf.mxu0 }
 0x388   : > { %v5057_v44 = vpop.eup %5056  ;;  %v3380_v19 = vpop.f32.mrf.mxu1 }
 0x389   : > { %v3474_v29 = vadd.f32 1e-05, %v3442_v9  ;;  %v3381_v13 = vadd.f32 %v3380_v19, %v3155_v15  ;;  %4916 = vmatmul.mubr.msk.f32.gmra.mxu0 %vm2102_vm1, %v5057_v44  ;;  %4948 = vmatmul.mubr.msk.f32.gmra.mxu1 %vm2102_vm1, %v5057_v44  ;;  %v3157_v20 = vpop.f32.mrf.mxu0 }
 0x38a   : > { %v3382_v12 = vpop.f32.mrf.mxu1  ;;  %3795 = vmatprep.mubr.f32.mxu0 %v7984_v34  ;;  %4052 = vmatprep.mubr.f32.mxu1 %v7984_v34 }
 0x38b   : > { %5064 = vrsqrt.f32 %v3474_v29  ;;  %v3443_v4 = vmul.f32 0.03125, %v3381_v13  ;;  %v3160_v63 = vpop.f32.mrf.mxu0 }
 0x38c   : > { %v5059_v14 = vpop.eup %5058  ;;  %v3385_v23 = vpop.f32.mrf.mxu1 }
 0x38d   : > { %v3475_v8 = vadd.f32 1e-05, %v3443_v4  ;;  %v3386_v59 = vadd.f32 %v3385_v23, %v3160_v63  ;;  %4917 = vmatmul.mubr.msk.f32.gmra.mxu0 %vm2102_vm1, %v5059_v14  ;;  %4949 = vmatmul.mubr.msk.f32.gmra.mxu1 %vm2102_vm1, %v5059_v14  ;;  %v3162_v22 = vpop.f32.mrf.mxu0 }
 0x38e   : > { %v3387_v16 = vpop.f32.mrf.mxu1  ;;  %3801 = vmatprep.mubr.f32.mxu0 %v7984_v34  ;;  %4058 = vmatprep.mubr.f32.mxu1 %v7984_v34 }
 0x38f   : > { %5066 = vrsqrt.f32 %v3475_v8  ;;  %v3444_v21 = vmul.f32 0.03125, %v3386_v59  ;;  %v3165_v55 = vpop.f32.mrf.mxu0 }
 0x390   : > { %v5061_v37 = vpop.eup %5060  ;;  %v3390_v17 = vpop.f32.mrf.mxu1 }
 0x391   : > { %v3476_v18 = vadd.f32 1e-05, %v3444_v21  ;;  %v3391_v9 = vadd.f32 %v3390_v17, %v3165_v55  ;;  %4918 = vmatmul.mubr.msk.f32.gmra.mxu0 %vm2102_vm1, %v5061_v37  ;;  %4950 = vmatmul.mubr.msk.f32.gmra.mxu1 %vm2102_vm1, %v5061_v37  ;;  %v3167_v15 = vpop.f32.mrf.mxu0 }
 0x392   : > { %v3392_v44 = vpop.f32.mrf.mxu1  ;;  %3807 = vmatprep.mubr.f32.mxu0 %v7984_v34  ;;  %4064 = vmatprep.mubr.f32.mxu1 %v7984_v34 }
 0x393   : > { %5068 = vrsqrt.f32 %v3476_v18  ;;  %v3445_v19 = vmul.f32 0.03125, %v3391_v9  ;;  %v3170_v29 = vpop.f32.mrf.mxu0 }
 0x394   : > { %v5063_v13 = vpop.eup %5062  ;;  %v3395_v20 = vpop.f32.mrf.mxu1 }
 0x395   : > { %v3477_v12 = vadd.f32 1e-05, %v3445_v19  ;;  %v3396_v4 = vadd.f32 %v3395_v20, %v3170_v29  ;;  %4919 = vmatmul.mubr.msk.f32.gmra.mxu0 %vm2102_vm1, %v5063_v13  ;;  %4951 = vmatmul.mubr.msk.f32.gmra.mxu1 %vm2102_vm1, %v5063_v13  ;;  %v3172_v63 = vpop.f32.mrf.mxu0 }
 0x396   : > { %v3397_v14 = vpop.f32.mrf.mxu1  ;;  %3813 = vmatprep.mubr.f32.mxu0 %v7984_v34  ;;  %4070 = vmatprep.mubr.f32.mxu1 %v7984_v34 }
 0x397   : > { %5070 = vrsqrt.f32 %v3477_v12  ;;  %v3446_v23 = vmul.f32 0.03125, %v3396_v4  ;;  %v3175_v8 = vpop.f32.mrf.mxu0 }
 0x398   : > { %v5065_v59 = vpop.eup %5064  ;;  %v3400_v22 = vpop.f32.mrf.mxu1 }
 0x399   : > { %v3478_v16 = vadd.f32 1e-05, %v3446_v23  ;;  %v3401_v21 = vadd.f32 %v3400_v22, %v3175_v8  ;;  %4920 = vmatmul.mubr.msk.f32.gmra.mxu0 %vm2102_vm1, %v5065_v59  ;;  %4952 = vmatmul.mubr.msk.f32.gmra.mxu1 %vm2102_vm1, %v5065_v59  ;;  %v3177_v55 = vpop.f32.mrf.mxu0 }
 0x39a   : > { %v3402_v37 = vpop.f32.mrf.mxu1  ;;  %3819 = vmatprep.mubr.f32.mxu0 %v7984_v34  ;;  %4076 = vmatprep.mubr.f32.mxu1 %v7984_v34 }
 0x39b   : > { %5072 = vrsqrt.f32 %v3478_v16  ;;  %v3447_v17 = vmul.f32 0.03125, %v3401_v21  ;;  %v3180_v18 = vpop.f32.mrf.mxu0 }
 0x39c   : > { %v5067_v9 = vpop.eup %5066  ;;  %v3405_v15 = vpop.f32.mrf.mxu1 }
 0x39d   : > { %v3479_v44 = vadd.f32 1e-05, %v3447_v17  ;;  %v3406_v19 = vadd.f32 %v3405_v15, %v3180_v18  ;;  %4921 = vmatmul.mubr.msk.f32.gmra.mxu0 %vm2102_vm1, %v5067_v9  ;;  %4953 = vmatmul.mubr.msk.f32.gmra.mxu1 %vm2102_vm1, %v5067_v9  ;;  %v3182_v29 = vpop.f32.mrf.mxu0 }
 0x39e   : > { %v3407_v13 = vpop.f32.mrf.mxu1  ;;  %3825 = vmatprep.mubr.f32.mxu0 %v7984_v34  ;;  %4082 = vmatprep.mubr.f32.mxu1 %v7984_v34 }
 0x39f   : > { %5074 = vrsqrt.f32 %v3479_v44  ;;  %v3448_v20 = vmul.f32 0.03125, %v3406_v19  ;;  %v3185_v12 = vpop.f32.mrf.mxu0 }
 0x3a0   : > { %v5069_v4 = vpop.eup %5068  ;;  %v3410_v63 = vpop.f32.mrf.mxu1 }
 0x3a1   : > { %v3480_v14 = vadd.f32 1e-05, %v3448_v20  ;;  %v3411_v23 = vadd.f32 %v3410_v63, %v3185_v12  ;;  %4922 = vmatmul.mubr.msk.f32.gmra.mxu0 %vm2102_vm1, %v5069_v4  ;;  %4954 = vmatmul.mubr.msk.f32.gmra.mxu1 %vm2102_vm1, %v5069_v4  ;;  %v3187_v8 = vpop.f32.mrf.mxu0  ;;  %v4255_v4 = vlaneseq }
 0x3a2   : > { %v3412_v59 = vpop.f32.mrf.mxu1  ;;  %3831 = vmatprep.mubr.f32.mxu0 %v7984_v34  ;;  %4088 = vmatprep.mubr.f32.mxu1 %v7984_v34  ;;  %v4253_v8 = vld [vmem:[%s7738_s4] sm:$0xf] }
 0x3a3   : > { %5076 = vrsqrt.f32 %v3480_v14  ;;  %v3449_v22 = vmul.f32 0.03125, %v3411_v23  ;;  %v3190_v16 = vpop.f32.mrf.mxu0  ;;  %v4256_v63 = vshrl.u32 %v4255_v4, 7  ;;  %v4403_v59 = vld [vmem:[%s7739_s5] sm:$0xf] }
 0x3a4   : > { %v5071_v21 = vpop.eup %5070  ;;  %v3415_v55 = vpop.f32.mrf.mxu1 }
 0x3a5   : > { %v3481_v37 = vadd.f32 1e-05, %v3449_v22  ;;  %v3416_v17 = vadd.f32 %v3415_v55, %v3190_v16  ;;  %4923 = vmatmul.mubr.msk.f32.gmra.mxu0 %vm2102_vm1, %v5071_v21  ;;  %4955 = vmatmul.mubr.msk.f32.gmra.mxu1 %vm2102_vm1, %v5071_v21  ;;  %v3192_v18 = vpop.f32.mrf.mxu0  ;;  %v4257_v14 = vsub.s32 0, %v4256_v63  ;;  %v4265_v23 = vsub.s32 2, %v4256_v63 }
 0x3a6   : > { %v3417_v9 = vpop.f32.mrf.mxu1  ;;  %3837 = vmatprep.mubr.f32.mxu0 %v7984_v34  ;;  %4094 = vmatprep.mubr.f32.mxu1 %v7984_v34  ;;  %v4261_v22 = vsub.s32 1, %v4256_v63 }
 0x3a7   : > { %5078 = vrsqrt.f32 %v3481_v37  ;;  %v3450_v15 = vmul.f32 0.03125, %v3416_v17  ;;  %v7191_v16 = vrot.slane %v4253_v8, %v4257_v14  ;;  %v7193_v21 = vrot.slane %v4253_v8, %v4265_v23 }
 0x3a8   : > { %v5073_v44 = vpop.eup %5072  ;;  %v7195_v37 = vrot.slane %v4403_v59, %v4257_v14  ;;  %v7197_v18 = vrot.slane %v4403_v59, %v4265_v23  ;;  %v8149_v14 = vld [vmem:[#allocation80_spill] sm:$0xff] }
 0x3a9   : > { %v3482_v19 = vadd.f32 1e-05, %v3450_v15  ;;  %4924 = vmatmul.mubr.msk.f32.gmra.mxu0 %vm2102_vm1, %v5073_v44  ;;  %4956 = vmatmul.mubr.msk.f32.gmra.mxu1 %vm2102_vm1, %v5073_v44  ;;  %v7202_v44 = vrot.slane %v4253_v8, %v4261_v22 }
 0x3aa   : > { %3843 = vmatprep.mubr.f32.mxu0 %v7984_v34  ;;  %4100 = vmatprep.mubr.f32.mxu1 %v7984_v34 }
 0x3ab   : > { %5080 = vrsqrt.f32 %v3482_v19 }
 0x3ac   : > { %v5075_v29 = vpop.eup %5074 }
 0x3ad   : > { %4925 = vmatmul.mubr.msk.f32.gmra.mxu0 %vm2102_vm1, %v5075_v29  ;;  %4957 = vmatmul.mubr.msk.f32.gmra.mxu1 %vm2102_vm1, %v5075_v29 }
 0x3ae   : > { %3849 = vmatprep.mubr.f32.mxu0 %v7984_v34  ;;  %4106 = vmatprep.mubr.f32.mxu1 %v7984_v34 }
 0x3b0   : > { %v5077_v13 = vpop.eup %5076 }
 0x3b1   : > { %4926 = vmatmul.mubr.msk.f32.gmra.mxu0 %vm2102_vm1, %v5077_v13  ;;  %4958 = vmatmul.mubr.msk.f32.gmra.mxu1 %vm2102_vm1, %v5077_v13  ;;  %v7206_v13 = vrot.slane %v4403_v59, %v4261_v22 }
 0x3b2   : > { %3855 = vmatprep.mubr.f32.mxu0 %v7984_v34  ;;  %4112 = vmatprep.mubr.f32.mxu1 %v7984_v34 }
 0x3b4   : > { %v5079_v20 = vpop.eup %5078 }
 0x3b5   : > { %4927 = vmatmul.mubr.msk.f32.gmra.mxu0 %vm2102_vm1, %v5079_v20  ;;  %4959 = vmatmul.mubr.msk.f32.gmra.mxu1 %vm2102_vm1, %v5079_v20 }
 0x3b6   : > { %3861 = vmatprep.mubr.f32.mxu0 %v7984_v34  ;;  %4118 = vmatprep.mubr.f32.mxu1 %v7984_v34  ;;  %v4269_v34 = vsub.s32 3, %v4256_v63 }
 0x3b8   : > { %v5081_v12 = vpop.eup %5080  ;;  %v7204_v19 = vrot.slane %v4253_v8, %v4269_v34 }
 0x3b9   : > { %4928 = vmatmul.mubr.msk.f32.gmra.mxu0 %vm2102_vm1, %v5081_v12  ;;  %4960 = vmatmul.mubr.msk.f32.gmra.mxu1 %vm2102_vm1, %v5081_v12  ;;  %v7208_v12 = vrot.slane %v4403_v59, %v4269_v34 }
 0x3fc   : > { %v3677_v55 = vpop.f32.mrf.mxu0  ;;  %v3934_v17 = vpop.f32.mrf.mxu1 }
 0x3fd   : > { %v4125_v9 = vmul.f32 %v3677_v55, %v6400_v36  ;;  %v4127_v15 = vmul.f32 %v3934_v17, %v6403_v10 }
 0x3fe   : > { %v3679_v29 = vpop.f32.mrf.mxu0  ;;  %v3936_v20 = vpop.f32.mrf.mxu1 }
 0x3ff   : > { %v4275_v4 = vmul.f32 %v7191_v16, %v4125_v9  ;;  %v4277_v63 = vmul.f32 %v7193_v21, %v4127_v15  ;;  %v4126_v23 = vmul.f32 %v3679_v29, %v8149_v14  ;;  %v4128_v36 = vmul.f32 %v3936_v20, %v8150_v7 }
 0x400   : > { %v3683_v10 = vpop.f32.mrf.mxu0  ;;  %v3940_v8 = vpop.f32.mrf.mxu1 }
 0x401   : > { %v4425_v59 = vadd.f32 %v7195_v37, %v4275_v4  ;;  %v4427_v22 = vadd.f32 %v7197_v18, %v4277_v63  ;;  %v4276_v34 = vmul.f32 %v7202_v44, %v4126_v23  ;;  %v4278_v55 = vmul.f32 %v7204_v19, %v4128_v36 }
 0x402   : > { %v4129_v7 = vmul.f32 %v3683_v10, %v6418_v31  ;;  %v4131_v17 = vmul.f32 %v3940_v8, %v6423_v35  ;;  %v3685_v9 = vpop.f32.mrf.mxu0  ;;  %v3942_v15 = vpop.f32.mrf.mxu1 }
 0x403   : > { %4553 = vst [vmem:[%s7217_s25] sm:$0xff] %v4425_v59  ;;  %4555 = vst [vmem:[%s7217_s25 + $0x10] sm:$0xff] %v4427_v22  ;;  %v4426_v29 = vadd.f32 %v7206_v13, %v4276_v34  ;;  %v4428_v20 = vadd.f32 %v7208_v12, %v4278_v55  ;;  %v4130_v4 = vmul.f32 %v3685_v9, %v6426_v41 }
 0x404   : > { %v4132_v63 = vmul.f32 %v3942_v15, %v6429_v42  ;;  %v4279_v14 = vmul.f32 %v7191_v16, %v4129_v7  ;;  %v4281_v23 = vmul.f32 %v7193_v21, %v4131_v17  ;;  %v3689_v36 = vpop.f32.mrf.mxu0  ;;  %v3946_v31 = vpop.f32.mrf.mxu1 }
 0x405   : > { %4554 = vst [vmem:[%s7217_s25 + $0x8] sm:$0xff] %v4426_v29  ;;  %4556 = vst [vmem:[%s7217_s25 + $0x18] sm:$0xff] %v4428_v20  ;;  %v4280_v35 = vmul.f32 %v7202_v44, %v4130_v4  ;;  %v4133_v8 = vmul.f32 %v3689_v36, %v6438_v39  ;;  %v4135_v41 = vmul.f32 %v3946_v31, %v6449_v33 }
 0x406   : > { %v4282_v10 = vmul.f32 %v7204_v19, %v4132_v63  ;;  %v4429_v42 = vadd.f32 %v7195_v37, %v4279_v14  ;;  %v4431_v59 = vadd.f32 %v7197_v18, %v4281_v23  ;;  %v3691_v22 = vpop.f32.mrf.mxu0  ;;  %v3948_v34 = vpop.f32.mrf.mxu1 }
 0x407   : > { %v4430_v55 = vadd.f32 %v7206_v13, %v4280_v35  ;;  %v4283_v17 = vmul.f32 %v7191_v16, %v4133_v8  ;;  %v4285_v9 = vmul.f32 %v7193_v21, %v4135_v41  ;;  %v4134_v39 = vmul.f32 %v3691_v22, %v6452_v43 }
 0x408   : > { %v4432_v7 = vadd.f32 %v7208_v12, %v4282_v10  ;;  %4557 = vst [vmem:[%s7217_s25 + $0x20] sm:$0xff] %v4429_v42  ;;  %4559 = vst [vmem:[%s7217_s25 + $0x30] sm:$0xff] %v4431_v59  ;;  %v4136_v33 = vmul.f32 %v3948_v34, %v6455_v24  ;;  %v3695_v15 = vpop.f32.mrf.mxu0  ;;  %v3952_v29 = vpop.f32.mrf.mxu1 }
 0x409   : > { %4558 = vst [vmem:[%s7217_s25 + $0x28] sm:$0xff] %v4430_v55  ;;  %v4433_v20 = vadd.f32 %v7195_v37, %v4283_v17  ;;  %v4435_v4 = vadd.f32 %v7197_v18, %v4285_v9  ;;  %v4137_v63 = vmul.f32 %v3695_v15, %v6464_v45  ;;  %v4139_v14 = vmul.f32 %v3952_v29, %v6475_v40 }
 0x40a   : > { %4560 = vst [vmem:[%s7217_s25 + $0x38] sm:$0xff] %v4432_v7  ;;  %v4284_v23 = vmul.f32 %v7202_v44, %v4134_v39  ;;  %v4286_v36 = vmul.f32 %v7204_v19, %v4136_v33  ;;  %v3697_v31 = vpop.f32.mrf.mxu0  ;;  %v3954_v43 = vpop.f32.mrf.mxu1 }
 0x40b   : > { %4561 = vst [vmem:[%s7217_s25 + $0x40] sm:$0xff] %v4433_v20  ;;  %4563 = vst [vmem:[%s7217_s25 + $0x50] sm:$0xff] %v4435_v4  ;;  %v4287_v24 = vmul.f32 %v7191_v16, %v4137_v63  ;;  %v4289_v35 = vmul.f32 %v7193_v21, %v4139_v14  ;;  %v4138_v10 = vmul.f32 %v3697_v31, %v6478_v47 }
 0x40c   : > { %v4140_v45 = vmul.f32 %v3954_v43, %v6481_v26  ;;  %v4434_v40 = vadd.f32 %v7206_v13, %v4284_v23  ;;  %v4436_v8 = vadd.f32 %v7208_v12, %v4286_v36  ;;  %v3701_v41 = vpop.f32.mrf.mxu0  ;;  %v3958_v42 = vpop.f32.mrf.mxu1 }
 0x40d   : > { %v4437_v59 = vadd.f32 %v7195_v37, %v4287_v24  ;;  %v4439_v22 = vadd.f32 %v7197_v18, %v4289_v35  ;;  %v4288_v34 = vmul.f32 %v7202_v44, %v4138_v10  ;;  %v4141_v47 = vmul.f32 %v3701_v41, %v6490_v49 }
 0x40e   : > { %v4290_v55 = vmul.f32 %v7204_v19, %v4140_v45  ;;  %4562 = vst [vmem:[%s7217_s25 + $0x48] sm:$0xff] %v4434_v40  ;;  %4564 = vst [vmem:[%s7217_s25 + $0x58] sm:$0xff] %v4436_v8  ;;  %v4143_v26 = vmul.f32 %v3958_v42, %v6501_v46  ;;  %v3703_v7 = vpop.f32.mrf.mxu0  ;;  %v3960_v17 = vpop.f32.mrf.mxu1 }
 0x40f   : > { %4565 = vst [vmem:[%s7217_s25 + $0x60] sm:$0xff] %v4437_v59  ;;  %4567 = vst [vmem:[%s7217_s25 + $0x70] sm:$0xff] %v4439_v22  ;;  %v4438_v9 = vadd.f32 %v7206_v13, %v4288_v34  ;;  %v4142_v33 = vmul.f32 %v3703_v7, %v6504_v51  ;;  %v4144_v15 = vmul.f32 %v3960_v17, %v6507_v27 }
 0x410   : > { %v4440_v39 = vadd.f32 %v7208_v12, %v4290_v55  ;;  %v4291_v29 = vmul.f32 %v7191_v16, %v4141_v47  ;;  %v4293_v20 = vmul.f32 %v7193_v21, %v4143_v26 }
 0x411   : > { %v3707_v4 = vpop.f32.mrf.mxu0  ;;  %v3964_v49 = vpop.f32.mrf.mxu1  ;;  %4566 = vst [vmem:[%s7217_s25 + $0x68] sm:$0xff] %v4438_v9  ;;  %v4292_v46 = vmul.f32 %v7202_v44, %v4142_v33  ;;  %v4294_v63 = vmul.f32 %v7204_v19, %v4144_v15 }
 0x412   : > { %4568 = vst [vmem:[%s7217_s25 + $0x78] sm:$0xff] %v4440_v39  ;;  %v4145_v14 = vmul.f32 %v3707_v4, %v6516_v53  ;;  %v4147_v51 = vmul.f32 %v3964_v49, %v6521_v25  ;;  %v4441_v27 = vadd.f32 %v7195_v37, %v4291_v29  ;;  %v4443_v23 = vadd.f32 %v7197_v18, %v4293_v20 }
 0x413   : > { %v3709_v36 = vpop.f32.mrf.mxu0  ;;  %v3966_v31 = vpop.f32.mrf.mxu1  ;;  %v4442_v43 = vadd.f32 %v7206_v13, %v4292_v46  ;;  %v4444_v24 = vadd.f32 %v7208_v12, %v4294_v63 }
 0x414   : > { %v4295_v35 = vmul.f32 %v7191_v16, %v4145_v14  ;;  %v4297_v10 = vmul.f32 %v7193_v21, %v4147_v51  ;;  %4569 = vst [vmem:[%s7217_s25 + $0x80] sm:$0xff] %v4441_v27  ;;  %4571 = vst [vmem:[%s7217_s25 + $0x90] sm:$0xff] %v4443_v23  ;;  %v4146_v53 = vmul.f32 %v3709_v36, %v6524_v48 }
 0x415   : > { %v4148_v25 = vmul.f32 %v3966_v31, %v6527_v50  ;;  %v3713_v45 = vpop.f32.mrf.mxu0  ;;  %v3970_v40 = vpop.f32.mrf.mxu1  ;;  %4570 = vst [vmem:[%s7217_s25 + $0x88] sm:$0xff] %v4442_v43  ;;  %4572 = vst [vmem:[%s7217_s25 + $0x98] sm:$0xff] %v4444_v24 }
 0x416   : > { %v4445_v8 = vadd.f32 %v7195_v37, %v4295_v35  ;;  %v4447_v41 = vadd.f32 %v7197_v18, %v4297_v10  ;;  %v4149_v42 = vmul.f32 %v3713_v45, %v6536_v57  ;;  %v4151_v59 = vmul.f32 %v3970_v40, %v6541_v30 }
 0x417   : > { %v4296_v22 = vmul.f32 %v7202_v44, %v4146_v53  ;;  %v4298_v34 = vmul.f32 %v7204_v19, %v4148_v25  ;;  %v3715_v55 = vpop.f32.mrf.mxu0  ;;  %v3972_v48 = vpop.f32.mrf.mxu1 }
 0x418   : > { %4573 = vst [vmem:[%s7217_s25 + $0xa0] sm:$0xff] %v4445_v8  ;;  %4575 = vst [vmem:[%s7217_s25 + $0xb0] sm:$0xff] %v4447_v41  ;;  %v4299_v50 = vmul.f32 %v7191_v16, %v4149_v42  ;;  %v4301_v47 = vmul.f32 %v7193_v21, %v4151_v59  ;;  %v4150_v26 = vmul.f32 %v3715_v55, %v6544_v52 }
 0x419   : > { %v4152_v57 = vmul.f32 %v3972_v48, %v6547_v54  ;;  %v4446_v30 = vadd.f32 %v7206_v13, %v4296_v22  ;;  %v4448_v7 = vadd.f32 %v7208_v12, %v4298_v34  ;;  %v3719_v17 = vpop.f32.mrf.mxu0  ;;  %v3976_v9 = vpop.f32.mrf.mxu1 }
 0x41a   : > { %v4449_v39 = vadd.f32 %v7195_v37, %v4299_v50  ;;  %v4451_v33 = vadd.f32 %v7197_v18, %v4301_v47  ;;  %v4300_v15 = vmul.f32 %v7202_v44, %v4150_v26  ;;  %v4153_v52 = vmul.f32 %v3719_v17, %v6556_v61 }
 0x41b   : > { %v4302_v29 = vmul.f32 %v7204_v19, %v4152_v57  ;;  %4574 = vst [vmem:[%s7217_s25 + $0xa8] sm:$0xff] %v4446_v30  ;;  %4576 = vst [vmem:[%s7217_s25 + $0xb8] sm:$0xff] %v4448_v7  ;;  %v4155_v54 = vmul.f32 %v3976_v9, %v6561_v38  ;;  %v3721_v20 = vpop.f32.mrf.mxu0  ;;  %v3978_v4 = vpop.f32.mrf.mxu1 }
 0x41c   : > { %4577 = vst [vmem:[%s7217_s25 + $0xc0] sm:$0xff] %v4449_v39  ;;  %4579 = vst [vmem:[%s7217_s25 + $0xd0] sm:$0xff] %v4451_v33  ;;  %v4450_v49 = vadd.f32 %v7206_v13, %v4300_v15  ;;  %v4154_v63 = vmul.f32 %v3721_v20, %v6564_v56  ;;  %v4156_v14 = vmul.f32 %v3978_v4, %v6567_v58  ;;  %v8151_v20 = vld [vmem:[#allocation82_spill] sm:$0xff] }
 0x41d   : > { %v4452_v46 = vadd.f32 %v7208_v12, %v4302_v29  ;;  %v4303_v51 = vmul.f32 %v7191_v16, %v4153_v52  ;;  %v4305_v27 = vmul.f32 %v7193_v21, %v4155_v54  ;;  %v3725_v23 = vpop.f32.mrf.mxu0  ;;  %v3982_v61 = vpop.f32.mrf.mxu1 }
 0x41e   : > { %4578 = vst [vmem:[%s7217_s25 + $0xc8] sm:$0xff] %v4450_v49  ;;  %v4304_v38 = vmul.f32 %v7202_v44, %v4154_v63  ;;  %v4306_v36 = vmul.f32 %v7204_v19, %v4156_v14  ;;  %v4157_v31 = vmul.f32 %v3725_v23, %v6576_v1  ;;  %v4159_v56 = vmul.f32 %v3982_v61, %v6581_v32  ;;  %v8153_v23 = vld [vmem:[#allocation84_spill] sm:$0xff] }
 0x41f   : > { %4580 = vst [vmem:[%s7217_s25 + $0xd8] sm:$0xff] %v4452_v46  ;;  %v4453_v58 = vadd.f32 %v7195_v37, %v4303_v51  ;;  %v4455_v43 = vadd.f32 %v7197_v18, %v4305_v27  ;;  %v3727_v24 = vpop.f32.mrf.mxu0  ;;  %v3984_v35 = vpop.f32.mrf.mxu1  ;;  %v8152_v51 = vld [vmem:[#allocation83_spill] sm:$0xff] }
 0x420   : > { %v4454_v10 = vadd.f32 %v7206_v13, %v4304_v38  ;;  %v4456_v53 = vadd.f32 %v7208_v12, %v4306_v36  ;;  %v4307_v25 = vmul.f32 %v7191_v16, %v4157_v31  ;;  %v4309_v45 = vmul.f32 %v7193_v21, %v4159_v56 }
 0x421   : > { %4581 = vst [vmem:[%s7217_s25 + $0xe0] sm:$0xff] %v4453_v58  ;;  %4583 = vst [vmem:[%s7217_s25 + $0xf0] sm:$0xff] %v4455_v43  ;;  %v4158_v1 = vmul.f32 %v3727_v24, %v6584_v60  ;;  %v4160_v32 = vmul.f32 %v3984_v35, %v6587_v62  ;;  %v3731_v40 = vpop.f32.mrf.mxu0  ;;  %v3988_v8 = vpop.f32.mrf.mxu1  ;;  %v8154_v35 = vld [vmem:[#allocation85_spill] sm:$0xff] }
 0x422   : > { %4582 = vst [vmem:[%s7217_s25 + $0xe8] sm:$0xff] %v4454_v10  ;;  %4584 = vst [vmem:[%s7217_s25 + $0xf8] sm:$0xff] %v4456_v53  ;;  %v4457_v41 = vadd.f32 %v7195_v37, %v4307_v25  ;;  %v4459_v42 = vadd.f32 %v7197_v18, %v4309_v45  ;;  %v4161_v59 = vmul.f32 %v3731_v40, %v6596_v6  ;;  %v8155_v53 = vld [vmem:[#allocation86_spill] sm:$0xff] }
 0x423   : > { %v4163_v22 = vmul.f32 %v3988_v8, %v6601_v2  ;;  %v4308_v34 = vmul.f32 %v7202_v44, %v4158_v1  ;;  %v4310_v55 = vmul.f32 %v7204_v19, %v4160_v32  ;;  %v3733_v48 = vpop.f32.mrf.mxu0  ;;  %v3990_v60 = vpop.f32.mrf.mxu1  ;;  %v8156_v8 = vld [vmem:[#allocation87_spill] sm:$0xff] }
 0x424   : > { %4585 = vst [vmem:[%s7217_s25 + $0x100] sm:$0xff] %v4457_v41  ;;  %4587 = vst [vmem:[%s7217_s25 + $0x110] sm:$0xff] %v4459_v42  ;;  %v4311_v62 = vmul.f32 %v7191_v16, %v4161_v59  ;;  %v4162_v47 = vmul.f32 %v3733_v48, %v6604_v0  ;;  %v4164_v6 = vmul.f32 %v3990_v60, %v6607_v3  ;;  %v8157_v42 = vld [vmem:[#allocation88_spill] sm:$0xff] }
 0x425   : > { %v4313_v50 = vmul.f32 %v7193_v21, %v4163_v22  ;;  %v4458_v2 = vadd.f32 %v7206_v13, %v4308_v34  ;;  %v4460_v26 = vadd.f32 %v7208_v12, %v4310_v55  ;;  %v3737_v57 = vpop.f32.mrf.mxu0  ;;  %v3994_v30 = vpop.f32.mrf.mxu1 }
 0x426   : > { %v4461_v7 = vadd.f32 %v7195_v37, %v4311_v62  ;;  %v4312_v9 = vmul.f32 %v7202_v44, %v4162_v47  ;;  %v4314_v39 = vmul.f32 %v7204_v19, %v4164_v6  ;;  %v4165_v0 = vmul.f32 %v3737_v57, %v6616_v11  ;;  %v8159_v6 = vld [vmem:[#allocation3_spill] sm:$0xff] }
 0x427   : > { %v4463_v17 = vadd.f32 %v7197_v18, %v4313_v50  ;;  %4586 = vst [vmem:[%s7217_s25 + $0x108] sm:$0xff] %v4458_v2  ;;  %4588 = vst [vmem:[%s7217_s25 + $0x118] sm:$0xff] %v4460_v26  ;;  %v4167_v3 = vmul.f32 %v3994_v30, %v6621_v28  ;;  %v3739_v33 = vpop.f32.mrf.mxu0  ;;  %v3996_v15 = vpop.f32.mrf.mxu1  ;;  %v8158_v50 = vld [vmem:[#allocation89_spill] sm:$0xff] }
 0x428   : > { %4589 = vst [vmem:[%s7217_s25 + $0x120] sm:$0xff] %v4461_v7  ;;  %v4462_v29 = vadd.f32 %v7206_v13, %v4312_v9  ;;  %v4464_v52 = vadd.f32 %v7208_v12, %v4314_v39  ;;  %v4166_v54 = vmul.f32 %v3739_v33, %v6624_v5  ;;  %v4168_v4 = vmul.f32 %v3996_v15, %v8151_v20  ;;  %v8161_v15 = vld [vmem:[#allocation5_spill] sm:$0xff] }
 0x429   : > { %4591 = vst [vmem:[%s7217_s25 + $0x130] sm:$0xff] %v4463_v17  ;;  %v4315_v49 = vmul.f32 %v7191_v16, %v4165_v0  ;;  %v4317_v46 = vmul.f32 %v7193_v21, %v4167_v3  ;;  %v3743_v63 = vpop.f32.mrf.mxu0  ;;  %v4000_v11 = vpop.f32.mrf.mxu1  ;;  %v8160_v3 = vld [vmem:[#allocation4_spill] sm:$0xff] }
 0x42a   : > { %4590 = vst [vmem:[%s7217_s25 + $0x128] sm:$0xff] %v4462_v29  ;;  %4592 = vst [vmem:[%s7217_s25 + $0x138] sm:$0xff] %v4464_v52  ;;  %v4316_v28 = vmul.f32 %v7202_v44, %v4166_v54  ;;  %v4318_v14 = vmul.f32 %v7204_v19, %v4168_v4  ;;  %v4169_v27 = vmul.f32 %v3743_v63, %v8152_v51  ;;  %v8163_v63 = vld [vmem:[#allocation7_spill] sm:$0xff] }
 0x42b   : > { %v4171_v5 = vmul.f32 %v4000_v11, %v8153_v23  ;;  %v4465_v61 = vadd.f32 %v7195_v37, %v4315_v49  ;;  %v4467_v38 = vadd.f32 %v7197_v18, %v4317_v46  ;;  %v3745_v36 = vpop.f32.mrf.mxu0  ;;  %v4002_v31 = vpop.f32.mrf.mxu1  ;;  %v8162_v49 = vld [vmem:[#allocation6_spill] sm:$0xff] }
 0x42c   : > { %v4466_v56 = vadd.f32 %v7206_v13, %v4316_v28  ;;  %v4468_v58 = vadd.f32 %v7208_v12, %v4318_v14  ;;  %v4319_v43 = vmul.f32 %v7191_v16, %v4169_v27  ;;  %v4170_v10 = vmul.f32 %v3745_v36, %v8154_v35  ;;  %v8165_v36 = vld [vmem:[#allocation9_spill] sm:$0xff] }
 0x42d   : > { %v4321_v24 = vmul.f32 %v7193_v21, %v4171_v5  ;;  %4593 = vst [vmem:[%s7217_s25 + $0x140] sm:$0xff] %v4465_v61  ;;  %4595 = vst [vmem:[%s7217_s25 + $0x150] sm:$0xff] %v4467_v38  ;;  %v4172_v25 = vmul.f32 %v4002_v31, %v8155_v53  ;;  %v3749_v45 = vpop.f32.mrf.mxu0  ;;  %v4006_v1 = vpop.f32.mrf.mxu1  ;;  %v8164_v61 = vld [vmem:[#allocation8_spill] sm:$0xff] }
 0x42e   : > { %4594 = vst [vmem:[%s7217_s25 + $0x148] sm:$0xff] %v4466_v56  ;;  %4596 = vst [vmem:[%s7217_s25 + $0x158] sm:$0xff] %v4468_v58  ;;  %v4469_v32 = vadd.f32 %v7195_v37, %v4319_v43  ;;  %v4173_v41 = vmul.f32 %v3749_v45, %v8156_v8  ;;  %v4175_v59 = vmul.f32 %v4006_v1, %v8157_v42  ;;  %v8166_v45 = vld [vmem:[#allocation10_spill] sm:$0xff] }
 0x42f   : > { %v4471_v40 = vadd.f32 %v7197_v18, %v4321_v24  ;;  %v4320_v22 = vmul.f32 %v7202_v44, %v4170_v10  ;;  %v4322_v34 = vmul.f32 %v7204_v19, %v4172_v25  ;;  %v3751_v55 = vpop.f32.mrf.mxu0  ;;  %v4008_v48 = vpop.f32.mrf.mxu1 }
 0x430   : > { %4597 = vst [vmem:[%s7217_s25 + $0x160] sm:$0xff] %v4469_v32  ;;  %v4323_v60 = vmul.f32 %v7191_v16, %v4173_v41  ;;  %v4325_v62 = vmul.f32 %v7193_v21, %v4175_v59  ;;  %v4174_v47 = vmul.f32 %v3751_v55, %v8158_v50  ;;  %v4176_v2 = vmul.f32 %v4008_v48, %v8159_v6  ;;  %v8167_v32 = vld [vmem:[#allocation11_spill] sm:$0xff]  ;;  %v8169_v55 = vld [vmem:[#allocation13_spill] sm:$0xff] }
 0x431   : > { %4599 = vst [vmem:[%s7217_s25 + $0x170] sm:$0xff] %v4471_v40  ;;  %v4470_v26 = vadd.f32 %v7206_v13, %v4320_v22  ;;  %v4472_v57 = vadd.f32 %v7208_v12, %v4322_v34  ;;  %v3755_v30 = vpop.f32.mrf.mxu0  ;;  %v4012_v7 = vpop.f32.mrf.mxu1  ;;  %v8168_v22 = vld [vmem:[#allocation12_spill] sm:$0xff] }
 0x432   : > { %v4473_v17 = vadd.f32 %v7195_v37, %v4323_v60  ;;  %v4475_v9 = vadd.f32 %v7197_v18, %v4325_v62  ;;  %v4324_v39 = vmul.f32 %v7202_v44, %v4174_v47  ;;  %v4326_v0 = vmul.f32 %v7204_v19, %v4176_v2 }
 0x433   : > { %4598 = vst [vmem:[%s7217_s25 + $0x168] sm:$0xff] %v4470_v26  ;;  %4600 = vst [vmem:[%s7217_s25 + $0x178] sm:$0xff] %v4472_v57  ;;  %v4177_v33 = vmul.f32 %v3755_v30, %v8160_v3  ;;  %v4179_v29 = vmul.f32 %v4012_v7, %v8161_v15  ;;  %v3757_v52 = vpop.f32.mrf.mxu0  ;;  %v4014_v54 = vpop.f32.mrf.mxu1  ;;  %v8170_v26 = vld [vmem:[#allocation14_spill] sm:$0xff]  ;;  %v8171_v30 = vld [vmem:[#allocation15_spill] sm:$0xff] }
 0x434   : > { %4601 = vst [vmem:[%s7217_s25 + $0x180] sm:$0xff] %v4473_v17  ;;  %4603 = vst [vmem:[%s7217_s25 + $0x190] sm:$0xff] %v4475_v9  ;;  %v4474_v20 = vadd.f32 %v7206_v13, %v4324_v39  ;;  %v4476_v4 = vadd.f32 %v7208_v12, %v4326_v0  ;;  %v4178_v46 = vmul.f32 %v3757_v52, %v8162_v49  ;;  %v8172_v52 = vld [vmem:[#allocation16_spill] sm:$0xff] }
 0x435   : > { %v4180_v11 = vmul.f32 %v4014_v54, %v8163_v63  ;;  %v4327_v28 = vmul.f32 %v7191_v16, %v4177_v33  ;;  %v4329_v14 = vmul.f32 %v7193_v21, %v4179_v29  ;;  %v3761_v51 = vpop.f32.mrf.mxu0  ;;  %v4018_v27 = vpop.f32.mrf.mxu1 }
 0x436   : > { %4602 = vst [vmem:[%s7217_s25 + $0x188] sm:$0xff] %v4474_v20  ;;  %4604 = vst [vmem:[%s7217_s25 + $0x198] sm:$0xff] %v4476_v4  ;;  %v4328_v23 = vmul.f32 %v7202_v44, %v4178_v46  ;;  %v4181_v38 = vmul.f32 %v3761_v51, %v8164_v61  ;;  %v4183_v31 = vmul.f32 %v4018_v27, %v8165_v36  ;;  %v8173_v20 = vld [vmem:[#allocation17_spill] sm:$0xff]  ;;  %v8175_v51 = vld [vmem:[#allocation19_spill] sm:$0xff] }
 0x437   : > { %v4330_v5 = vmul.f32 %v7204_v19, %v4180_v11  ;;  %v4477_v56 = vadd.f32 %v7195_v37, %v4327_v28  ;;  %v4479_v58 = vadd.f32 %v7197_v18, %v4329_v14  ;;  %v3763_v43 = vpop.f32.mrf.mxu0  ;;  %v4020_v24 = vpop.f32.mrf.mxu1  ;;  %v8174_v28 = vld [vmem:[#allocation18_spill] sm:$0xff] }
 0x438   : > { %v4478_v35 = vadd.f32 %v7206_v13, %v4328_v23  ;;  %v4331_v53 = vmul.f32 %v7191_v16, %v4181_v38  ;;  %v4333_v25 = vmul.f32 %v7193_v21, %v4183_v31  ;;  %v4182_v1 = vmul.f32 %v3763_v43, %v8166_v45  ;;  %v8177_v43 = vld [vmem:[#allocation21_spill] sm:$0xff] }
 0x439   : > { %v4480_v10 = vadd.f32 %v7208_v12, %v4330_v5  ;;  %4605 = vst [vmem:[%s7217_s25 + $0x1a0] sm:$0xff] %v4477_v56  ;;  %4607 = vst [vmem:[%s7217_s25 + $0x1b0] sm:$0xff] %v4479_v58  ;;  %v4184_v40 = vmul.f32 %v4020_v24, %v8167_v32  ;;  %v3767_v8 = vpop.f32.mrf.mxu0  ;;  %v4024_v41 = vpop.f32.mrf.mxu1  ;;  %v8176_v56 = vld [vmem:[#allocation20_spill] sm:$0xff] }
 0x43a   : > { %4606 = vst [vmem:[%s7217_s25 + $0x1a8] sm:$0xff] %v4478_v35  ;;  %v4481_v42 = vadd.f32 %v7195_v37, %v4331_v53  ;;  %v4483_v59 = vadd.f32 %v7197_v18, %v4333_v25  ;;  %v4185_v34 = vmul.f32 %v3767_v8, %v8168_v22  ;;  %v4187_v48 = vmul.f32 %v4024_v41, %v8169_v55  ;;  %v8178_v8 = vld [vmem:[#allocation22_spill] sm:$0xff] }
 0x43b   : > { %4608 = vst [vmem:[%s7217_s25 + $0x1b8] sm:$0xff] %v4480_v10  ;;  %v4332_v60 = vmul.f32 %v7202_v44, %v4182_v1  ;;  %v4334_v62 = vmul.f32 %v7204_v19, %v4184_v40  ;;  %v3769_v50 = vpop.f32.mrf.mxu0  ;;  %v4026_v47 = vpop.f32.mrf.mxu1 }
 0x43c   : > { %4609 = vst [vmem:[%s7217_s25 + $0x1c0] sm:$0xff] %v4481_v42  ;;  %4611 = vst [vmem:[%s7217_s25 + $0x1d0] sm:$0xff] %v4483_v59  ;;  %v4335_v6 = vmul.f32 %v7191_v16, %v4185_v34  ;;  %v4337_v2 = vmul.f32 %v7193_v21, %v4187_v48  ;;  %v4186_v57 = vmul.f32 %v3769_v50, %v8170_v26  ;;  %v8179_v42 = vld [vmem:[#allocation23_spill] sm:$0xff]  ;;  %v8181_v50 = vld [vmem:[#allocation25_spill] sm:$0xff] }
 0x43d   : > { %v4188_v7 = vmul.f32 %v4026_v47, %v8171_v30  ;;  %v4482_v17 = vadd.f32 %v7206_v13, %v4332_v60  ;;  %v4484_v9 = vadd.f32 %v7208_v12, %v4334_v62  ;;  %v3773_v39 = vpop.f32.mrf.mxu0  ;;  %v4030_v0 = vpop.f32.mrf.mxu1  ;;  %v8180_v60 = vld [vmem:[#allocation24_spill] sm:$0xff] }
 0x43e   : > { %v4485_v3 = vadd.f32 %v7195_v37, %v4335_v6  ;;  %v4487_v33 = vadd.f32 %v7197_v18, %v4337_v2  ;;  %v4336_v15 = vmul.f32 %v7202_v44, %v4186_v57  ;;  %v4189_v54 = vmul.f32 %v3773_v39, %v8172_v52  ;;  %v8183_v39 = vld [vmem:[#allocation27_spill] sm:$0xff] }
 0x43f   : > { %v4338_v29 = vmul.f32 %v7204_v19, %v4188_v7  ;;  %4610 = vst [vmem:[%s7217_s25 + $0x1c8] sm:$0xff] %v4482_v17  ;;  %4612 = vst [vmem:[%s7217_s25 + $0x1d8] sm:$0xff] %v4484_v9  ;;  %v4191_v4 = vmul.f32 %v4030_v0, %v8173_v20  ;;  %v3775_v49 = vpop.f32.mrf.mxu0  ;;  %v4032_v46 = vpop.f32.mrf.mxu1  ;;  %v8182_v17 = vld [vmem:[#allocation26_spill] sm:$0xff] }
 0x440   : > { %4613 = vst [vmem:[%s7217_s25 + $0x1e0] sm:$0xff] %v4485_v3  ;;  %4615 = vst [vmem:[%s7217_s25 + $0x1f0] sm:$0xff] %v4487_v33  ;;  %v4486_v63 = vadd.f32 %v7206_v13, %v4336_v15  ;;  %v4190_v14 = vmul.f32 %v3775_v49, %v8174_v28  ;;  %v4192_v27 = vmul.f32 %v4032_v46, %v8175_v51  ;;  %v8184_v49 = vld [vmem:[#allocation28_spill] sm:$0xff] }
 0x441   : > { %v4488_v11 = vadd.f32 %v7208_v12, %v4338_v29  ;;  %v4339_v23 = vmul.f32 %v7191_v16, %v4189_v54  ;;  %v4341_v5 = vmul.f32 %v7193_v21, %v4191_v4  ;;  %v3779_v61 = vpop.f32.mrf.mxu0  ;;  %v4036_v38 = vpop.f32.mrf.mxu1 }
 0x442   : > { %4614 = vst [vmem:[%s7217_s25 + $0x1e8] sm:$0xff] %v4486_v63  ;;  %v4340_v36 = vmul.f32 %v7202_v44, %v4190_v14  ;;  %v4342_v31 = vmul.f32 %v7204_v19, %v4192_v27  ;;  %v4193_v58 = vmul.f32 %v3779_v61, %v8176_v56  ;;  %v4195_v24 = vmul.f32 %v4036_v38, %v8177_v43  ;;  %v8185_v63 = vld [vmem:[#allocation29_spill] sm:$0xff]  ;;  %v8187_v61 = vld [vmem:[#allocation31_spill] sm:$0xff] }
 0x443   : > { %4616 = vst [vmem:[%s7217_s25 + $0x1f8] sm:$0xff] %v4488_v11  ;;  %v4489_v35 = vadd.f32 %v7195_v37, %v4339_v23  ;;  %v4491_v10 = vadd.f32 %v7197_v18, %v4341_v5  ;;  %v3781_v53 = vpop.f32.mrf.mxu0  ;;  %v4038_v25 = vpop.f32.mrf.mxu1  ;;  %v8186_v23 = vld [vmem:[#allocation30_spill] sm:$0xff] }
 0x444   : > { %v4490_v45 = vadd.f32 %v7206_v13, %v4340_v36  ;;  %v4492_v1 = vadd.f32 %v7208_v12, %v4342_v31  ;;  %v4343_v32 = vmul.f32 %v7191_v16, %v4193_v58  ;;  %v4345_v40 = vmul.f32 %v7193_v21, %v4195_v24 }
 0x445   : > { %4617 = vst [vmem:[%s7217_s25 + $0x200] sm:$0xff] %v4489_v35  ;;  %4619 = vst [vmem:[%s7217_s25 + $0x210] sm:$0xff] %v4491_v10  ;;  %v4194_v41 = vmul.f32 %v3781_v53, %v8178_v8  ;;  %v4196_v59 = vmul.f32 %v4038_v25, %v8179_v42  ;;  %v3785_v22 = vpop.f32.mrf.mxu0  ;;  %v4042_v34 = vpop.f32.mrf.mxu1  ;;  %v8188_v35 = vld [vmem:[#allocation32_spill] sm:$0xff]  ;;  %v8189_v53 = vld [vmem:[#allocation33_spill] sm:$0xff] }
 0x446   : > { %4618 = vst [vmem:[%s7217_s25 + $0x208] sm:$0xff] %v4490_v45  ;;  %4620 = vst [vmem:[%s7217_s25 + $0x218] sm:$0xff] %v4492_v1  ;;  %v4493_v55 = vadd.f32 %v7195_v37, %v4343_v32  ;;  %v4495_v48 = vadd.f32 %v7197_v18, %v4345_v40  ;;  %v4197_v62 = vmul.f32 %v3785_v22, %v8180_v60  ;;  %v8190_v22 = vld [vmem:[#allocation34_spill] sm:$0xff] }
 0x447   : > { %v4199_v47 = vmul.f32 %v4042_v34, %v8181_v50  ;;  %v4344_v6 = vmul.f32 %v7202_v44, %v4194_v41  ;;  %v4346_v2 = vmul.f32 %v7204_v19, %v4196_v59  ;;  %v3787_v26 = vpop.f32.mrf.mxu0  ;;  %v4044_v57 = vpop.f32.mrf.mxu1 }
 0x448   : > { %4621 = vst [vmem:[%s7217_s25 + $0x220] sm:$0xff] %v4493_v55  ;;  %4623 = vst [vmem:[%s7217_s25 + $0x230] sm:$0xff] %v4495_v48  ;;  %v4347_v30 = vmul.f32 %v7191_v16, %v4197_v62  ;;  %v4198_v9 = vmul.f32 %v3787_v26, %v8182_v17  ;;  %v4200_v0 = vmul.f32 %v4044_v57, %v8183_v39  ;;  %v8191_v55 = vld [vmem:[#allocation35_spill] sm:$0xff]  ;;  %v8193_v26 = vld [vmem:[#allocation37_spill] sm:$0xff] }
 0x449   : > { %v4349_v7 = vmul.f32 %v7193_v21, %v4199_v47  ;;  %v4494_v3 = vadd.f32 %v7206_v13, %v4344_v6  ;;  %v4496_v33 = vadd.f32 %v7208_v12, %v4346_v2  ;;  %v3791_v15 = vpop.f32.mrf.mxu0  ;;  %v4048_v29 = vpop.f32.mrf.mxu1  ;;  %v8192_v6 = vld [vmem:[#allocation36_spill] sm:$0xff] }
 0x44a   : > { %v4497_v52 = vadd.f32 %v7195_v37, %v4347_v30  ;;  %v4348_v20 = vmul.f32 %v7202_v44, %v4198_v9  ;;  %v4350_v4 = vmul.f32 %v7204_v19, %v4200_v0  ;;  %v4201_v46 = vmul.f32 %v3791_v15, %v8184_v49  ;;  %v8195_v15 = vld [vmem:[#allocation39_spill] sm:$0xff] }
 0x44b   : > { %v4499_v54 = vadd.f32 %v7197_v18, %v4349_v7  ;;  %4622 = vst [vmem:[%s7217_s25 + $0x228] sm:$0xff] %v4494_v3  ;;  %4624 = vst [vmem:[%s7217_s25 + $0x238] sm:$0xff] %v4496_v33  ;;  %v4203_v11 = vmul.f32 %v4048_v29, %v8185_v63  ;;  %v3793_v28 = vpop.f32.mrf.mxu0  ;;  %v4050_v14 = vpop.f32.mrf.mxu1  ;;  %v8194_v3 = vld [vmem:[#allocation38_spill] sm:$0xff] }
 0x44c   : > { %4625 = vst [vmem:[%s7217_s25 + $0x240] sm:$0xff] %v4497_v52  ;;  %v4498_v51 = vadd.f32 %v7206_v13, %v4348_v20  ;;  %v4500_v27 = vadd.f32 %v7208_v12, %v4350_v4  ;;  %v4202_v5 = vmul.f32 %v3793_v28, %v8186_v23  ;;  %v4204_v38 = vmul.f32 %v4050_v14, %v8187_v61  ;;  %v8196_v28 = vld [vmem:[#allocation40_spill] sm:$0xff] }
 0x44d   : > { %4627 = vst [vmem:[%s7217_s25 + $0x250] sm:$0xff] %v4499_v54  ;;  %v4351_v36 = vmul.f32 %v7191_v16, %v4201_v46  ;;  %v4353_v31 = vmul.f32 %v7193_v21, %v4203_v11  ;;  %v3797_v56 = vpop.f32.mrf.mxu0  ;;  %v4054_v58 = vpop.f32.mrf.mxu1 }
 0x44e   : > { %4626 = vst [vmem:[%s7217_s25 + $0x248] sm:$0xff] %v4498_v51  ;;  %4628 = vst [vmem:[%s7217_s25 + $0x258] sm:$0xff] %v4500_v27  ;;  %v4352_v43 = vmul.f32 %v7202_v44, %v4202_v5  ;;  %v4354_v24 = vmul.f32 %v7204_v19, %v4204_v38  ;;  %v4205_v10 = vmul.f32 %v3797_v56, %v8188_v35  ;;  %v8197_v51 = vld [vmem:[#allocation41_spill] sm:$0xff]  ;;  %v8199_v56 = vld [vmem:[#allocation43_spill] sm:$0xff] }
 0x44f   : > { %v4207_v25 = vmul.f32 %v4054_v58, %v8189_v53  ;;  %v4501_v45 = vadd.f32 %v7195_v37, %v4351_v36  ;;  %v4503_v1 = vadd.f32 %v7197_v18, %v4353_v31  ;;  %v3799_v32 = vpop.f32.mrf.mxu0  ;;  %v4056_v40 = vpop.f32.mrf.mxu1  ;;  %v8198_v36 = vld [vmem:[#allocation42_spill] sm:$0xff] }
 0x450   : > { %v4502_v8 = vadd.f32 %v7206_v13, %v4352_v43  ;;  %v4504_v41 = vadd.f32 %v7208_v12, %v4354_v24  ;;  %v4355_v42 = vmul.f32 %v7191_v16, %v4205_v10  ;;  %v4206_v34 = vmul.f32 %v3799_v32, %v8190_v22  ;;  %v8201_v32 = vld [vmem:[#allocation45_spill] sm:$0xff] }
 0x451   : > { %v4357_v59 = vmul.f32 %v7193_v21, %v4207_v25  ;;  %4629 = vst [vmem:[%s7217_s25 + $0x260] sm:$0xff] %v4501_v45  ;;  %4631 = vst [vmem:[%s7217_s25 + $0x270] sm:$0xff] %v4503_v1  ;;  %v4208_v48 = vmul.f32 %v4056_v40, %v8191_v55  ;;  %v3803_v60 = vpop.f32.mrf.mxu0  ;;  %v4060_v62 = vpop.f32.mrf.mxu1  ;;  %v8200_v45 = vld [vmem:[#allocation44_spill] sm:$0xff] }
 0x452   : > { %4630 = vst [vmem:[%s7217_s25 + $0x268] sm:$0xff] %v4502_v8  ;;  %4632 = vst [vmem:[%s7217_s25 + $0x278] sm:$0xff] %v4504_v41  ;;  %v4505_v50 = vadd.f32 %v7195_v37, %v4355_v42  ;;  %v4209_v2 = vmul.f32 %v3803_v60, %v8192_v6  ;;  %v4211_v57 = vmul.f32 %v4060_v62, %v8193_v26  ;;  %v8202_v60 = vld [vmem:[#allocation46_spill] sm:$0xff] }
 0x453   : > { %v4507_v47 = vadd.f32 %v7197_v18, %v4357_v59  ;;  %v4356_v30 = vmul.f32 %v7202_v44, %v4206_v34  ;;  %v4358_v7 = vmul.f32 %v7204_v19, %v4208_v48  ;;  %v3805_v17 = vpop.f32.mrf.mxu0  ;;  %v4062_v9 = vpop.f32.mrf.mxu1 }
 0x454   : > { %4633 = vst [vmem:[%s7217_s25 + $0x280] sm:$0xff] %v4505_v50  ;;  %v4359_v39 = vmul.f32 %v7191_v16, %v4209_v2  ;;  %v4361_v0 = vmul.f32 %v7193_v21, %v4211_v57  ;;  %v4210_v33 = vmul.f32 %v3805_v17, %v8194_v3  ;;  %v4212_v29 = vmul.f32 %v4062_v9, %v8195_v15  ;;  %v8203_v50 = vld [vmem:[#allocation47_spill] sm:$0xff]  ;;  %v8205_v17 = vld [vmem:[#allocation49_spill] sm:$0xff] }
 0x455   : > { %4635 = vst [vmem:[%s7217_s25 + $0x290] sm:$0xff] %v4507_v47  ;;  %v4506_v52 = vadd.f32 %v7206_v13, %v4356_v30  ;;  %v4508_v54 = vadd.f32 %v7208_v12, %v4358_v7  ;;  %v3809_v20 = vpop.f32.mrf.mxu0  ;;  %v4066_v4 = vpop.f32.mrf.mxu1  ;;  %v8204_v30 = vld [vmem:[#allocation48_spill] sm:$0xff] }
 0x456   : > { %v4509_v49 = vadd.f32 %v7195_v37, %v4359_v39  ;;  %v4511_v46 = vadd.f32 %v7197_v18, %v4361_v0  ;;  %v4360_v63 = vmul.f32 %v7202_v44, %v4210_v33  ;;  %v4362_v11 = vmul.f32 %v7204_v19, %v4212_v29 }
 0x457   : > { %4634 = vst [vmem:[%s7217_s25 + $0x288] sm:$0xff] %v4506_v52  ;;  %4636 = vst [vmem:[%s7217_s25 + $0x298] sm:$0xff] %v4508_v54  ;;  %v4213_v14 = vmul.f32 %v3809_v20, %v8196_v28  ;;  %v4215_v27 = vmul.f32 %v4066_v4, %v8197_v51  ;;  %v3811_v23 = vpop.f32.mrf.mxu0  ;;  %v4068_v5 = vpop.f32.mrf.mxu1  ;;  %v8206_v52 = vld [vmem:[#allocation50_spill] sm:$0xff]  ;;  %v8207_v20 = vld [vmem:[#allocation51_spill] sm:$0xff] }
 0x458   : > { %4637 = vst [vmem:[%s7217_s25 + $0x2a0] sm:$0xff] %v4509_v49  ;;  %4639 = vst [vmem:[%s7217_s25 + $0x2b0] sm:$0xff] %v4511_v46  ;;  %v4510_v61 = vadd.f32 %v7206_v13, %v4360_v63  ;;  %v4512_v38 = vadd.f32 %v7208_v12, %v4362_v11  ;;  %v4214_v31 = vmul.f32 %v3811_v23, %v8198_v36  ;;  %v8208_v23 = vld [vmem:[#allocation52_spill] sm:$0xff] }
 0x459   : > { %v4216_v58 = vmul.f32 %v4068_v5, %v8199_v56  ;;  %v4363_v43 = vmul.f32 %v7191_v16, %v4213_v14  ;;  %v4365_v24 = vmul.f32 %v7193_v21, %v4215_v27  ;;  %v3815_v35 = vpop.f32.mrf.mxu0  ;;  %v4072_v10 = vpop.f32.mrf.mxu1 }
 0x45a   : > { %4638 = vst [vmem:[%s7217_s25 + $0x2a8] sm:$0xff] %v4510_v61  ;;  %4640 = vst [vmem:[%s7217_s25 + $0x2b8] sm:$0xff] %v4512_v38  ;;  %v4364_v53 = vmul.f32 %v7202_v44, %v4214_v31  ;;  %v4217_v1 = vmul.f32 %v3815_v35, %v8200_v45  ;;  %v4219_v40 = vmul.f32 %v4072_v10, %v8201_v32  ;;  %v8209_v61 = vld [vmem:[#allocation53_spill] sm:$0xff]  ;;  %v8211_v35 = vld [vmem:[#allocation55_spill] sm:$0xff] }
 0x45b   : > { %v4366_v25 = vmul.f32 %v7204_v19, %v4216_v58  ;;  %v4513_v8 = vadd.f32 %v7195_v37, %v4363_v43  ;;  %v4515_v41 = vadd.f32 %v7197_v18, %v4365_v24  ;;  %v3817_v42 = vpop.f32.mrf.mxu0  ;;  %v4074_v59 = vpop.f32.mrf.mxu1  ;;  %v8210_v43 = vld [vmem:[#allocation54_spill] sm:$0xff] }
 0x45c   : > { %v4514_v22 = vadd.f32 %v7206_v13, %v4364_v53  ;;  %v4367_v55 = vmul.f32 %v7191_v16, %v4217_v1  ;;  %v4369_v48 = vmul.f32 %v7193_v21, %v4219_v40  ;;  %v4218_v62 = vmul.f32 %v3817_v42, %v8202_v60  ;;  %v8213_v42 = vld [vmem:[#allocation57_spill] sm:$0xff] }
 0x45d   : > { %v4516_v34 = vadd.f32 %v7208_v12, %v4366_v25  ;;  %4641 = vst [vmem:[%s7217_s25 + $0x2c0] sm:$0xff] %v4513_v8  ;;  %4643 = vst [vmem:[%s7217_s25 + $0x2d0] sm:$0xff] %v4515_v41  ;;  %v4220_v47 = vmul.f32 %v4074_v59, %v8203_v50  ;;  %v3821_v6 = vpop.f32.mrf.mxu0  ;;  %v4078_v2 = vpop.f32.mrf.mxu1  ;;  %v8212_v8 = vld [vmem:[#allocation56_spill] sm:$0xff] }
 0x45e   : > { %4642 = vst [vmem:[%s7217_s25 + $0x2c8] sm:$0xff] %v4514_v22  ;;  %v4517_v26 = vadd.f32 %v7195_v37, %v4367_v55  ;;  %v4519_v57 = vadd.f32 %v7197_v18, %v4369_v48  ;;  %v4221_v7 = vmul.f32 %v3821_v6, %v8204_v30  ;;  %v4223_v9 = vmul.f32 %v4078_v2, %v8205_v17  ;;  %v8214_v6 = vld [vmem:[#allocation58_spill] sm:$0xff] }
 0x45f   : > { %4644 = vst [vmem:[%s7217_s25 + $0x2d8] sm:$0xff] %v4516_v34  ;;  %v4368_v39 = vmul.f32 %v7202_v44, %v4218_v62  ;;  %v4370_v0 = vmul.f32 %v7204_v19, %v4220_v47  ;;  %v3823_v3 = vpop.f32.mrf.mxu0  ;;  %v4080_v33 = vpop.f32.mrf.mxu1 }
 0x460   : > { %4645 = vst [vmem:[%s7217_s25 + $0x2e0] sm:$0xff] %v4517_v26  ;;  %4647 = vst [vmem:[%s7217_s25 + $0x2f0] sm:$0xff] %v4519_v57  ;;  %v4371_v15 = vmul.f32 %v7191_v16, %v4221_v7  ;;  %v4373_v29 = vmul.f32 %v7193_v21, %v4223_v9  ;;  %v4222_v54 = vmul.f32 %v3823_v3, %v8206_v52  ;;  %v8215_v26 = vld [vmem:[#allocation59_spill] sm:$0xff]  ;;  %v8217_v3 = vld [vmem:[#allocation61_spill] sm:$0xff] }
 0x461   : > { %v4224_v4 = vmul.f32 %v4080_v33, %v8207_v20  ;;  %v4518_v49 = vadd.f32 %v7206_v13, %v4368_v39  ;;  %v4520_v46 = vadd.f32 %v7208_v12, %v4370_v0  ;;  %v3827_v63 = vpop.f32.mrf.mxu0  ;;  %v4084_v11 = vpop.f32.mrf.mxu1  ;;  %v8216_v39 = vld [vmem:[#allocation60_spill] sm:$0xff] }
 0x462   : > { %v4521_v28 = vadd.f32 %v7195_v37, %v4371_v15  ;;  %v4523_v14 = vadd.f32 %v7197_v18, %v4373_v29  ;;  %v4372_v51 = vmul.f32 %v7202_v44, %v4222_v54  ;;  %v4225_v5 = vmul.f32 %v3827_v63, %v8208_v23  ;;  %v8219_v63 = vld [vmem:[#allocation63_spill] sm:$0xff] }
 0x463   : > { %v4374_v27 = vmul.f32 %v7204_v19, %v4224_v4  ;;  %4646 = vst [vmem:[%s7217_s25 + $0x2e8] sm:$0xff] %v4518_v49  ;;  %4648 = vst [vmem:[%s7217_s25 + $0x2f8] sm:$0xff] %v4520_v46  ;;  %v4227_v38 = vmul.f32 %v4084_v11, %v8209_v61  ;;  %v3829_v36 = vpop.f32.mrf.mxu0  ;;  %v4086_v31 = vpop.f32.mrf.mxu1  ;;  %v8218_v49 = vld [vmem:[#allocation62_spill] sm:$0xff] }
 0x464   : > { %4649 = vst [vmem:[%s7217_s25 + $0x300] sm:$0xff] %v4521_v28  ;;  %4651 = vst [vmem:[%s7217_s25 + $0x310] sm:$0xff] %v4523_v14  ;;  %v4522_v56 = vadd.f32 %v7206_v13, %v4372_v51  ;;  %v4226_v24 = vmul.f32 %v3829_v36, %v8210_v43  ;;  %v4228_v10 = vmul.f32 %v4086_v31, %v8211_v35  ;;  %v8220_v36 = vld [vmem:[#allocation64_spill] sm:$0xff] }
 0x465   : > { %v4524_v58 = vadd.f32 %v7208_v12, %v4374_v27  ;;  %v4375_v53 = vmul.f32 %v7191_v16, %v4225_v5  ;;  %v4377_v25 = vmul.f32 %v7193_v21, %v4227_v38  ;;  %v3833_v45 = vpop.f32.mrf.mxu0  ;;  %v4090_v1 = vpop.f32.mrf.mxu1 }
 0x466   : > { %4650 = vst [vmem:[%s7217_s25 + $0x308] sm:$0xff] %v4522_v56  ;;  %v4376_v32 = vmul.f32 %v7202_v44, %v4226_v24  ;;  %v4378_v40 = vmul.f32 %v7204_v19, %v4228_v10  ;;  %v4229_v41 = vmul.f32 %v3833_v45, %v8212_v8  ;;  %v4231_v59 = vmul.f32 %v4090_v1, %v8213_v42  ;;  %v8221_v56 = vld [vmem:[#allocation65_spill] sm:$0xff]  ;;  %v8223_v45 = vld [vmem:[#allocation67_spill] sm:$0xff] }
 0x467   : > { %4652 = vst [vmem:[%s7217_s25 + $0x318] sm:$0xff] %v4524_v58  ;;  %v4525_v22 = vadd.f32 %v7195_v37, %v4375_v53  ;;  %v4527_v34 = vadd.f32 %v7197_v18, %v4377_v25  ;;  %v3835_v55 = vpop.f32.mrf.mxu0  ;;  %v4092_v48 = vpop.f32.mrf.mxu1  ;;  %v8222_v53 = vld [vmem:[#allocation66_spill] sm:$0xff] }
 0x468   : > { %v4526_v60 = vadd.f32 %v7206_v13, %v4376_v32  ;;  %v4528_v62 = vadd.f32 %v7208_v12, %v4378_v40  ;;  %v4379_v50 = vmul.f32 %v7191_v16, %v4229_v41  ;;  %v4381_v47 = vmul.f32 %v7193_v21, %v4231_v59 }
 0x469   : > { %4653 = vst [vmem:[%s7217_s25 + $0x320] sm:$0xff] %v4525_v22  ;;  %4655 = vst [vmem:[%s7217_s25 + $0x330] sm:$0xff] %v4527_v34  ;;  %v4230_v2 = vmul.f32 %v3835_v55, %v8214_v6  ;;  %v4232_v57 = vmul.f32 %v4092_v48, %v8215_v26  ;;  %v3839_v30 = vpop.f32.mrf.mxu0  ;;  %v4096_v7 = vpop.f32.mrf.mxu1  ;;  %v8224_v22 = vld [vmem:[#allocation68_spill] sm:$0xff]  ;;  %v8225_v55 = vld [vmem:[#allocation69_spill] sm:$0xff] }
 0x46a   : > { %4654 = vst [vmem:[%s7217_s25 + $0x328] sm:$0xff] %v4526_v60  ;;  %4656 = vst [vmem:[%s7217_s25 + $0x338] sm:$0xff] %v4528_v62  ;;  %v4529_v17 = vadd.f32 %v7195_v37, %v4379_v50  ;;  %v4531_v9 = vadd.f32 %v7197_v18, %v4381_v47  ;;  %v4233_v0 = vmul.f32 %v3839_v30, %v8216_v39  ;;  %v8226_v30 = vld [vmem:[#allocation70_spill] sm:$0xff] }
 0x46b   : > { %v4235_v33 = vmul.f32 %v4096_v7, %v8217_v3  ;;  %v4380_v15 = vmul.f32 %v7202_v44, %v4230_v2  ;;  %v4382_v29 = vmul.f32 %v7204_v19, %v4232_v57  ;;  %v3841_v52 = vpop.f32.mrf.mxu0  ;;  %v4098_v54 = vpop.f32.mrf.mxu1 }
 0x46c   : > { %4657 = vst [vmem:[%s7217_s25 + $0x340] sm:$0xff] %v4529_v17  ;;  %4659 = vst [vmem:[%s7217_s25 + $0x350] sm:$0xff] %v4531_v9  ;;  %v4383_v20 = vmul.f32 %v7191_v16, %v4233_v0  ;;  %v4234_v46 = vmul.f32 %v3841_v52, %v8218_v49  ;;  %v4236_v11 = vmul.f32 %v4098_v54, %v8219_v63  ;;  %v8227_v17 = vld [vmem:[#allocation71_spill] sm:$0xff]  ;;  %v8229_v52 = vld [vmem:[#allocation73_spill] sm:$0xff] }
 0x46d   : > { %v4385_v4 = vmul.f32 %v7193_v21, %v4235_v33  ;;  %v4530_v28 = vadd.f32 %v7206_v13, %v4380_v15  ;;  %v4532_v14 = vadd.f32 %v7208_v12, %v4382_v29  ;;  %v3845_v51 = vpop.f32.mrf.mxu0  ;;  %v4102_v27 = vpop.f32.mrf.mxu1  ;;  %v8228_v15 = vld [vmem:[#allocation72_spill] sm:$0xff] }
 0x46e   : > { %v4533_v23 = vadd.f32 %v7195_v37, %v4383_v20  ;;  %v4384_v61 = vmul.f32 %v7202_v44, %v4234_v46  ;;  %v4386_v38 = vmul.f32 %v7204_v19, %v4236_v11  ;;  %v4237_v31 = vmul.f32 %v3845_v51, %v8220_v36  ;;  %v8231_v51 = vld [vmem:[#allocation75_spill] sm:$0xff] }
 0x46f   : > { %v4535_v5 = vadd.f32 %v7197_v18, %v4385_v4  ;;  %4658 = vst [vmem:[%s7217_s25 + $0x348] sm:$0xff] %v4530_v28  ;;  %4660 = vst [vmem:[%s7217_s25 + $0x358] sm:$0xff] %v4532_v14  ;;  %v4239_v58 = vmul.f32 %v4102_v27, %v8221_v56  ;;  %v3847_v43 = vpop.f32.mrf.mxu0  ;;  %v4104_v24 = vpop.f32.mrf.mxu1  ;;  %v8230_v28 = vld [vmem:[#allocation74_spill] sm:$0xff] }
 0x470   : > { %4661 = vst [vmem:[%s7217_s25 + $0x360] sm:$0xff] %v4533_v23  ;;  %v4534_v35 = vadd.f32 %v7206_v13, %v4384_v61  ;;  %v4536_v10 = vadd.f32 %v7208_v12, %v4386_v38  ;;  %v4238_v25 = vmul.f32 %v3847_v43, %v8222_v53  ;;  %v4240_v1 = vmul.f32 %v4104_v24, %v8223_v45  ;;  %v8232_v43 = vld [vmem:[#allocation76_spill] sm:$0xff] }
 0x471   : > { %4663 = vst [vmem:[%s7217_s25 + $0x370] sm:$0xff] %v4535_v5  ;;  %v4387_v32 = vmul.f32 %v7191_v16, %v4237_v31  ;;  %v4389_v40 = vmul.f32 %v7193_v21, %v4239_v58  ;;  %v3851_v8 = vpop.f32.mrf.mxu0  ;;  %v4108_v41 = vpop.f32.mrf.mxu1 }
 0x472   : > { %4662 = vst [vmem:[%s7217_s25 + $0x368] sm:$0xff] %v4534_v35  ;;  %4664 = vst [vmem:[%s7217_s25 + $0x378] sm:$0xff] %v4536_v10  ;;  %v4388_v42 = vmul.f32 %v7202_v44, %v4238_v25  ;;  %v4390_v59 = vmul.f32 %v7204_v19, %v4240_v1  ;;  %v4241_v34 = vmul.f32 %v3851_v8, %v8224_v22  ;;  %v8233_v35 = vld [vmem:[#allocation77_spill] sm:$0xff]  ;;  %v8235_v8 = vld [vmem:[#allocation79_spill] sm:$0xff] }
 0x473   : > { %v4243_v48 = vmul.f32 %v4108_v41, %v8225_v55  ;;  %v4537_v60 = vadd.f32 %v7195_v37, %v4387_v32  ;;  %v4539_v62 = vadd.f32 %v7197_v18, %v4389_v40  ;;  %v3853_v50 = vpop.f32.mrf.mxu0  ;;  %v4110_v47 = vpop.f32.mrf.mxu1  ;;  %v8234_v32 = vld [vmem:[#allocation78_spill] sm:$0xff] }
 0x474   : > { %v4538_v6 = vadd.f32 %v7206_v13, %v4388_v42  ;;  %v4540_v2 = vadd.f32 %v7208_v12, %v4390_v59  ;;  %v4391_v26 = vmul.f32 %v7191_v16, %v4241_v34  ;;  %v4242_v7 = vmul.f32 %v3853_v50, %v8226_v30 }
 0x475   : > { %v4393_v57 = vmul.f32 %v7193_v21, %v4243_v48  ;;  %4665 = vst [vmem:[%s7217_s25 + $0x380] sm:$0xff] %v4537_v60  ;;  %4667 = vst [vmem:[%s7217_s25 + $0x390] sm:$0xff] %v4539_v62  ;;  %v4244_v9 = vmul.f32 %v4110_v47, %v8227_v17  ;;  %v3857_v39 = vpop.f32.mrf.mxu0  ;;  %v4114_v0 = vpop.f32.mrf.mxu1 }
 0x476   : > { %4666 = vst [vmem:[%s7217_s25 + $0x388] sm:$0xff] %v4538_v6  ;;  %4668 = vst [vmem:[%s7217_s25 + $0x398] sm:$0xff] %v4540_v2  ;;  %v4541_v3 = vadd.f32 %v7195_v37, %v4391_v26  ;;  %v4245_v29 = vmul.f32 %v3857_v39, %v8228_v15  ;;  %v4247_v54 = vmul.f32 %v4114_v0, %v8229_v52 }
 0x477   : > { %v4543_v33 = vadd.f32 %v7197_v18, %v4393_v57  ;;  %v4392_v20 = vmul.f32 %v7202_v44, %v4242_v7  ;;  %v4394_v4 = vmul.f32 %v7204_v19, %v4244_v9  ;;  %v3859_v49 = vpop.f32.mrf.mxu0  ;;  %v4116_v46 = vpop.f32.mrf.mxu1 }
 0x478   : > { %4669 = vst [vmem:[%s7217_s25 + $0x3a0] sm:$0xff] %v4541_v3  ;;  %v4395_v63 = vmul.f32 %v7191_v16, %v4245_v29  ;;  %v4397_v11 = vmul.f32 %v7193_v21, %v4247_v54  ;;  %v4246_v14 = vmul.f32 %v3859_v49, %v8230_v28  ;;  %v4248_v27 = vmul.f32 %v4116_v46, %v8231_v51 }
 0x479   : > { %4671 = vst [vmem:[%s7217_s25 + $0x3b0] sm:$0xff] %v4543_v33  ;;  %v4542_v23 = vadd.f32 %v7206_v13, %v4392_v20  ;;  %v4544_v5 = vadd.f32 %v7208_v12, %v4394_v4  ;;  %v3863_v61 = vpop.f32.mrf.mxu0  ;;  %v4120_v38 = vpop.f32.mrf.mxu1 }
 0x47a   : > { %v4545_v36 = vadd.f32 %v7195_v37, %v4395_v63  ;;  %v4547_v31 = vadd.f32 %v7197_v18, %v4397_v11  ;;  %v4396_v56 = vmul.f32 %v7202_v44, %v4246_v14  ;;  %v4398_v58 = vmul.f32 %v7204_v19, %v4248_v27 }
 0x47b   : > { %4670 = vst [vmem:[%s7217_s25 + $0x3a8] sm:$0xff] %v4542_v23  ;;  %4672 = vst [vmem:[%s7217_s25 + $0x3b8] sm:$0xff] %v4544_v5  ;;  %v4249_v24 = vmul.f32 %v3863_v61, %v8232_v43  ;;  %v4251_v10 = vmul.f32 %v4120_v38, %v8233_v35  ;;  %v3865_v53 = vpop.f32.mrf.mxu0  ;;  %v4122_v25 = vpop.f32.mrf.mxu1 }
 0x47c   : > { %4673 = vst [vmem:[%s7217_s25 + $0x3c0] sm:$0xff] %v4545_v36  ;;  %4675 = vst [vmem:[%s7217_s25 + $0x3d0] sm:$0xff] %v4547_v31  ;;  %v4546_v45 = vadd.f32 %v7206_v13, %v4396_v56  ;;  %v4548_v1 = vadd.f32 %v7208_v12, %v4398_v58  ;;  %v4250_v40 = vmul.f32 %v3865_v53, %v8234_v32 }
 0x47d   : > { %v4252_v41 = vmul.f32 %v4122_v25, %v8235_v8  ;;  %v4399_v42 = vmul.f32 %v7191_v16, %v4249_v24  ;;  %v4401_v59 = vmul.f32 %v7193_v21, %v4251_v10 }
 0x47e   : > { %4674 = vst [vmem:[%s7217_s25 + $0x3c8] sm:$0xff] %v4546_v45  ;;  %4676 = vst [vmem:[%s7217_s25 + $0x3d8] sm:$0xff] %v4548_v1  ;;  %v4400_v22 = vmul.f32 %v7202_v44, %v4250_v40 }
 0x47f   : > { %v4402_v34 = vmul.f32 %v7204_v19, %v4252_v41  ;;  %v4549_v55 = vadd.f32 %v7195_v37, %v4399_v42  ;;  %v4551_v48 = vadd.f32 %v7197_v18, %v4401_v59 }
 0x480   : > { %v4550_v60 = vadd.f32 %v7206_v13, %v4400_v22 }
 0x481   : > { %v4552_v62 = vadd.f32 %v7208_v12, %v4402_v34  ;;  %4677 = vst [vmem:[%s7217_s25 + $0x3e0] sm:$0xff] %v4549_v55  ;;  %4679 = vst [vmem:[%s7217_s25 + $0x3f0] sm:$0xff] %v4551_v48 }
 0x482   : > { %4678 = vst [vmem:[%s7217_s25 + $0x3e8] sm:$0xff] %v4550_v60 }
 0x483   : > { %4680 = vst [vmem:[%s7217_s25 + $0x3f8] sm:$0xff] %v4552_v62 }
 0x484 PF: > { %s16_s23 = sadd.s32 1, %s5176_s23   ;;  %s8236_s21 = smov %s5172_s22 }
 0x485   : > { %p13_p5 = scmp.ge.s32.totalorder %s16_s23, 4   ;;  %s8237_s22 = smov %s8239_s24 }
 0x487   :  { %15 = sbr.rel (!%p13_p5) target bundleno = 2 (0x2), region = 85 }

</bundles_post_ra>
